<compile_context>
chip_gen: v7x
topology: tpu7x:2x2x1
jax: 0.10.0
libtpu: 0.0.40
codegen_flags: <defaults>
</compile_context>

<pallas_src>
import functools
import math

import jax
import jax.numpy as jnp
from jax.experimental import pallas as pl
from jax.experimental.pallas import tpu as pltpu


# matmul tile caps (multiples of 128; actual tiles are shrunk to fit the
# per-generation VMEM budget and to minimize padding waste).
_TM_CAP, _TN_CAP, _TK_CAP = 512, 1024, 2048
_INV_SQRT2 = 0.7071067811865476
_SQRT_2_OVER_PI = 0.7978845608028654
_NEG_BIG = -1e30            # finite mask value -> no NaN even if a block is fully masked
_EXACT_SOFTMAX_RECIP = False  # set True for exact 1/l (parity testing)


# ------------------------------- helpers ------------------------------------


def _round_up(x, m):
    return (x + m - 1) // m * m


def _pad2(a, rows, cols):
    pr, pc = rows - a.shape[0], cols - a.shape[1]
    if pr == 0 and pc == 0:
        return a
    return jnp.pad(a, ((0, pr), (0, pc)))


def _pad_axis(a, axis, size):
    pad = size - a.shape[axis]
    if pad == 0:
        return a
    widths = [(0, 0)] * a.ndim
    widths[axis] = (0, pad)
    return jnp.pad(a, widths)


@functools.lru_cache(maxsize=None)
def _vmem_budget_bytes():
    """Working-set budget per generation (v7x: 64 MiB physical; v5e/v6e: 128)."""
    try:
        kind = jax.devices()[0].device_kind.lower()
    except Exception:
        kind = ""
    if "7" in kind:
        return 48 * 1024 * 1024
    return 96 * 1024 * 1024


def _pick_tile(dim, cap, align):
    """Largest tile (multiple of `align`, <= cap) minimizing padding waste."""
    padded = _round_up(dim, align)
    if padded <= cap:
        return padded
    best, best_waste = align, None
    for mult in range(cap // align, 0, -1):
        t = mult * align
        waste = _round_up(padded, t) - padded
        if best_waste is None or waste < best_waste:
            best, best_waste = t, waste
            if waste == 0:
                break
    return best


def _probe_erf():
    """Probe once (eagerly, at import) whether exact erf lowers in Mosaic."""
    def k(x_ref, o_ref):
        o_ref[...] = jax.lax.erf(x_ref[...])
    try:
        x = jnp.zeros((8, 128), jnp.float32)
        out = pl.pallas_call(
            k, out_shape=jax.ShapeDtypeStruct((8, 128), jnp.float32))(x)
        jax.block_until_ready(out)
        return True
    except Exception:
        return False


_ERF_OK = _probe_erf()


def _gelu_f32(y):
    if _ERF_OK:                                   # exact erf GELU (== torch.nn.GELU())
        return 0.5 * y * (1.0 + jax.lax.erf(y * _INV_SQRT2))
    # TODO(synk): tanh-GELU fallback (in-kernel; avoids an HBM round trip) differs
    # from exact erf by <1e-3 and is only used if erf does not lower in Mosaic.
    return 0.5 * y * (1.0 + jnp.tanh(_SQRT_2_OVER_PI * (y + 0.044715 * y * y * y)))


# ----------------------------- Pallas kernels -------------------------------


def _layernorm_kernel(x_ref, g_ref, b_ref, o_ref, *, eps):
    x = x_ref[...].astype(jnp.float32)                       # (tm, D)
    mean = jnp.mean(x, axis=-1, keepdims=True)
    xc = x - mean
    var = jnp.mean(xc * xc, axis=-1, keepdims=True)
    y = xc * jax.lax.rsqrt(var + eps)
    y = y * g_ref[...].astype(jnp.float32) + b_ref[...].astype(jnp.float32)
    o_ref[...] = y.astype(o_ref.dtype)


def layernorm(x, gamma, beta, eps=1e-5):
    B, T, D = x.shape
    M = B * T
    rmult = 16 if jnp.dtype(x.dtype).itemsize < 4 else 8
    tm = _pick_tile(M, 512, rmult)
    Mp = _round_up(M, tm)
    x2 = _pad2(x.reshape(M, D), Mp, D)
    out = pl.pallas_call(
        functools.partial(_layernorm_kernel, eps=eps),
        out_shape=jax.ShapeDtypeStruct((Mp, D), x.dtype),
        grid=(Mp // tm,),
        in_specs=[
            pl.BlockSpec((tm, D), lambda i: (i, 0)),
            pl.BlockSpec((1, D), lambda i: (0, 0)),
            pl.BlockSpec((1, D), lambda i: (0, 0)),
        ],
        out_specs=pl.BlockSpec((tm, D), lambda i: (i, 0)),
        compiler_params=pltpu.CompilerParams(
            dimension_semantics=("parallel",),
            vmem_limit_bytes=int(min(_vmem_budget_bytes(), 32 * 1024 * 1024))),
    )(x2, gamma.reshape(1, D), beta.reshape(1, D))
    return out[:M].reshape(B, T, D)


def _linear_kernel(*refs, has_bias, has_res, activation):
    x_ref, w_ref = refs[0], refs[1]
    i = 2
    b_ref = r_ref = None
    if has_bias:
        b_ref = refs[i]; i += 1
    if has_res:
        r_ref = refs[i]; i += 1
    o_ref, acc_ref = refs[i], refs[i + 1]

    @pl.when(pl.program_id(2) == 0)
    def _():
        acc_ref[...] = jnp.zeros(acc_ref.shape, jnp.float32)

    acc_ref[...] += jnp.dot(x_ref[...], w_ref[...],
                            preferred_element_type=jnp.float32)

    @pl.when(pl.program_id(2) == pl.num_programs(2) - 1)
    def _():
        y = acc_ref[...]
        if has_bias:
            y = y + b_ref[...].astype(jnp.float32)
        if activation == "gelu":
            y = _gelu_f32(y)
        if has_res:                                 # fused residual add
            y = y + r_ref[...].astype(jnp.float32)
        o_ref[...] = y.astype(o_ref.dtype)


def linear(x, w, b=None, *, activation=None, residual=None, out_dtype=None):
    """y = act(x @ w + b) [+ residual];  x: (..., K),  w: (K, N) pre-transposed."""
    lead, K = x.shape[:-1], x.shape[-1]
    N = w.shape[1]
    M = math.prod(lead)
    out_dtype = out_dtype or x.dtype
    in_bytes = jnp.dtype(x.dtype).itemsize
    out_bytes = jnp.dtype(out_dtype).itemsize
    rmult = 16 if in_bytes < 4 else 8
    has_bias = b is not None
    has_res = residual is not None

    budget = _vmem_budget_bytes()

    def usage(tm, tn, tk):
        u = (2 * tm * tk * in_bytes          # x blocks (double-buffered)
             + 2 * tk * tn * in_bytes        # w blocks
             + 2 * tm * tn * out_bytes       # out blocks
             + tm * tn * 4)                  # f32 accumulator
        if has_res:
            u += 2 * tm * tn * in_bytes
        return u

    tm_cap, tn_cap, tk_cap = _TM_CAP, _TN_CAP, _TK_CAP
    while True:
        tm = _pick_tile(M, tm_cap, rmult)
        tn = _pick_tile(N, tn_cap, 128)
        tk = _pick_tile(K, tk_cap, 128)
        if usage(tm, tn, tk) + (8 << 20) <= budget:
            break
        if tk_cap > 256:
            tk_cap //= 2
        elif tn_cap > 256:
            tn_cap //= 2
        elif tm_cap > 64:
            tm_cap //= 2
        else:
            break
    vmem_limit = int(min(budget, max(usage(tm, tn, tk) + (8 << 20), 32 << 20)))

    Mp, Np, Kp = _round_up(M, tm), _round_up(N, tn), _round_up(K, tk)
    x2 = _pad2(x.reshape(M, K), Mp, Kp)
    wp = _pad2(w, Kp, Np)

    in_specs = [
        pl.BlockSpec((tm, tk), lambda i, j, k: (i, k)),
        pl.BlockSpec((tk, tn), lambda i, j, k: (k, j)),
    ]
    args = [x2, wp]
    if has_bias:
        in_specs.append(pl.BlockSpec((1, tn), lambda i, j, k: (0, j)))
        args.append(_pad_axis(b.reshape(1, N), 1, Np))
    if has_res:
        in_specs.append(pl.BlockSpec((tm, tn), lambda i, j, k: (i, j)))
        args.append(_pad2(residual.reshape(M, N), Mp, Np))

    out = pl.pallas_call(
        functools.partial(_linear_kernel, has_bias=has_bias, has_res=has_res,
                          activation=activation),
        out_shape=jax.ShapeDtypeStruct((Mp, Np), out_dtype),
        grid=(Mp // tm, Np // tn, Kp // tk),
        in_specs=in_specs,
        out_specs=pl.BlockSpec((tm, tn), lambda i, j, k: (i, j)),
        scratch_shapes=[pltpu.VMEM((tm, tn), jnp.float32)],
        compiler_params=pltpu.CompilerParams(
            dimension_semantics=("parallel", "parallel", "arbitrary"),
            vmem_limit_bytes=vmem_limit),
    )(*args)

    return out[:M, :N].reshape(*lead, N)


def _mha_kernel(q_ref, k_ref, v_ref, o_ref, m_ref, l_ref, acc_ref, *,
                scale, causal, kv_block, kv_len, hpg, dh, exact_recip):
    kvi = pl.program_id(2)

    @pl.when(kvi == 0)
    def _():
        m_ref[...] = jnp.full(m_ref.shape, _NEG_BIG, jnp.float32)
        l_ref[...] = jnp.zeros(l_ref.shape, jnp.float32)
        acc_ref[...] = jnp.zeros(acc_ref.shape, jnp.float32)

    # softmax scale folded into q once (dh**-0.5 == dh**-0.25 on q and k in torch)
    q = q_ref[0] * scale                               # (T, hpg*dh)
    k = k_ref[0]                                       # (kv_block, hpg*dh)
    v = v_ref[0]
    T = q.shape[0]

    col = kvi * kv_block + jax.lax.broadcasted_iota(jnp.int32, (T, kv_block), 1)
    valid = col < kv_len                               # mask KV padding
    if causal:
        row = jax.lax.broadcasted_iota(jnp.int32, (T, kv_block), 0)
        valid = jnp.logical_and(valid, col <= row)     # causal mask, in-kernel

    for h in range(hpg):                               # static unroll over heads
        sl = slice(h * dh, (h + 1) * dh)
        s = jax.lax.dot_general(q[:, sl], k[:, sl], (((1,), (1,)), ((), ())),
                                preferred_element_type=jnp.float32)
        s = jnp.where(valid, s, _NEG_BIG)              # finite mask -> no NaN path
        m_prev = m_ref[h]
        m_new = jnp.maximum(m_prev, jnp.max(s, axis=-1, keepdims=True))
        alpha = jnp.exp(m_prev - m_new)
        p = jnp.exp(s - m_new)
        l_ref[h] = alpha * l_ref[h] + jnp.sum(p, axis=-1, keepdims=True)
        acc_ref[h] = alpha * acc_ref[h] + jnp.dot(
            p.astype(v.dtype), v[:, sl], preferred_element_type=jnp.float32)
        m_ref[h] = m_new

    @pl.when(kvi == pl.num_programs(2) - 1)
    def _():
        for h in range(hpg):
            l = l_ref[h]
            inv = (1.0 / l) if exact_recip else pl.reciprocal(l, approx=True)
            o_ref[0, :, h * dh:(h + 1) * dh] = (acc_ref[h] * inv).astype(o_ref.dtype)


def mha(q, k, v, n_state, n_head, causal, q_off=0, k_off=0, v_off=0):
    """Flash-style attention reading head blocks directly out of (possibly
    fused) (B, L, W) projection outputs at column offsets *_off.
    Returns (B, T, n_state) in q.dtype.  No head split/merge HBM transposes."""
    B, T = q.shape[:2]
    S = k.shape[1]
    dh = n_state // n_head
    scale = float(dh) ** -0.5

    # heads-per-group: block width must be a multiple of 128 lanes (dense
    # stores, legal BlockSpec over the fused projection arrays).
    hpg = None
    for g in range(1, n_head + 1):
        if n_head % g == 0 and (g * dh) % 128 == 0:
            hpg = g
            break
    if hpg is None:
        # Toy widths (< 128 lanes): fall back to one group over all heads,
        # which requires exactly (B, L, n_state)-shaped inputs.
        q = q[..., q_off:q_off + n_state]
        k = k[..., k_off:k_off + n_state]
        v = v[..., v_off:v_off + n_state]
        q_off = k_off = v_off = 0
        hpg = n_head
    bw = hpg * dh
    n_groups = n_head // hpg
    assert q_off % bw == 0 and k_off % bw == 0 and v_off % bw == 0
    qb0, kb0, vb0 = q_off // bw, k_off // bw, v_off // bw

    # KV tile: full S in one step when it fits (Whisper: always), so the
    # online-softmax rescale happens once and no K/V padding copy is needed.
    max_kv = 2048
    if S <= max_kv:
        n_kv, kv_block, Sp = 1, S, S
    else:
        n_kv = math.ceil(S / max_kv)
        kv_block = _round_up(math.ceil(S / n_kv), 128)
        Sp = kv_block * n_kv
    kp = _pad_axis(k, 1, Sp)
    vp = kp if v is k else _pad_axis(v, 1, Sp)

    out = pl.pallas_call(
        functools.partial(_mha_kernel, scale=scale, causal=causal,
                          kv_block=kv_block, kv_len=S, hpg=hpg, dh=dh,
                          exact_recip=_EXACT_SOFTMAX_RECIP),
        out_shape=jax.ShapeDtypeStruct((B, T, n_state), q.dtype),
        grid=(B, n_groups, n_kv),
        in_specs=[
            pl.BlockSpec((1, T, bw), lambda b, hp, s: (b, 0, qb0 + hp)),
            pl.BlockSpec((1, kv_block, bw), lambda b, hp, s: (b, s, kb0 + hp)),
            pl.BlockSpec((1, kv_block, bw), lambda b, hp, s: (b, s, vb0 + hp)),
        ],
        out_specs=pl.BlockSpec((1, T, bw), lambda b, hp, s: (b, 0, hp)),
        scratch_shapes=[pltpu.VMEM((hpg, T, 1), jnp.float32),
                        pltpu.VMEM((hpg, T, 1), jnp.float32),
                        pltpu.VMEM((hpg, T, dh), jnp.float32)],
        compiler_params=pltpu.CompilerParams(
            dimension_semantics=("parallel", "parallel", "arbitrary"),
            vmem_limit_bytes=int(min(_vmem_budget_bytes(), 32 * 1024 * 1024))),
    )(q, kp, vp)
    return out


# --------------------------- parameter creation ------------------------------


def init_params(key, n_vocab, n_ctx, n_state, n_layer):
    def nrm(k, shape, scale=0.02):
        return scale * jax.random.normal(k, shape, dtype=jnp.float32)

    D, Dm = n_state, 4 * n_state
    keys = iter(jax.random.split(key, 4 + n_layer * 24))
    emb = nrm(next(keys), (n_vocab, D))
    params = {
        "token_embedding": emb,                       # (V, D) for the gather
        "token_embedding_t": jnp.transpose(emb),      # (D, V) pre-transposed once
        "pos_emb": nrm(next(keys), (n_ctx, D)),
        "ln_g": 1.0 + nrm(next(keys), (D,)),
        "ln_b": nrm(next(keys), (D,)),
        "blocks": [],
    }
    for _ in range(n_layer):
        q_w, k_w, v_w = (nrm(next(keys), (D, D)) for _ in range(3))
        q_b, v_b = nrm(next(keys), (D,)), nrm(next(keys), (D,))
        ck_w, cv_w = nrm(next(keys), (D, D)), nrm(next(keys), (D, D))
        cv_b = nrm(next(keys), (D,))
        blk = {
            "attn_ln_g": 1.0 + nrm(next(keys), (D,)),
            "attn_ln_b": nrm(next(keys), (D,)),
            # fused QKV projection; key projection has no bias in Whisper.
            "attn_qkv_w": jnp.concatenate([q_w, k_w, v_w], axis=1),
            "attn_qkv_b": jnp.concatenate(
                [q_b, jnp.zeros((D,), jnp.float32), v_b]),
            "attn_o_w": nrm(next(keys), (D, D)),
            "attn_o_b": nrm(next(keys), (D,)),
            "cross_ln_g": 1.0 + nrm(next(keys), (D,)),
            "cross_ln_b": nrm(next(keys), (D,)),
            "cross_q_w": nrm(next(keys), (D, D)),
            "cross_q_b": nrm(next(keys), (D,)),
            # fused cross K/V projection applied to the audio features.
            "cross_kv_w": jnp.concatenate([ck_w, cv_w], axis=1),
            "cross_kv_b": jnp.concatenate(
                [jnp.zeros((D,), jnp.float32), cv_b]),
            "cross_o_w": nrm(next(keys), (D, D)),
            "cross_o_b": nrm(next(keys), (D,)),
            "mlp_ln_g": 1.0 + nrm(next(keys), (D,)),
            "mlp_ln_b": nrm(next(keys), (D,)),
            "mlp1_w": nrm(next(keys), (D, Dm)),
            "mlp1_b": nrm(next(keys), (Dm,)),
            "mlp2_w": nrm(next(keys), (Dm, D)),
            "mlp2_b": nrm(next(keys), (D,)),
        }
        params["blocks"].append(blk)
    return params


# ------------------------------ forward pass ---------------------------------


def text_decoder_forward(params, tokens, xa, n_head):
    """tokens: (B, T) int32 ; xa: (B, S_audio, n_state) -> logits (B, T, V) f32."""
    B, T = tokens.shape
    dtype = xa.dtype
    emb = params["token_embedding"]                                # (V, D) f32
    D = emb.shape[1]

    x = jnp.take(emb, tokens, axis=0) + params["pos_emb"][:T]      # offset = 0
    x = x.astype(dtype)

    for blk in params["blocks"]:
        # ---- masked self-attention: fused QKV projection; attention reads
        #      head blocks straight out of the fused output (no slice copies),
        #      residual fused into the out-projection epilogue ----
        xn = layernorm(x, blk["attn_ln_g"], blk["attn_ln_b"])
        qkv = linear(xn, blk["attn_qkv_w"].astype(dtype), blk["attn_qkv_b"])
        att = mha(qkv, qkv, qkv, D, n_head, causal=True,
                  q_off=0, k_off=D, v_off=2 * D)
        x = linear(att, blk["attn_o_w"].astype(dtype), blk["attn_o_b"],
                   residual=x)

        # ---- cross-attention over audio features (fused KV, no mask) ----
        xn = layernorm(x, blk["cross_ln_g"], blk["cross_ln_b"])
        q = linear(xn, blk["cross_q_w"].astype(dtype), blk["cross_q_b"])
        kv = linear(xa, blk["cross_kv_w"].astype(dtype), blk["cross_kv_b"])
        att = mha(q, kv, kv, D, n_head, causal=False, k_off=0, v_off=D)
        x = linear(att, blk["cross_o_w"].astype(dtype), blk["cross_o_b"],
                   residual=x)

        # ---- MLP: fused GELU epilogue in mlp1, fused residual in mlp2 ----
        xn = layernorm(x, blk["mlp_ln_g"], blk["mlp_ln_b"])
        h = linear(xn, blk["mlp1_w"].astype(dtype), blk["mlp1_b"],
                   activation="gelu")
        x = linear(h, blk["mlp2_w"].astype(dtype), blk["mlp2_b"], residual=x)

    x = layernorm(x, params["ln_g"], params["ln_b"])
    # tied-embedding logits via the standard MXU linear on the pre-transposed
    # (D, V) embedding (no in-kernel RHS transpose), f32 output.
    # TODO(synk): for autoregressive decoding, slice x to the last position
    # before this matmul; kept full-T here to match the module's semantics.
    return linear(x, params["token_embedding_t"].astype(dtype), None,
                  out_dtype=jnp.float32)


# ----------------------------------- main ------------------------------------


if __name__ == "__main__":
    # small but representative: dh = 256/4 = 64 (Whisper's head dim), so the
    # 128-lane head-pair attention path is exercised.
    n_vocab, n_ctx, n_state, n_head, n_layer = 64, 8, 256, 4, 2
    batch, n_audio_ctx = 2, 16

    key = jax.random.PRNGKey(0)
    k_par, k_tok, k_aud = jax.random.split(key, 3)

    params = init_params(k_par, n_vocab, n_ctx, n_state, n_layer)
    tokens = jax.random.randint(k_tok, (batch, n_ctx), 0, n_vocab,
                                dtype=jnp.int32)
    xa = jax.random.normal(k_aud, (batch, n_audio_ctx, n_state),
                           dtype=jnp.float32).astype(jnp.bfloat16)

    fwd = jax.jit(text_decoder_forward, static_argnames=("n_head",))
    logits = fwd(params, tokens, xa, n_head=n_head)
    jax.block_until_ready(logits)

    assert logits.shape == (batch, n_ctx, n_vocab)
    assert logits.dtype == jnp.float32
    assert bool(jnp.all(jnp.isfinite(logits)))
    print("KERNEL_OK")
</pallas_src>

<mosaic_0001>
module attributes {stable_mosaic.version = 11 : i64} {
  func.func @k(%arg0: memref<8x128xf32, #tpu.memory_space<vmem>>, %arg1: memref<8x128xf32, #tpu.memory_space<vmem>>) attributes {dimension_semantics = [], scalar_prefetch = 0 : i64, scratch_operands = 0 : i64, tpu.core_type = #tpu.core_type<tc>} {
    %c0 = arith.constant 0 : index
    %c0_0 = arith.constant 0 : index
    %0 = vector.load %arg0[%c0, %c0_0] : memref<8x128xf32, #tpu.memory_space<vmem>>, vector<8x128xf32>
    %1 = math.erf %0 : vector<8x128xf32>
    %c0_1 = arith.constant 0 : index
    %c0_2 = arith.constant 0 : index
    %2 = vector.load %arg1[%c0_1, %c0_2] : memref<8x128xf32, #tpu.memory_space<vmem>>, vector<8x128xf32>
    tpu.vector_store %arg1[%c0_1, %c0_2], %1 {strides = array<i32>} : memref<8x128xf32, #tpu.memory_space<vmem>>, vector<8x128xf32>,
    return
  }
}

module attributes {stable_mosaic.version = 11 : i64} {
  func.func @_layernorm_kernel(%arg0: i32, %arg1: memref<16x256xbf16, #tpu.memory_space<vmem>>, %arg2: memref<1x256xf32, #tpu.memory_space<vmem>>, %arg3: memref<1x256xf32, #tpu.memory_space<vmem>>, %arg4: memref<16x256xbf16, #tpu.memory_space<vmem>>) attributes {dimension_semantics = [#tpu.dimension_semantics<parallel>], iteration_bounds = array<i64: 1>, scalar_prefetch = 0 : i64, scratch_operands = 0 : i64, tpu.core_type = #tpu.core_type<tc>, window_params = [{transform_indices = @transform_0, window_bounds = array<i64: 16, 256>}, {pipeline_mode = #tpu.pipeline_mode<synchronous>, transform_indices = @transform_1, window_bounds = array<i64: 1, 256>}, {pipeline_mode = #tpu.pipeline_mode<synchronous>, transform_indices = @transform_2, window_bounds = array<i64: 1, 256>}, {transform_indices = @transform_3, window_bounds = array<i64: 16, 256>}]} {
    %c0 = arith.constant 0 : index
    %c0_0 = arith.constant 0 : index
    %0 = vector.load %arg1[%c0, %c0_0] : memref<16x256xbf16, #tpu.memory_space<vmem>>, vector<16x256xbf16>
    %1 = arith.extf %0 : vector<16x256xbf16> to vector<16x256xf32>
    %cst = arith.constant dense<0.000000e+00> : vector<16xf32>
    %2 = vector.multi_reduction <add>, %1, %cst [1] : vector<16x256xf32> to vector<16xf32>
    %3 = vector.shape_cast %2 : vector<16xf32> to vector<16x1xf32>
    %cst_1 = arith.constant 2.560000e+02 : f32
    %4 = vector.broadcast %cst_1 : f32 to vector<16x1xf32>
    %5 = arith.divf %3, %4 : vector<16x1xf32>
    %6 = vector.broadcast %5 : vector<16x1xf32> to vector<16x256xf32>
    %7 = arith.subf %1, %6 : vector<16x256xf32>
    %8 = arith.mulf %7, %7 : vector<16x256xf32>
    %cst_2 = arith.constant dense<0.000000e+00> : vector<16xf32>
    %9 = vector.multi_reduction <add>, %8, %cst_2 [1] : vector<16x256xf32> to vector<16xf32>
    %10 = vector.shape_cast %9 : vector<16xf32> to vector<16x1xf32>
    %cst_3 = arith.constant 2.560000e+02 : f32
    %11 = vector.broadcast %cst_3 : f32 to vector<16x1xf32>
    %12 = arith.divf %10, %11 : vector<16x1xf32>
    %cst_4 = arith.constant 9.99999974E-6 : f32
    %13 = vector.broadcast %cst_4 : f32 to vector<16x1xf32>
    %14 = arith.addf %12, %13 : vector<16x1xf32>
    %15 = math.rsqrt %14 : vector<16x1xf32>
    %16 = vector.broadcast %15 : vector<16x1xf32> to vector<16x256xf32>
    %17 = arith.mulf %7, %16 : vector<16x256xf32>
    %c0_5 = arith.constant 0 : index
    %c0_6 = arith.constant 0 : index
    %18 = vector.load %arg2[%c0_5, %c0_6] : memref<1x256xf32, #tpu.memory_space<vmem>>, vector<1x256xf32>
    %19 = vector.broadcast %18 : vector<1x256xf32> to vector<16x256xf32>
    %20 = arith.mulf %17, %19 : vector<16x256xf32>
    %c0_7 = arith.constant 0 : index
    %c0_8 = arith.constant 0 : index
    %21 = vector.load %arg3[%c0_7, %c0_8] : memref<1x256xf32, #tpu.memory_space<vmem>>, vector<1x256xf32>
    %22 = vector.broadcast %21 : vector<1x256xf32> to vector<16x256xf32>
    %23 = arith.addf %20, %22 : vector<16x256xf32>
    %24 = arith.truncf %23 : vector<16x256xf32> to vector<16x256xbf16>
    %c0_9 = arith.constant 0 : index
    %c0_10 = arith.constant 0 : index
    %25 = vector.load %arg4[%c0_9, %c0_10] : memref<16x256xbf16, #tpu.memory_space<vmem>>, vector<16x256xbf16>
    tpu.vector_store %arg4[%c0_9, %c0_10], %24 {strides = array<i32>} : memref<16x256xbf16, #tpu.memory_space<vmem>>, vector<16x256xbf16>,
    return
  }
  func.func @transform_0(%arg0: i32) -> (i32, i32) {
    %c0_i32 = arith.constant 0 : i32
    %c0_i32_0 = arith.constant 0 : i32
    return %arg0, %c0_i32 : i32, i32
  }
  func.func @transform_1(%arg0: i32) -> (i32, i32) {
    %c0_i32 = arith.constant 0 : i32
    %c0_i32_0 = arith.constant 0 : i32
    %c0_i32_1 = arith.constant 0 : i32
    return %c0_i32, %c0_i32_0 : i32, i32
  }
  func.func @transform_2(%arg0: i32) -> (i32, i32) {
    %c0_i32 = arith.constant 0 : i32
    %c0_i32_0 = arith.constant 0 : i32
    %c0_i32_1 = arith.constant 0 : i32
    return %c0_i32, %c0_i32_0 : i32, i32
  }
  func.func @transform_3(%arg0: i32) -> (i32, i32) {
    %c0_i32 = arith.constant 0 : i32
    %c0_i32_0 = arith.constant 0 : i32
    return %arg0, %c0_i32 : i32, i32
  }
}

module attributes {stable_mosaic.version = 11 : i64} {
  func.func @_linear_kernel(%arg0: i32, %arg1: i32, %arg2: i32, %arg3: memref<16x256xbf16, #tpu.memory_space<vmem>>, %arg4: memref<256x768xbf16, #tpu.memory_space<vmem>>, %arg5: memref<1x768xf32, #tpu.memory_space<vmem>>, %arg6: memref<16x768xbf16, #tpu.memory_space<vmem>>, %arg7: memref<16x768xf32, #tpu.memory_space<vmem>>) attributes {dimension_semantics = [#tpu.dimension_semantics<parallel>, #tpu.dimension_semantics<parallel>, #tpu.dimension_semantics<arbitrary>], iteration_bounds = array<i64: 1, 1, 1>, scalar_prefetch = 0 : i64, scratch_operands = 1 : i64, tpu.core_type = #tpu.core_type<tc>, window_params = [{transform_indices = @transform_0, window_bounds = array<i64: 16, 256>}, {transform_indices = @transform_1, window_bounds = array<i64: 256, 768>}, {transform_indices = @transform_2, window_bounds = array<i64: 1, 768>}, {transform_indices = @transform_3, window_bounds = array<i64: 16, 768>}]} {
    %c0_i32 = arith.constant 0 : i32
    %0 = arith.cmpi eq, %arg2, %c0_i32 : i32
    %1 = arith.extui %0 : i1 to i32
    %c0_i32_0 = arith.constant 0 : i32
    %2 = arith.cmpi ne, %1, %c0_i32_0 : i32
    scf.if %2 {
      %cst_10 = arith.constant 0.000000e+00 : f32
      %12 = vector.broadcast %cst_10 : f32 to vector<16x768xf32>
      %c0_11 = arith.constant 0 : index
      %c0_12 = arith.constant 0 : index
      %13 = vector.load %arg7[%c0_11, %c0_12] : memref<16x768xf32, #tpu.memory_space<vmem>>, vector<16x768xf32>
      tpu.vector_store %arg7[%c0_11, %c0_12], %12 {strides = array<i32>} : memref<16x768xf32, #tpu.memory_space<vmem>>, vector<16x768xf32>,
    } else {
    }
    %c0 = arith.constant 0 : index
    %c0_1 = arith.constant 0 : index
    %3 = vector.load %arg7[%c0, %c0_1] : memref<16x768xf32, #tpu.memory_space<vmem>>, vector<16x768xf32>
    %c0_2 = arith.constant 0 : index
    %c0_3 = arith.constant 0 : index
    %4 = vector.load %arg3[%c0_2, %c0_3] : memref<16x256xbf16, #tpu.memory_space<vmem>>, vector<16x256xbf16>
    %c0_4 = arith.constant 0 : index
    %c0_5 = arith.constant 0 : index
    %5 = vector.load %arg4[%c0_4, %c0_5] : memref<256x768xbf16, #tpu.memory_space<vmem>>, vector<256x768xbf16>
    %cst = arith.constant dense<0.000000e+00> : vector<16x768xf32>
    %6 = tpu.matmul %4, %5, %cst {dimension_numbers = #tpu.dot_dimension_numbers<[1], [0], [0], [1], [0, 0, 1, 1], [], []>} : vector<16x256xbf16>, vector<256x768xbf16>, vector<16x768xf32> -> vector<16x768xf32>
    %7 = arith.addf %3, %6 : vector<16x768xf32>
    %c0_6 = arith.constant 0 : index
    %c0_7 = arith.constant 0 : index
    %8 = vector.load %arg7[%c0_6, %c0_7] : memref<16x768xf32, #tpu.memory_space<vmem>>, vector<16x768xf32>
    tpu.vector_store %arg7[%c0_6, %c0_7], %7 {strides = array<i32>} : memref<16x768xf32, #tpu.memory_space<vmem>>, vector<16x768xf32>,
    %c0_i32_8 = arith.constant 0 : i32
    %9 = arith.cmpi eq, %arg2, %c0_i32_8 : i32
    %10 = arith.extui %9 : i1 to i32
    %c0_i32_9 = arith.constant 0 : i32
    %11 = arith.cmpi ne, %10, %c0_i32_9 : i32
    scf.if %11 {
      %c0_10 = arith.constant 0 : index
      %c0_11 = arith.constant 0 : index
      %12 = vector.load %arg7[%c0_10, %c0_11] : memref<16x768xf32, #tpu.memory_space<vmem>>, vector<16x768xf32>
      %c0_12 = arith.constant 0 : index
      %c0_13 = arith.constant 0 : index
      %13 = vector.load %arg5[%c0_12, %c0_13] : memref<1x768xf32, #tpu.memory_space<vmem>>, vector<1x768xf32>
      %14 = vector.broadcast %13 : vector<1x768xf32> to vector<16x768xf32>
      %15 = arith.addf %12, %14 : vector<16x768xf32>
      %16 = arith.truncf %15 : vector<16x768xf32> to vector<16x768xbf16>
      %c0_14 = arith.constant 0 : index
      %c0_15 = arith.constant 0 : index
      %17 = vector.load %arg6[%c0_14, %c0_15] : memref<16x768xbf16, #tpu.memory_space<vmem>>, vector<16x768xbf16>
      tpu.vector_store %arg6[%c0_14, %c0_15], %16 {strides = array<i32>} : memref<16x768xbf16, #tpu.memory_space<vmem>>, vector<16x768xbf16>,
    } else {
    }
    return
  }
  func.func @transform_0(%arg0: i32, %arg1: i32, %arg2: i32) -> (i32, i32) {
    %c0_i32 = arith.constant 0 : i32
    return %arg0, %arg2 : i32, i32
  }
  func.func @transform_1(%arg0: i32, %arg1: i32, %arg2: i32) -> (i32, i32) {
    %c0_i32 = arith.constant 0 : i32
    return %arg2, %arg1 : i32, i32
  }
  func.func @transform_2(%arg0: i32, %arg1: i32, %arg2: i32) -> (i32, i32) {
    %c0_i32 = arith.constant 0 : i32
    %c0_i32_0 = arith.constant 0 : i32
    return %c0_i32, %arg1 : i32, i32
  }
  func.func @transform_3(%arg0: i32, %arg1: i32, %arg2: i32) -> (i32, i32) {
    %c0_i32 = arith.constant 0 : i32
    return %arg0, %arg1 : i32, i32
  }
}

module attributes {stable_mosaic.version = 11 : i64} {
  func.func @_mha_kernel(%arg0: i32, %arg1: i32, %arg2: i32, %arg3: memref<1x8x128xbf16, #tpu.memory_space<vmem>>, %arg4: memref<1x8x128xbf16, #tpu.memory_space<vmem>>, %arg5: memref<1x8x128xbf16, #tpu.memory_space<vmem>>, %arg6: memref<1x8x128xbf16, #tpu.memory_space<vmem>>, %arg7: memref<2x8x1xf32, #tpu.memory_space<vmem>>, %arg8: memref<2x8x1xf32, #tpu.memory_space<vmem>>, %arg9: memref<2x8x64xf32, #tpu.memory_space<vmem>>) attributes {dimension_semantics = [#tpu.dimension_semantics<parallel>, #tpu.dimension_semantics<parallel>, #tpu.dimension_semantics<arbitrary>], iteration_bounds = array<i64: 2, 2, 1>, scalar_prefetch = 0 : i64, scratch_operands = 3 : i64, tpu.core_type = #tpu.core_type<tc>, window_params = [{transform_indices = @transform_0, window_bounds = array<i64: 1, 8, 128>}, {transform_indices = @transform_1, window_bounds = array<i64: 1, 8, 128>}, {transform_indices = @transform_2, window_bounds = array<i64: 1, 8, 128>}, {transform_indices = @transform_3, window_bounds = array<i64: 1, 8, 128>}]} {
    %c0_i32 = arith.constant 0 : i32
    %0 = arith.cmpi eq, %arg2, %c0_i32 : i32
    %1 = arith.extui %0 : i1 to i32
    %c0_i32_0 = arith.constant 0 : i32
    %2 = arith.cmpi ne, %1, %c0_i32_0 : i32
    scf.if %2 {
      %cst_57 = arith.constant -1.000000e+30 : f32
      %99 = vector.broadcast %cst_57 : f32 to vector<2x8x1xf32>
      %c0_58 = arith.constant 0 : index
      %c0_59 = arith.constant 0 : index
      %c0_60 = arith.constant 0 : index
      %100 = vector.load %arg7[%c0_58, %c0_59, %c0_60] : memref<2x8x1xf32, #tpu.memory_space<vmem>>, vector<2x8x1xf32>
      tpu.vector_store %arg7[%c0_58, %c0_59, %c0_60], %99 {strides = array<i32>} : memref<2x8x1xf32, #tpu.memory_space<vmem>>, vector<2x8x1xf32>,
      %cst_61 = arith.constant 0.000000e+00 : f32
      %101 = vector.broadcast %cst_61 : f32 to vector<2x8x1xf32>
      %c0_62 = arith.constant 0 : index
      %c0_63 = arith.constant 0 : index
      %c0_64 = arith.constant 0 : index
      %102 = vector.load %arg8[%c0_62, %c0_63, %c0_64] : memref<2x8x1xf32, #tpu.memory_space<vmem>>, vector<2x8x1xf32>
      tpu.vector_store %arg8[%c0_62, %c0_63, %c0_64], %101 {strides = array<i32>} : memref<2x8x1xf32, #tpu.memory_space<vmem>>, vector<2x8x1xf32>,
      %cst_65 = arith.constant 0.000000e+00 : f32
      %103 = vector.broadcast %cst_65 : f32 to vector<2x8x64xf32>
      %c0_66 = arith.constant 0 : index
      %c0_67 = arith.constant 0 : index
      %c0_68 = arith.constant 0 : index
      %104 = vector.load %arg9[%c0_66, %c0_67, %c0_68] : memref<2x8x64xf32, #tpu.memory_space<vmem>>, vector<2x8x64xf32>
      tpu.vector_store %arg9[%c0_66, %c0_67, %c0_68], %103 {strides = array<i32>} : memref<2x8x64xf32, #tpu.memory_space<vmem>>, vector<2x8x64xf32>,
    } else {
    }
    %c0 = arith.constant 0 : index
    %c0_1 = arith.constant 0 : index
    %c0_2 = arith.constant 0 : index
    %3 = vector.load %arg3[%c0, %c0_1, %c0_2] : memref<1x8x128xbf16, #tpu.memory_space<vmem>>, vector<1x8x128xbf16>
    %4 = vector.shape_cast %3 : vector<1x8x128xbf16> to vector<8x128xbf16>
    %cst = arith.constant 1.250000e-01 : bf16
    %5 = vector.broadcast %cst : bf16 to vector<8x128xbf16>
    %6 = arith.mulf %4, %5 : vector<8x128xbf16>
    %c0_3 = arith.constant 0 : index
    %c0_4 = arith.constant 0 : index
    %c0_5 = arith.constant 0 : index
    %7 = vector.load %arg4[%c0_3, %c0_4, %c0_5] : memref<1x8x128xbf16, #tpu.memory_space<vmem>>, vector<1x8x128xbf16>
    %8 = vector.shape_cast %7 : vector<1x8x128xbf16> to vector<8x128xbf16>
    %c0_6 = arith.constant 0 : index
    %c0_7 = arith.constant 0 : index
    %c0_8 = arith.constant 0 : index
    %9 = vector.load %arg5[%c0_6, %c0_7, %c0_8] : memref<1x8x128xbf16, #tpu.memory_space<vmem>>, vector<1x8x128xbf16>
    %10 = vector.shape_cast %9 : vector<1x8x128xbf16> to vector<8x128xbf16>
    %c8_i32 = arith.constant 8 : i32
    %11 = arith.muli %arg2, %c8_i32 : i32
    %12 = tpu.iota {dimensions = array<i32: 1>} : vector<8x8xi32>
    %13 = vector.broadcast %11 : i32 to vector<8x8xi32>
    %14 = arith.addi %13, %12 : vector<8x8xi32>
    %c8_i32_9 = arith.constant 8 : i32
    %15 = vector.broadcast %c8_i32_9 : i32 to vector<8x8xi32>
    %16 = arith.cmpi slt, %14, %15 : vector<8x8xi32>
    %17 = tpu.iota {dimensions = array<i32: 0>} : vector<8x8xi32>
    %18 = arith.cmpi sle, %14, %17 : vector<8x8xi32>
    %19 = arith.andi %16, %18 : vector<8x8xi1>
    %20 = vector.extract_strided_slice %6 {offsets = [0, 0], sizes = [8, 64], strides = [1, 1]} : vector<8x128xbf16> to vector<8x64xbf16>
    %21 = vector.extract_strided_slice %8 {offsets = [0, 0], sizes = [8, 64], strides = [1, 1]} : vector<8x128xbf16> to vector<8x64xbf16>
    %cst_10 = arith.constant dense<0.000000e+00> : vector<8x8xf32>
    %22 = tpu.matmul %20, %21, %cst_10 {dimension_numbers = #tpu.dot_dimension_numbers<[1], [1], [0], [0], [0, 0, 1, 0], [], []>} : vector<8x64xbf16>, vector<8x64xbf16>, vector<8x8xf32> -> vector<8x8xf32>
    %cst_11 = arith.constant -1.000000e+30 : f32
    %23 = vector.broadcast %cst_11 : f32 to vector<8x8xf32>
    %24 = arith.select %19, %22, %23 : vector<8x8xi1>, vector<8x8xf32>
    %c0_12 = arith.constant 0 : index
    %c0_13 = arith.constant 0 : index
    %c0_14 = arith.constant 0 : index
    %25 = vector.load %arg7[%c0_12, %c0_13, %c0_14] : memref<2x8x1xf32, #tpu.memory_space<vmem>>, vector<1x8x1xf32>
    %26 = vector.shape_cast %25 : vector<1x8x1xf32> to vector<8x1xf32>
    %cst_15 = arith.constant dense<0xFF800000> : vector<8xf32>
    %27 = vector.multi_reduction <maximumf>, %24, %cst_15 [1] : vector<8x8xf32> to vector<8xf32>
    %28 = vector.shape_cast %27 : vector<8xf32> to vector<8x1xf32>
    %29 = arith.maximumf %26, %28 : vector<8x1xf32>
    %30 = arith.subf %26, %29 : vector<8x1xf32>
    %31 = math.exp %30 : vector<8x1xf32>
    %32 = vector.broadcast %29 : vector<8x1xf32> to vector<8x8xf32>
    %33 = arith.subf %24, %32 : vector<8x8xf32>
    %34 = math.exp %33 : vector<8x8xf32>
    %c0_16 = arith.constant 0 : index
    %c0_17 = arith.constant 0 : index
    %c0_18 = arith.constant 0 : index
    %35 = vector.load %arg8[%c0_16, %c0_17, %c0_18] : memref<2x8x1xf32, #tpu.memory_space<vmem>>, vector<1x8x1xf32>
    %36 = vector.shape_cast %35 : vector<1x8x1xf32> to vector<8x1xf32>
    %37 = arith.mulf %31, %36 : vector<8x1xf32>
    %cst_19 = arith.constant dense<0.000000e+00> : vector<8xf32>
    %38 = vector.multi_reduction <add>, %34, %cst_19 [1] : vector<8x8xf32> to vector<8xf32>
    %39 = vector.shape_cast %38 : vector<8xf32> to vector<8x1xf32>
    %40 = arith.addf %37, %39 : vector<8x1xf32>
    %c0_20 = arith.constant 0 : index
    %c0_21 = arith.constant 0 : index
    %c0_22 = arith.constant 0 : index
    %41 = vector.load %arg8[%c0_20, %c0_21, %c0_22] : memref<2x8x1xf32, #tpu.memory_space<vmem>>, vector<1x8x1xf32>
    %42 = vector.shape_cast %41 : vector<1x8x1xf32> to vector<8x1xf32>
    %43 = vector.shape_cast %40 : vector<8x1xf32> to vector<1x8x1xf32>
    tpu.vector_store %arg8[%c0_20, %c0_21, %c0_22], %43 {strides = array<i32>} : memref<2x8x1xf32, #tpu.memory_space<vmem>>, vector<1x8x1xf32>,
    %c0_23 = arith.constant 0 : index
    %c0_24 = arith.constant 0 : index
    %c0_25 = arith.constant 0 : index
    %44 = vector.load %arg9[%c0_23, %c0_24, %c0_25] : memref<2x8x64xf32, #tpu.memory_space<vmem>>, vector<1x8x64xf32>
    %45 = vector.shape_cast %44 : vector<1x8x64xf32> to vector<8x64xf32>
    %46 = vector.broadcast %31 : vector<8x1xf32> to vector<8x64xf32>
    %47 = arith.mulf %46, %45 : vector<8x64xf32>
    %48 = arith.truncf %34 : vector<8x8xf32> to vector<8x8xbf16>
    %49 = vector.extract_strided_slice %10 {offsets = [0, 0], sizes = [8, 64], strides = [1, 1]} : vector<8x128xbf16> to vector<8x64xbf16>
    %cst_26 = arith.constant dense<0.000000e+00> : vector<8x64xf32>
    %50 = tpu.matmul %48, %49, %cst_26 {dimension_numbers = #tpu.dot_dimension_numbers<[1], [0], [0], [1], [0, 0, 1, 1], [], []>} : vector<8x8xbf16>, vector<8x64xbf16>, vector<8x64xf32> -> vector<8x64xf32>
    %51 = arith.addf %47, %50 : vector<8x64xf32>
    %c0_27 = arith.constant 0 : index
    %c0_28 = arith.constant 0 : index
    %c0_29 = arith.constant 0 : index
    %52 = vector.load %arg9[%c0_27, %c0_28, %c0_29] : memref<2x8x64xf32, #tpu.memory_space<vmem>>, vector<1x8x64xf32>
    %53 = vector.shape_cast %52 : vector<1x8x64xf32> to vector<8x64xf32>
    %54 = vector.shape_cast %51 : vector<8x64xf32> to vector<1x8x64xf32>
    tpu.vector_store %arg9[%c0_27, %c0_28, %c0_29], %54 {strides = array<i32>} : memref<2x8x64xf32, #tpu.memory_space<vmem>>, vector<1x8x64xf32>,
    %c0_30 = arith.constant 0 : index
    %c0_31 = arith.constant 0 : index
    %c0_32 = arith.constant 0 : index
    %55 = vector.load %arg7[%c0_30, %c0_31, %c0_32] : memref<2x8x1xf32, #tpu.memory_space<vmem>>, vector<1x8x1xf32>
    %56 = vector.shape_cast %55 : vector<1x8x1xf32> to vector<8x1xf32>
    %57 = vector.shape_cast %29 : vector<8x1xf32> to vector<1x8x1xf32>
    tpu.vector_store %arg7[%c0_30, %c0_31, %c0_32], %57 {strides = array<i32>} : memref<2x8x1xf32, #tpu.memory_space<vmem>>, vector<1x8x1xf32>,
    %58 = vector.extract_strided_slice %6 {offsets = [0, 64], sizes = [8, 64], strides = [1, 1]} : vector<8x128xbf16> to vector<8x64xbf16>
    %59 = vector.extract_strided_slice %8 {offsets = [0, 64], sizes = [8, 64], strides = [1, 1]} : vector<8x128xbf16> to vector<8x64xbf16>
    %cst_33 = arith.constant dense<0.000000e+00> : vector<8x8xf32>
    %60 = tpu.matmul %58, %59, %cst_33 {dimension_numbers = #tpu.dot_dimension_numbers<[1], [1], [0], [0], [0, 0, 1, 0], [], []>} : vector<8x64xbf16>, vector<8x64xbf16>, vector<8x8xf32> -> vector<8x8xf32>
    %cst_34 = arith.constant -1.000000e+30 : f32
    %61 = vector.broadcast %cst_34 : f32 to vector<8x8xf32>
    %62 = arith.select %19, %60, %61 : vector<8x8xi1>, vector<8x8xf32>
    %c1 = arith.constant 1 : index
    %c0_35 = arith.constant 0 : index
    %c0_36 = arith.constant 0 : index
    %63 = vector.load %arg7[%c1, %c0_35, %c0_36] : memref<2x8x1xf32, #tpu.memory_space<vmem>>, vector<1x8x1xf32>
    %64 = vector.shape_cast %63 : vector<1x8x1xf32> to vector<8x1xf32>
    %cst_37 = arith.constant dense<0xFF800000> : vector<8xf32>
    %65 = vector.multi_reduction <maximumf>, %62, %cst_37 [1] : vector<8x8xf32> to vector<8xf32>
    %66 = vector.shape_cast %65 : vector<8xf32> to vector<8x1xf32>
    %67 = arith.maximumf %64, %66 : vector<8x1xf32>
    %68 = arith.subf %64, %67 : vector<8x1xf32>
    %69 = math.exp %68 : vector<8x1xf32>
    %70 = vector.broadcast %67 : vector<8x1xf32> to vector<8x8xf32>
    %71 = arith.subf %62, %70 : vector<8x8xf32>
    %72 = math.exp %71 : vector<8x8xf32>
    %c1_38 = arith.constant 1 : index
    %c0_39 = arith.constant 0 : index
    %c0_40 = arith.constant 0 : index
    %73 = vector.load %arg8[%c1_38, %c0_39, %c0_40] : memref<2x8x1xf32, #tpu.memory_space<vmem>>, vector<1x8x1xf32>
    %74 = vector.shape_cast %73 : vector<1x8x1xf32> to vector<8x1xf32>
    %75 = arith.mulf %69, %74 : vector<8x1xf32>
    %cst_41 = arith.constant dense<0.000000e+00> : vector<8xf32>
    %76 = vector.multi_reduction <add>, %72, %cst_41 [1] : vector<8x8xf32> to vector<8xf32>
    %77 = vector.shape_cast %76 : vector<8xf32> to vector<8x1xf32>
    %78 = arith.addf %75, %77 : vector<8x1xf32>
    %c1_42 = arith.constant 1 : index
    %c0_43 = arith.constant 0 : index
    %c0_44 = arith.constant 0 : index
    %79 = vector.load %arg8[%c1_42, %c0_43, %c0_44] : memref<2x8x1xf32, #tpu.memory_space<vmem>>, vector<1x8x1xf32>
    %80 = vector.shape_cast %79 : vector<1x8x1xf32> to vector<8x1xf32>
    %81 = vector.shape_cast %78 : vector<8x1xf32> to vector<1x8x1xf32>
    tpu.vector_store %arg8[%c1_42, %c0_43, %c0_44], %81 {strides = array<i32>} : memref<2x8x1xf32, #tpu.memory_space<vmem>>, vector<1x8x1xf32>,
    %c1_45 = arith.constant 1 : index
    %c0_46 = arith.constant 0 : index
    %c0_47 = arith.constant 0 : index
    %82 = vector.load %arg9[%c1_45, %c0_46, %c0_47] : memref<2x8x64xf32, #tpu.memory_space<vmem>>, vector<1x8x64xf32>
    %83 = vector.shape_cast %82 : vector<1x8x64xf32> to vector<8x64xf32>
    %84 = vector.broadcast %69 : vector<8x1xf32> to vector<8x64xf32>
    %85 = arith.mulf %84, %83 : vector<8x64xf32>
    %86 = arith.truncf %72 : vector<8x8xf32> to vector<8x8xbf16>
    %87 = vector.extract_strided_slice %10 {offsets = [0, 64], sizes = [8, 64], strides = [1, 1]} : vector<8x128xbf16> to vector<8x64xbf16>
    %cst_48 = arith.constant dense<0.000000e+00> : vector<8x64xf32>
    %88 = tpu.matmul %86, %87, %cst_48 {dimension_numbers = #tpu.dot_dimension_numbers<[1], [0], [0], [1], [0, 0, 1, 1], [], []>} : vector<8x8xbf16>, vector<8x64xbf16>, vector<8x64xf32> -> vector<8x64xf32>
    %89 = arith.addf %85, %88 : vector<8x64xf32>
    %c1_49 = arith.constant 1 : index
    %c0_50 = arith.constant 0 : index
    %c0_51 = arith.constant 0 : index
    %90 = vector.load %arg9[%c1_49, %c0_50, %c0_51] : memref<2x8x64xf32, #tpu.memory_space<vmem>>, vector<1x8x64xf32>
    %91 = vector.shape_cast %90 : vector<1x8x64xf32> to vector<8x64xf32>
    %92 = vector.shape_cast %89 : vector<8x64xf32> to vector<1x8x64xf32>
    tpu.vector_store %arg9[%c1_49, %c0_50, %c0_51], %92 {strides = array<i32>} : memref<2x8x64xf32, #tpu.memory_space<vmem>>, vector<1x8x64xf32>,
    %c1_52 = arith.constant 1 : index
    %c0_53 = arith.constant 0 : index
    %c0_54 = arith.constant 0 : index
    %93 = vector.load %arg7[%c1_52, %c0_53, %c0_54] : memref<2x8x1xf32, #tpu.memory_space<vmem>>, vector<1x8x1xf32>
    %94 = vector.shape_cast %93 : vector<1x8x1xf32> to vector<8x1xf32>
    %95 = vector.shape_cast %67 : vector<8x1xf32> to vector<1x8x1xf32>
    tpu.vector_store %arg7[%c1_52, %c0_53, %c0_54], %95 {strides = array<i32>} : memref<2x8x1xf32, #tpu.memory_space<vmem>>, vector<1x8x1xf32>,
    %c0_i32_55 = arith.constant 0 : i32
    %96 = arith.cmpi eq, %arg2, %c0_i32_55 : i32
    %97 = arith.extui %96 : i1 to i32
    %c0_i32_56 = arith.constant 0 : i32
    %98 = arith.cmpi ne, %97, %c0_i32_56 : i32
    scf.if %98 {
      %c0_57 = arith.constant 0 : index
      %c0_58 = arith.constant 0 : index
      %c0_59 = arith.constant 0 : index
      %99 = vector.load %arg8[%c0_57, %c0_58, %c0_59] : memref<2x8x1xf32, #tpu.memory_space<vmem>>, vector<1x8x1xf32>
      %100 = vector.shape_cast %99 : vector<1x8x1xf32> to vector<8x1xf32>
      %101 = tpu.reciprocal %100 {approx = true} : vector<8x1xf32> -> vector<8x1xf32>
      %c0_60 = arith.constant 0 : index
      %c0_61 = arith.constant 0 : index
      %c0_62 = arith.constant 0 : index
      %102 = vector.load %arg9[%c0_60, %c0_61, %c0_62] : memref<2x8x64xf32, #tpu.memory_space<vmem>>, vector<1x8x64xf32>
      %103 = vector.shape_cast %102 : vector<1x8x64xf32> to vector<8x64xf32>
      %104 = vector.broadcast %101 : vector<8x1xf32> to vector<8x64xf32>
      %105 = arith.mulf %103, %104 : vector<8x64xf32>
      %106 = arith.truncf %105 : vector<8x64xf32> to vector<8x64xbf16>
      %c0_63 = arith.constant 0 : index
      %c0_64 = arith.constant 0 : index
      %c0_65 = arith.constant 0 : index
      %107 = vector.load %arg6[%c0_63, %c0_64, %c0_65] : memref<1x8x128xbf16, #tpu.memory_space<vmem>>, vector<1x8x64xbf16>
      %108 = vector.shape_cast %107 : vector<1x8x64xbf16> to vector<8x64xbf16>
      %109 = vector.shape_cast %106 : vector<8x64xbf16> to vector<1x8x64xbf16>
      tpu.vector_store %arg6[%c0_63, %c0_64, %c0_65], %109 {strides = array<i32>} : memref<1x8x128xbf16, #tpu.memory_space<vmem>>, vector<1x8x64xbf16>,
      %c1_66 = arith.constant 1 : index
      %c0_67 = arith.constant 0 : index
      %c0_68 = arith.constant 0 : index
      %110 = vector.load %arg8[%c1_66, %c0_67, %c0_68] : memref<2x8x1xf32, #tpu.memory_space<vmem>>, vector<1x8x1xf32>
      %111 = vector.shape_cast %110 : vector<1x8x1xf32> to vector<8x1xf32>
      %112 = tpu.reciprocal %111 {approx = true} : vector<8x1xf32> -> vector<8x1xf32>
      %c1_69 = arith.constant 1 : index
      %c0_70 = arith.constant 0 : index
      %c0_71 = arith.constant 0 : index
      %113 = vector.load %arg9[%c1_69, %c0_70, %c0_71] : memref<2x8x64xf32, #tpu.memory_space<vmem>>, vector<1x8x64xf32>
      %114 = vector.shape_cast %113 : vector<1x8x64xf32> to vector<8x64xf32>
      %115 = vector.broadcast %112 : vector<8x1xf32> to vector<8x64xf32>
      %116 = arith.mulf %114, %115 : vector<8x64xf32>
      %117 = arith.truncf %116 : vector<8x64xf32> to vector<8x64xbf16>
      %c0_72 = arith.constant 0 : index
      %c0_73 = arith.constant 0 : index
      %c64 = arith.constant 64 : index
      %118 = vector.load %arg6[%c0_72, %c0_73, %c64] : memref<1x8x128xbf16, #tpu.memory_space<vmem>>, vector<1x8x64xbf16>
      %119 = vector.shape_cast %118 : vector<1x8x64xbf16> to vector<8x64xbf16>
      %120 = vector.shape_cast %117 : vector<8x64xbf16> to vector<1x8x64xbf16>
      tpu.vector_store %arg6[%c0_72, %c0_73, %c64], %120 {strides = array<i32>} : memref<1x8x128xbf16, #tpu.memory_space<vmem>>, vector<1x8x64xbf16>,
    } else {
    }
    return
  }
  func.func @transform_0(%arg0: i32, %arg1: i32, %arg2: i32) -> (i32, i32, i32) {
    %c0_i32 = arith.constant 0 : i32
    %0 = arith.addi %c0_i32, %arg1 : i32
    %c0_i32_0 = arith.constant 0 : i32
    %c0_i32_1 = arith.constant 0 : i32
    return %arg0, %c0_i32_0, %0 : i32, i32, i32
  }
  func.func @transform_1(%arg0: i32, %arg1: i32, %arg2: i32) -> (i32, i32, i32) {
    %c2_i32 = arith.constant 2 : i32
    %0 = arith.addi %c2_i32, %arg1 : i32
    %c0_i32 = arith.constant 0 : i32
    return %arg0, %arg2, %0 : i32, i32, i32
  }
  func.func @transform_2(%arg0: i32, %arg1: i32, %arg2: i32) -> (i32, i32, i32) {
    %c4_i32 = arith.constant 4 : i32
    %0 = arith.addi %c4_i32, %arg1 : i32
    %c0_i32 = arith.constant 0 : i32
    return %arg0, %arg2, %0 : i32, i32, i32
  }
  func.func @transform_3(%arg0: i32, %arg1: i32, %arg2: i32) -> (i32, i32, i32) {
    %c0_i32 = arith.constant 0 : i32
    %c0_i32_0 = arith.constant 0 : i32
    return %arg0, %c0_i32, %arg1 : i32, i32, i32
  }
}

module attributes {stable_mosaic.version = 11 : i64} {
  func.func @_linear_kernel(%arg0: i32, %arg1: i32, %arg2: i32, %arg3: memref<16x256xbf16, #tpu.memory_space<vmem>>, %arg4: memref<256x256xbf16, #tpu.memory_space<vmem>>, %arg5: memref<1x256xf32, #tpu.memory_space<vmem>>, %arg6: memref<16x256xbf16, #tpu.memory_space<vmem>>, %arg7: memref<16x256xbf16, #tpu.memory_space<vmem>>, %arg8: memref<16x256xf32, #tpu.memory_space<vmem>>) attributes {dimension_semantics = [#tpu.dimension_semantics<parallel>, #tpu.dimension_semantics<parallel>, #tpu.dimension_semantics<arbitrary>], iteration_bounds = array<i64: 1, 1, 1>, scalar_prefetch = 0 : i64, scratch_operands = 1 : i64, tpu.core_type = #tpu.core_type<tc>, window_params = [{transform_indices = @transform_0, window_bounds = array<i64: 16, 256>}, {transform_indices = @transform_1, window_bounds = array<i64: 256, 256>}, {transform_indices = @transform_2, window_bounds = array<i64: 1, 256>}, {transform_indices = @transform_3, window_bounds = array<i64: 16, 256>}, {transform_indices = @transform_4, window_bounds = array<i64: 16, 256>}]} {
    %c0_i32 = arith.constant 0 : i32
    %0 = arith.cmpi eq, %arg2, %c0_i32 : i32
    %1 = arith.extui %0 : i1 to i32
    %c0_i32_0 = arith.constant 0 : i32
    %2 = arith.cmpi ne, %1, %c0_i32_0 : i32
    scf.if %2 {
      %cst_10 = arith.constant 0.000000e+00 : f32
      %12 = vector.broadcast %cst_10 : f32 to vector<16x256xf32>
      %c0_11 = arith.constant 0 : index
      %c0_12 = arith.constant 0 : index
      %13 = vector.load %arg8[%c0_11, %c0_12] : memref<16x256xf32, #tpu.memory_space<vmem>>, vector<16x256xf32>
      tpu.vector_store %arg8[%c0_11, %c0_12], %12 {strides = array<i32>} : memref<16x256xf32, #tpu.memory_space<vmem>>, vector<16x256xf32>,
    } else {
    }
    %c0 = arith.constant 0 : index
    %c0_1 = arith.constant 0 : index
    %3 = vector.load %arg8[%c0, %c0_1] : memref<16x256xf32, #tpu.memory_space<vmem>>, vector<16x256xf32>
    %c0_2 = arith.constant 0 : index
    %c0_3 = arith.constant 0 : index
    %4 = vector.load %arg3[%c0_2, %c0_3] : memref<16x256xbf16, #tpu.memory_space<vmem>>, vector<16x256xbf16>
    %c0_4 = arith.constant 0 : index
    %c0_5 = arith.constant 0 : index
    %5 = vector.load %arg4[%c0_4, %c0_5] : memref<256x256xbf16, #tpu.memory_space<vmem>>, vector<256x256xbf16>
    %cst = arith.constant dense<0.000000e+00> : vector<16x256xf32>
    %6 = tpu.matmul %4, %5, %cst {dimension_numbers = #tpu.dot_dimension_numbers<[1], [0], [0], [1], [0, 0, 1, 1], [], []>} : vector<16x256xbf16>, vector<256x256xbf16>, vector<16x256xf32> -> vector<16x256xf32>
    %7 = arith.addf %3, %6 : vector<16x256xf32>
    %c0_6 = arith.constant 0 : index
    %c0_7 = arith.constant 0 : index
    %8 = vector.load %arg8[%c0_6, %c0_7] : memref<16x256xf32, #tpu.memory_space<vmem>>, vector<16x256xf32>
    tpu.vector_store %arg8[%c0_6, %c0_7], %7 {strides = array<i32>} : memref<16x256xf32, #tpu.memory_space<vmem>>, vector<16x256xf32>,
    %c0_i32_8 = arith.constant 0 : i32
    %9 = arith.cmpi eq, %arg2, %c0_i32_8 : i32
    %10 = arith.extui %9 : i1 to i32
    %c0_i32_9 = arith.constant 0 : i32
    %11 = arith.cmpi ne, %10, %c0_i32_9 : i32
    scf.if %11 {
      %c0_10 = arith.constant 0 : index
      %c0_11 = arith.constant 0 : index
      %12 = vector.load %arg8[%c0_10, %c0_11] : memref<16x256xf32, #tpu.memory_space<vmem>>, vector<16x256xf32>
      %c0_12 = arith.constant 0 : index
      %c0_13 = arith.constant 0 : index
      %13 = vector.load %arg5[%c0_12, %c0_13] : memref<1x256xf32, #tpu.memory_space<vmem>>, vector<1x256xf32>
      %14 = vector.broadcast %13 : vector<1x256xf32> to vector<16x256xf32>
      %15 = arith.addf %12, %14 : vector<16x256xf32>
      %c0_14 = arith.constant 0 : index
      %c0_15 = arith.constant 0 : index
      %16 = vector.load %arg6[%c0_14, %c0_15] : memref<16x256xbf16, #tpu.memory_space<vmem>>, vector<16x256xbf16>
      %17 = arith.extf %16 : vector<16x256xbf16> to vector<16x256xf32>
      %18 = arith.addf %15, %17 : vector<16x256xf32>
      %19 = arith.truncf %18 : vector<16x256xf32> to vector<16x256xbf16>
      %c0_16 = arith.constant 0 : index
      %c0_17 = arith.constant 0 : index
      %20 = vector.load %arg7[%c0_16, %c0_17] : memref<16x256xbf16, #tpu.memory_space<vmem>>, vector<16x256xbf16>
      tpu.vector_store %arg7[%c0_16, %c0_17], %19 {strides = array<i32>} : memref<16x256xbf16, #tpu.memory_space<vmem>>, vector<16x256xbf16>,
    } else {
    }
    return
  }
  func.func @transform_0(%arg0: i32, %arg1: i32, %arg2: i32) -> (i32, i32) {
    %c0_i32 = arith.constant 0 : i32
    return %arg0, %arg2 : i32, i32
  }
  func.func @transform_1(%arg0: i32, %arg1: i32, %arg2: i32) -> (i32, i32) {
    %c0_i32 = arith.constant 0 : i32
    return %arg2, %arg1 : i32, i32
  }
  func.func @transform_2(%arg0: i32, %arg1: i32, %arg2: i32) -> (i32, i32) {
    %c0_i32 = arith.constant 0 : i32
    %c0_i32_0 = arith.constant 0 : i32
    return %c0_i32, %arg1 : i32, i32
  }
  func.func @transform_3(%arg0: i32, %arg1: i32, %arg2: i32) -> (i32, i32) {
    %c0_i32 = arith.constant 0 : i32
    return %arg0, %arg1 : i32, i32
  }
  func.func @transform_4(%arg0: i32, %arg1: i32, %arg2: i32) -> (i32, i32) {
    %c0_i32 = arith.constant 0 : i32
    return %arg0, %arg1 : i32, i32
  }
}

module attributes {stable_mosaic.version = 11 : i64} {
  func.func @_linear_kernel(%arg0: i32, %arg1: i32, %arg2: i32, %arg3: memref<16x256xbf16, #tpu.memory_space<vmem>>, %arg4: memref<256x256xbf16, #tpu.memory_space<vmem>>, %arg5: memref<1x256xf32, #tpu.memory_space<vmem>>, %arg6: memref<16x256xbf16, #tpu.memory_space<vmem>>, %arg7: memref<16x256xf32, #tpu.memory_space<vmem>>) attributes {dimension_semantics = [#tpu.dimension_semantics<parallel>, #tpu.dimension_semantics<parallel>, #tpu.dimension_semantics<arbitrary>], iteration_bounds = array<i64: 1, 1, 1>, scalar_prefetch = 0 : i64, scratch_operands = 1 : i64, tpu.core_type = #tpu.core_type<tc>, window_params = [{transform_indices = @transform_0, window_bounds = array<i64: 16, 256>}, {transform_indices = @transform_1, window_bounds = array<i64: 256, 256>}, {transform_indices = @transform_2, window_bounds = array<i64: 1, 256>}, {transform_indices = @transform_3, window_bounds = array<i64: 16, 256>}]} {
    %c0_i32 = arith.constant 0 : i32
    %0 = arith.cmpi eq, %arg2, %c0_i32 : i32
    %1 = arith.extui %0 : i1 to i32
    %c0_i32_0 = arith.constant 0 : i32
    %2 = arith.cmpi ne, %1, %c0_i32_0 : i32
    scf.if %2 {
      %cst_10 = arith.constant 0.000000e+00 : f32
      %12 = vector.broadcast %cst_10 : f32 to vector<16x256xf32>
      %c0_11 = arith.constant 0 : index
      %c0_12 = arith.constant 0 : index
      %13 = vector.load %arg7[%c0_11, %c0_12] : memref<16x256xf32, #tpu.memory_space<vmem>>, vector<16x256xf32>
      tpu.vector_store %arg7[%c0_11, %c0_12], %12 {strides = array<i32>} : memref<16x256xf32, #tpu.memory_space<vmem>>, vector<16x256xf32>,
    } else {
    }
    %c0 = arith.constant 0 : index
    %c0_1 = arith.constant 0 : index
    %3 = vector.load %arg7[%c0, %c0_1] : memref<16x256xf32, #tpu.memory_space<vmem>>, vector<16x256xf32>
    %c0_2 = arith.constant 0 : index
    %c0_3 = arith.constant 0 : index
    %4 = vector.load %arg3[%c0_2, %c0_3] : memref<16x256xbf16, #tpu.memory_space<vmem>>, vector<16x256xbf16>
    %c0_4 = arith.constant 0 : index
    %c0_5 = arith.constant 0 : index
    %5 = vector.load %arg4[%c0_4, %c0_5] : memref<256x256xbf16, #tpu.memory_space<vmem>>, vector<256x256xbf16>
    %cst = arith.constant dense<0.000000e+00> : vector<16x256xf32>
    %6 = tpu.matmul %4, %5, %cst {dimension_numbers = #tpu.dot_dimension_numbers<[1], [0], [0], [1], [0, 0, 1, 1], [], []>} : vector<16x256xbf16>, vector<256x256xbf16>, vector<16x256xf32> -> vector<16x256xf32>
    %7 = arith.addf %3, %6 : vector<16x256xf32>
    %c0_6 = arith.constant 0 : index
    %c0_7 = arith.constant 0 : index
    %8 = vector.load %arg7[%c0_6, %c0_7] : memref<16x256xf32, #tpu.memory_space<vmem>>, vector<16x256xf32>
    tpu.vector_store %arg7[%c0_6, %c0_7], %7 {strides = array<i32>} : memref<16x256xf32, #tpu.memory_space<vmem>>, vector<16x256xf32>,
    %c0_i32_8 = arith.constant 0 : i32
    %9 = arith.cmpi eq, %arg2, %c0_i32_8 : i32
    %10 = arith.extui %9 : i1 to i32
    %c0_i32_9 = arith.constant 0 : i32
    %11 = arith.cmpi ne, %10, %c0_i32_9 : i32
    scf.if %11 {
      %c0_10 = arith.constant 0 : index
      %c0_11 = arith.constant 0 : index
      %12 = vector.load %arg7[%c0_10, %c0_11] : memref<16x256xf32, #tpu.memory_space<vmem>>, vector<16x256xf32>
      %c0_12 = arith.constant 0 : index
      %c0_13 = arith.constant 0 : index
      %13 = vector.load %arg5[%c0_12, %c0_13] : memref<1x256xf32, #tpu.memory_space<vmem>>, vector<1x256xf32>
      %14 = vector.broadcast %13 : vector<1x256xf32> to vector<16x256xf32>
      %15 = arith.addf %12, %14 : vector<16x256xf32>
      %16 = arith.truncf %15 : vector<16x256xf32> to vector<16x256xbf16>
      %c0_14 = arith.constant 0 : index
      %c0_15 = arith.constant 0 : index
      %17 = vector.load %arg6[%c0_14, %c0_15] : memref<16x256xbf16, #tpu.memory_space<vmem>>, vector<16x256xbf16>
      tpu.vector_store %arg6[%c0_14, %c0_15], %16 {strides = array<i32>} : memref<16x256xbf16, #tpu.memory_space<vmem>>, vector<16x256xbf16>,
    } else {
    }
    return
  }
  func.func @transform_0(%arg0: i32, %arg1: i32, %arg2: i32) -> (i32, i32) {
    %c0_i32 = arith.constant 0 : i32
    return %arg0, %arg2 : i32, i32
  }
  func.func @transform_1(%arg0: i32, %arg1: i32, %arg2: i32) -> (i32, i32) {
    %c0_i32 = arith.constant 0 : i32
    return %arg2, %arg1 : i32, i32
  }
  func.func @transform_2(%arg0: i32, %arg1: i32, %arg2: i32) -> (i32, i32) {
    %c0_i32 = arith.constant 0 : i32
    %c0_i32_0 = arith.constant 0 : i32
    return %c0_i32, %arg1 : i32, i32
  }
  func.func @transform_3(%arg0: i32, %arg1: i32, %arg2: i32) -> (i32, i32) {
    %c0_i32 = arith.constant 0 : i32
    return %arg0, %arg1 : i32, i32
  }
}

module attributes {stable_mosaic.version = 11 : i64} {
  func.func @_linear_kernel(%arg0: i32, %arg1: i32, %arg2: i32, %arg3: memref<32x256xbf16, #tpu.memory_space<vmem>>, %arg4: memref<256x512xbf16, #tpu.memory_space<vmem>>, %arg5: memref<1x512xf32, #tpu.memory_space<vmem>>, %arg6: memref<32x512xbf16, #tpu.memory_space<vmem>>, %arg7: memref<32x512xf32, #tpu.memory_space<vmem>>) attributes {dimension_semantics = [#tpu.dimension_semantics<parallel>, #tpu.dimension_semantics<parallel>, #tpu.dimension_semantics<arbitrary>], iteration_bounds = array<i64: 1, 1, 1>, scalar_prefetch = 0 : i64, scratch_operands = 1 : i64, tpu.core_type = #tpu.core_type<tc>, window_params = [{transform_indices = @transform_0, window_bounds = array<i64: 32, 256>}, {transform_indices = @transform_1, window_bounds = array<i64: 256, 512>}, {transform_indices = @transform_2, window_bounds = array<i64: 1, 512>}, {transform_indices = @transform_3, window_bounds = array<i64: 32, 512>}]} {
    %c0_i32 = arith.constant 0 : i32
    %0 = arith.cmpi eq, %arg2, %c0_i32 : i32
    %1 = arith.extui %0 : i1 to i32
    %c0_i32_0 = arith.constant 0 : i32
    %2 = arith.cmpi ne, %1, %c0_i32_0 : i32
    scf.if %2 {
      %cst_10 = arith.constant 0.000000e+00 : f32
      %12 = vector.broadcast %cst_10 : f32 to vector<32x512xf32>
      %c0_11 = arith.constant 0 : index
      %c0_12 = arith.constant 0 : index
      %13 = vector.load %arg7[%c0_11, %c0_12] : memref<32x512xf32, #tpu.memory_space<vmem>>, vector<32x512xf32>
      tpu.vector_store %arg7[%c0_11, %c0_12], %12 {strides = array<i32>} : memref<32x512xf32, #tpu.memory_space<vmem>>, vector<32x512xf32>,
    } else {
    }
    %c0 = arith.constant 0 : index
    %c0_1 = arith.constant 0 : index
    %3 = vector.load %arg7[%c0, %c0_1] : memref<32x512xf32, #tpu.memory_space<vmem>>, vector<32x512xf32>
    %c0_2 = arith.constant 0 : index
    %c0_3 = arith.constant 0 : index
    %4 = vector.load %arg3[%c0_2, %c0_3] : memref<32x256xbf16, #tpu.memory_space<vmem>>, vector<32x256xbf16>
    %c0_4 = arith.constant 0 : index
    %c0_5 = arith.constant 0 : index
    %5 = vector.load %arg4[%c0_4, %c0_5] : memref<256x512xbf16, #tpu.memory_space<vmem>>, vector<256x512xbf16>
    %cst = arith.constant dense<0.000000e+00> : vector<32x512xf32>
    %6 = tpu.matmul %4, %5, %cst {dimension_numbers = #tpu.dot_dimension_numbers<[1], [0], [0], [1], [0, 0, 1, 1], [], []>} : vector<32x256xbf16>, vector<256x512xbf16>, vector<32x512xf32> -> vector<32x512xf32>
    %7 = arith.addf %3, %6 : vector<32x512xf32>
    %c0_6 = arith.constant 0 : index
    %c0_7 = arith.constant 0 : index
    %8 = vector.load %arg7[%c0_6, %c0_7] : memref<32x512xf32, #tpu.memory_space<vmem>>, vector<32x512xf32>
    tpu.vector_store %arg7[%c0_6, %c0_7], %7 {strides = array<i32>} : memref<32x512xf32, #tpu.memory_space<vmem>>, vector<32x512xf32>,
    %c0_i32_8 = arith.constant 0 : i32
    %9 = arith.cmpi eq, %arg2, %c0_i32_8 : i32
    %10 = arith.extui %9 : i1 to i32
    %c0_i32_9 = arith.constant 0 : i32
    %11 = arith.cmpi ne, %10, %c0_i32_9 : i32
    scf.if %11 {
      %c0_10 = arith.constant 0 : index
      %c0_11 = arith.constant 0 : index
      %12 = vector.load %arg7[%c0_10, %c0_11] : memref<32x512xf32, #tpu.memory_space<vmem>>, vector<32x512xf32>
      %c0_12 = arith.constant 0 : index
      %c0_13 = arith.constant 0 : index
      %13 = vector.load %arg5[%c0_12, %c0_13] : memref<1x512xf32, #tpu.memory_space<vmem>>, vector<1x512xf32>
      %14 = vector.broadcast %13 : vector<1x512xf32> to vector<32x512xf32>
      %15 = arith.addf %12, %14 : vector<32x512xf32>
      %16 = arith.truncf %15 : vector<32x512xf32> to vector<32x512xbf16>
      %c0_14 = arith.constant 0 : index
      %c0_15 = arith.constant 0 : index
      %17 = vector.load %arg6[%c0_14, %c0_15] : memref<32x512xbf16, #tpu.memory_space<vmem>>, vector<32x512xbf16>
      tpu.vector_store %arg6[%c0_14, %c0_15], %16 {strides = array<i32>} : memref<32x512xbf16, #tpu.memory_space<vmem>>, vector<32x512xbf16>,
    } else {
    }
    return
  }
  func.func @transform_0(%arg0: i32, %arg1: i32, %arg2: i32) -> (i32, i32) {
    %c0_i32 = arith.constant 0 : i32
    return %arg0, %arg2 : i32, i32
  }
  func.func @transform_1(%arg0: i32, %arg1: i32, %arg2: i32) -> (i32, i32) {
    %c0_i32 = arith.constant 0 : i32
    return %arg2, %arg1 : i32, i32
  }
  func.func @transform_2(%arg0: i32, %arg1: i32, %arg2: i32) -> (i32, i32) {
    %c0_i32 = arith.constant 0 : i32
    %c0_i32_0 = arith.constant 0 : i32
    return %c0_i32, %arg1 : i32, i32
  }
  func.func @transform_3(%arg0: i32, %arg1: i32, %arg2: i32) -> (i32, i32) {
    %c0_i32 = arith.constant 0 : i32
    return %arg0, %arg1 : i32, i32
  }
}

module attributes {stable_mosaic.version = 11 : i64} {
  func.func @_mha_kernel(%arg0: i32, %arg1: i32, %arg2: i32, %arg3: memref<1x8x128xbf16, #tpu.memory_space<vmem>>, %arg4: memref<1x16x128xbf16, #tpu.memory_space<vmem>>, %arg5: memref<1x16x128xbf16, #tpu.memory_space<vmem>>, %arg6: memref<1x8x128xbf16, #tpu.memory_space<vmem>>, %arg7: memref<2x8x1xf32, #tpu.memory_space<vmem>>, %arg8: memref<2x8x1xf32, #tpu.memory_space<vmem>>, %arg9: memref<2x8x64xf32, #tpu.memory_space<vmem>>) attributes {dimension_semantics = [#tpu.dimension_semantics<parallel>, #tpu.dimension_semantics<parallel>, #tpu.dimension_semantics<arbitrary>], iteration_bounds = array<i64: 2, 2, 1>, scalar_prefetch = 0 : i64, scratch_operands = 3 : i64, tpu.core_type = #tpu.core_type<tc>, window_params = [{transform_indices = @transform_0, window_bounds = array<i64: 1, 8, 128>}, {transform_indices = @transform_1, window_bounds = array<i64: 1, 16, 128>}, {transform_indices = @transform_2, window_bounds = array<i64: 1, 16, 128>}, {transform_indices = @transform_3, window_bounds = array<i64: 1, 8, 128>}]} {
    %c0_i32 = arith.constant 0 : i32
    %0 = arith.cmpi eq, %arg2, %c0_i32 : i32
    %1 = arith.extui %0 : i1 to i32
    %c0_i32_0 = arith.constant 0 : i32
    %2 = arith.cmpi ne, %1, %c0_i32_0 : i32
    scf.if %2 {
      %cst_57 = arith.constant -1.000000e+30 : f32
      %96 = vector.broadcast %cst_57 : f32 to vector<2x8x1xf32>
      %c0_58 = arith.constant 0 : index
      %c0_59 = arith.constant 0 : index
      %c0_60 = arith.constant 0 : index
      %97 = vector.load %arg7[%c0_58, %c0_59, %c0_60] : memref<2x8x1xf32, #tpu.memory_space<vmem>>, vector<2x8x1xf32>
      tpu.vector_store %arg7[%c0_58, %c0_59, %c0_60], %96 {strides = array<i32>} : memref<2x8x1xf32, #tpu.memory_space<vmem>>, vector<2x8x1xf32>,
      %cst_61 = arith.constant 0.000000e+00 : f32
      %98 = vector.broadcast %cst_61 : f32 to vector<2x8x1xf32>
      %c0_62 = arith.constant 0 : index
      %c0_63 = arith.constant 0 : index
      %c0_64 = arith.constant 0 : index
      %99 = vector.load %arg8[%c0_62, %c0_63, %c0_64] : memref<2x8x1xf32, #tpu.memory_space<vmem>>, vector<2x8x1xf32>
      tpu.vector_store %arg8[%c0_62, %c0_63, %c0_64], %98 {strides = array<i32>} : memref<2x8x1xf32, #tpu.memory_space<vmem>>, vector<2x8x1xf32>,
      %cst_65 = arith.constant 0.000000e+00 : f32
      %100 = vector.broadcast %cst_65 : f32 to vector<2x8x64xf32>
      %c0_66 = arith.constant 0 : index
      %c0_67 = arith.constant 0 : index
      %c0_68 = arith.constant 0 : index
      %101 = vector.load %arg9[%c0_66, %c0_67, %c0_68] : memref<2x8x64xf32, #tpu.memory_space<vmem>>, vector<2x8x64xf32>
      tpu.vector_store %arg9[%c0_66, %c0_67, %c0_68], %100 {strides = array<i32>} : memref<2x8x64xf32, #tpu.memory_space<vmem>>, vector<2x8x64xf32>,
    } else {
    }
    %c0 = arith.constant 0 : index
    %c0_1 = arith.constant 0 : index
    %c0_2 = arith.constant 0 : index
    %3 = vector.load %arg3[%c0, %c0_1, %c0_2] : memref<1x8x128xbf16, #tpu.memory_space<vmem>>, vector<1x8x128xbf16>
    %4 = vector.shape_cast %3 : vector<1x8x128xbf16> to vector<8x128xbf16>
    %cst = arith.constant 1.250000e-01 : bf16
    %5 = vector.broadcast %cst : bf16 to vector<8x128xbf16>
    %6 = arith.mulf %4, %5 : vector<8x128xbf16>
    %c0_3 = arith.constant 0 : index
    %c0_4 = arith.constant 0 : index
    %c0_5 = arith.constant 0 : index
    %7 = vector.load %arg4[%c0_3, %c0_4, %c0_5] : memref<1x16x128xbf16, #tpu.memory_space<vmem>>, vector<1x16x128xbf16>
    %8 = vector.shape_cast %7 : vector<1x16x128xbf16> to vector<16x128xbf16>
    %c0_6 = arith.constant 0 : index
    %c0_7 = arith.constant 0 : index
    %c0_8 = arith.constant 0 : index
    %9 = vector.load %arg5[%c0_6, %c0_7, %c0_8] : memref<1x16x128xbf16, #tpu.memory_space<vmem>>, vector<1x16x128xbf16>
    %10 = vector.shape_cast %9 : vector<1x16x128xbf16> to vector<16x128xbf16>
    %c16_i32 = arith.constant 16 : i32
    %11 = arith.muli %arg2, %c16_i32 : i32
    %12 = tpu.iota {dimensions = array<i32: 1>} : vector<8x16xi32>
    %13 = vector.broadcast %11 : i32 to vector<8x16xi32>
    %14 = arith.addi %13, %12 : vector<8x16xi32>
    %c16_i32_9 = arith.constant 16 : i32
    %15 = vector.broadcast %c16_i32_9 : i32 to vector<8x16xi32>
    %16 = arith.cmpi slt, %14, %15 : vector<8x16xi32>
    %17 = vector.extract_strided_slice %6 {offsets = [0, 0], sizes = [8, 64], strides = [1, 1]} : vector<8x128xbf16> to vector<8x64xbf16>
    %18 = vector.extract_strided_slice %8 {offsets = [0, 0], sizes = [16, 64], strides = [1, 1]} : vector<16x128xbf16> to vector<16x64xbf16>
    %cst_10 = arith.constant dense<0.000000e+00> : vector<8x16xf32>
    %19 = tpu.matmul %17, %18, %cst_10 {dimension_numbers = #tpu.dot_dimension_numbers<[1], [1], [0], [0], [0, 0, 1, 0], [], []>} : vector<8x64xbf16>, vector<16x64xbf16>, vector<8x16xf32> -> vector<8x16xf32>
    %cst_11 = arith.constant -1.000000e+30 : f32
    %20 = vector.broadcast %cst_11 : f32 to vector<8x16xf32>
    %21 = arith.select %16, %19, %20 : vector<8x16xi1>, vector<8x16xf32>
    %c0_12 = arith.constant 0 : index
    %c0_13 = arith.constant 0 : index
    %c0_14 = arith.constant 0 : index
    %22 = vector.load %arg7[%c0_12, %c0_13, %c0_14] : memref<2x8x1xf32, #tpu.memory_space<vmem>>, vector<1x8x1xf32>
    %23 = vector.shape_cast %22 : vector<1x8x1xf32> to vector<8x1xf32>
    %cst_15 = arith.constant dense<0xFF800000> : vector<8xf32>
    %24 = vector.multi_reduction <maximumf>, %21, %cst_15 [1] : vector<8x16xf32> to vector<8xf32>
    %25 = vector.shape_cast %24 : vector<8xf32> to vector<8x1xf32>
    %26 = arith.maximumf %23, %25 : vector<8x1xf32>
    %27 = arith.subf %23, %26 : vector<8x1xf32>
    %28 = math.exp %27 : vector<8x1xf32>
    %29 = vector.broadcast %26 : vector<8x1xf32> to vector<8x16xf32>
    %30 = arith.subf %21, %29 : vector<8x16xf32>
    %31 = math.exp %30 : vector<8x16xf32>
    %c0_16 = arith.constant 0 : index
    %c0_17 = arith.constant 0 : index
    %c0_18 = arith.constant 0 : index
    %32 = vector.load %arg8[%c0_16, %c0_17, %c0_18] : memref<2x8x1xf32, #tpu.memory_space<vmem>>, vector<1x8x1xf32>
    %33 = vector.shape_cast %32 : vector<1x8x1xf32> to vector<8x1xf32>
    %34 = arith.mulf %28, %33 : vector<8x1xf32>
    %cst_19 = arith.constant dense<0.000000e+00> : vector<8xf32>
    %35 = vector.multi_reduction <add>, %31, %cst_19 [1] : vector<8x16xf32> to vector<8xf32>
    %36 = vector.shape_cast %35 : vector<8xf32> to vector<8x1xf32>
    %37 = arith.addf %34, %36 : vector<8x1xf32>
    %c0_20 = arith.constant 0 : index
    %c0_21 = arith.constant 0 : index
    %c0_22 = arith.constant 0 : index
    %38 = vector.load %arg8[%c0_20, %c0_21, %c0_22] : memref<2x8x1xf32, #tpu.memory_space<vmem>>, vector<1x8x1xf32>
    %39 = vector.shape_cast %38 : vector<1x8x1xf32> to vector<8x1xf32>
    %40 = vector.shape_cast %37 : vector<8x1xf32> to vector<1x8x1xf32>
    tpu.vector_store %arg8[%c0_20, %c0_21, %c0_22], %40 {strides = array<i32>} : memref<2x8x1xf32, #tpu.memory_space<vmem>>, vector<1x8x1xf32>,
    %c0_23 = arith.constant 0 : index
    %c0_24 = arith.constant 0 : index
    %c0_25 = arith.constant 0 : index
    %41 = vector.load %arg9[%c0_23, %c0_24, %c0_25] : memref<2x8x64xf32, #tpu.memory_space<vmem>>, vector<1x8x64xf32>
    %42 = vector.shape_cast %41 : vector<1x8x64xf32> to vector<8x64xf32>
    %43 = vector.broadcast %28 : vector<8x1xf32> to vector<8x64xf32>
    %44 = arith.mulf %43, %42 : vector<8x64xf32>
    %45 = arith.truncf %31 : vector<8x16xf32> to vector<8x16xbf16>
    %46 = vector.extract_strided_slice %10 {offsets = [0, 0], sizes = [16, 64], strides = [1, 1]} : vector<16x128xbf16> to vector<16x64xbf16>
    %cst_26 = arith.constant dense<0.000000e+00> : vector<8x64xf32>
    %47 = tpu.matmul %45, %46, %cst_26 {dimension_numbers = #tpu.dot_dimension_numbers<[1], [0], [0], [1], [0, 0, 1, 1], [], []>} : vector<8x16xbf16>, vector<16x64xbf16>, vector<8x64xf32> -> vector<8x64xf32>
    %48 = arith.addf %44, %47 : vector<8x64xf32>
    %c0_27 = arith.constant 0 : index
    %c0_28 = arith.constant 0 : index
    %c0_29 = arith.constant 0 : index
    %49 = vector.load %arg9[%c0_27, %c0_28, %c0_29] : memref<2x8x64xf32, #tpu.memory_space<vmem>>, vector<1x8x64xf32>
    %50 = vector.shape_cast %49 : vector<1x8x64xf32> to vector<8x64xf32>
    %51 = vector.shape_cast %48 : vector<8x64xf32> to vector<1x8x64xf32>
    tpu.vector_store %arg9[%c0_27, %c0_28, %c0_29], %51 {strides = array<i32>} : memref<2x8x64xf32, #tpu.memory_space<vmem>>, vector<1x8x64xf32>,
    %c0_30 = arith.constant 0 : index
    %c0_31 = arith.constant 0 : index
    %c0_32 = arith.constant 0 : index
    %52 = vector.load %arg7[%c0_30, %c0_31, %c0_32] : memref<2x8x1xf32, #tpu.memory_space<vmem>>, vector<1x8x1xf32>
    %53 = vector.shape_cast %52 : vector<1x8x1xf32> to vector<8x1xf32>
    %54 = vector.shape_cast %26 : vector<8x1xf32> to vector<1x8x1xf32>
    tpu.vector_store %arg7[%c0_30, %c0_31, %c0_32], %54 {strides = array<i32>} : memref<2x8x1xf32, #tpu.memory_space<vmem>>, vector<1x8x1xf32>,
    %55 = vector.extract_strided_slice %6 {offsets = [0, 64], sizes = [8, 64], strides = [1, 1]} : vector<8x128xbf16> to vector<8x64xbf16>
    %56 = vector.extract_strided_slice %8 {offsets = [0, 64], sizes = [16, 64], strides = [1, 1]} : vector<16x128xbf16> to vector<16x64xbf16>
    %cst_33 = arith.constant dense<0.000000e+00> : vector<8x16xf32>
    %57 = tpu.matmul %55, %56, %cst_33 {dimension_numbers = #tpu.dot_dimension_numbers<[1], [1], [0], [0], [0, 0, 1, 0], [], []>} : vector<8x64xbf16>, vector<16x64xbf16>, vector<8x16xf32> -> vector<8x16xf32>
    %cst_34 = arith.constant -1.000000e+30 : f32
    %58 = vector.broadcast %cst_34 : f32 to vector<8x16xf32>
    %59 = arith.select %16, %57, %58 : vector<8x16xi1>, vector<8x16xf32>
    %c1 = arith.constant 1 : index
    %c0_35 = arith.constant 0 : index
    %c0_36 = arith.constant 0 : index
    %60 = vector.load %arg7[%c1, %c0_35, %c0_36] : memref<2x8x1xf32, #tpu.memory_space<vmem>>, vector<1x8x1xf32>
    %61 = vector.shape_cast %60 : vector<1x8x1xf32> to vector<8x1xf32>
    %cst_37 = arith.constant dense<0xFF800000> : vector<8xf32>
    %62 = vector.multi_reduction <maximumf>, %59, %cst_37 [1] : vector<8x16xf32> to vector<8xf32>
    %63 = vector.shape_cast %62 : vector<8xf32> to vector<8x1xf32>
    %64 = arith.maximumf %61, %63 : vector<8x1xf32>
    %65 = arith.subf %61, %64 : vector<8x1xf32>
    %66 = math.exp %65 : vector<8x1xf32>
    %67 = vector.broadcast %64 : vector<8x1xf32> to vector<8x16xf32>
    %68 = arith.subf %59, %67 : vector<8x16xf32>
    %69 = math.exp %68 : vector<8x16xf32>
    %c1_38 = arith.constant 1 : index
    %c0_39 = arith.constant 0 : index
    %c0_40 = arith.constant 0 : index
    %70 = vector.load %arg8[%c1_38, %c0_39, %c0_40] : memref<2x8x1xf32, #tpu.memory_space<vmem>>, vector<1x8x1xf32>
    %71 = vector.shape_cast %70 : vector<1x8x1xf32> to vector<8x1xf32>
    %72 = arith.mulf %66, %71 : vector<8x1xf32>
    %cst_41 = arith.constant dense<0.000000e+00> : vector<8xf32>
    %73 = vector.multi_reduction <add>, %69, %cst_41 [1] : vector<8x16xf32> to vector<8xf32>
    %74 = vector.shape_cast %73 : vector<8xf32> to vector<8x1xf32>
    %75 = arith.addf %72, %74 : vector<8x1xf32>
    %c1_42 = arith.constant 1 : index
    %c0_43 = arith.constant 0 : index
    %c0_44 = arith.constant 0 : index
    %76 = vector.load %arg8[%c1_42, %c0_43, %c0_44] : memref<2x8x1xf32, #tpu.memory_space<vmem>>, vector<1x8x1xf32>
    %77 = vector.shape_cast %76 : vector<1x8x1xf32> to vector<8x1xf32>
    %78 = vector.shape_cast %75 : vector<8x1xf32> to vector<1x8x1xf32>
    tpu.vector_store %arg8[%c1_42, %c0_43, %c0_44], %78 {strides = array<i32>} : memref<2x8x1xf32, #tpu.memory_space<vmem>>, vector<1x8x1xf32>,
    %c1_45 = arith.constant 1 : index
    %c0_46 = arith.constant 0 : index
    %c0_47 = arith.constant 0 : index
    %79 = vector.load %arg9[%c1_45, %c0_46, %c0_47] : memref<2x8x64xf32, #tpu.memory_space<vmem>>, vector<1x8x64xf32>
    %80 = vector.shape_cast %79 : vector<1x8x64xf32> to vector<8x64xf32>
    %81 = vector.broadcast %66 : vector<8x1xf32> to vector<8x64xf32>
    %82 = arith.mulf %81, %80 : vector<8x64xf32>
    %83 = arith.truncf %69 : vector<8x16xf32> to vector<8x16xbf16>
    %84 = vector.extract_strided_slice %10 {offsets = [0, 64], sizes = [16, 64], strides = [1, 1]} : vector<16x128xbf16> to vector<16x64xbf16>
    %cst_48 = arith.constant dense<0.000000e+00> : vector<8x64xf32>
    %85 = tpu.matmul %83, %84, %cst_48 {dimension_numbers = #tpu.dot_dimension_numbers<[1], [0], [0], [1], [0, 0, 1, 1], [], []>} : vector<8x16xbf16>, vector<16x64xbf16>, vector<8x64xf32> -> vector<8x64xf32>
    %86 = arith.addf %82, %85 : vector<8x64xf32>
    %c1_49 = arith.constant 1 : index
    %c0_50 = arith.constant 0 : index
    %c0_51 = arith.constant 0 : index
    %87 = vector.load %arg9[%c1_49, %c0_50, %c0_51] : memref<2x8x64xf32, #tpu.memory_space<vmem>>, vector<1x8x64xf32>
    %88 = vector.shape_cast %87 : vector<1x8x64xf32> to vector<8x64xf32>
    %89 = vector.shape_cast %86 : vector<8x64xf32> to vector<1x8x64xf32>
    tpu.vector_store %arg9[%c1_49, %c0_50, %c0_51], %89 {strides = array<i32>} : memref<2x8x64xf32, #tpu.memory_space<vmem>>, vector<1x8x64xf32>,
    %c1_52 = arith.constant 1 : index
    %c0_53 = arith.constant 0 : index
    %c0_54 = arith.constant 0 : index
    %90 = vector.load %arg7[%c1_52, %c0_53, %c0_54] : memref<2x8x1xf32, #tpu.memory_space<vmem>>, vector<1x8x1xf32>
    %91 = vector.shape_cast %90 : vector<1x8x1xf32> to vector<8x1xf32>
    %92 = vector.shape_cast %64 : vector<8x1xf32> to vector<1x8x1xf32>
    tpu.vector_store %arg7[%c1_52, %c0_53, %c0_54], %92 {strides = array<i32>} : memref<2x8x1xf32, #tpu.memory_space<vmem>>, vector<1x8x1xf32>,
    %c0_i32_55 = arith.constant 0 : i32
    %93 = arith.cmpi eq, %arg2, %c0_i32_55 : i32
    %94 = arith.extui %93 : i1 to i32
    %c0_i32_56 = arith.constant 0 : i32
    %95 = arith.cmpi ne, %94, %c0_i32_56 : i32
    scf.if %95 {
      %c0_57 = arith.constant 0 : index
      %c0_58 = arith.constant 0 : index
      %c0_59 = arith.constant 0 : index
      %96 = vector.load %arg8[%c0_57, %c0_58, %c0_59] : memref<2x8x1xf32, #tpu.memory_space<vmem>>, vector<1x8x1xf32>
      %97 = vector.shape_cast %96 : vector<1x8x1xf32> to vector<8x1xf32>
      %98 = tpu.reciprocal %97 {approx = true} : vector<8x1xf32> -> vector<8x1xf32>
      %c0_60 = arith.constant 0 : index
      %c0_61 = arith.constant 0 : index
      %c0_62 = arith.constant 0 : index
      %99 = vector.load %arg9[%c0_60, %c0_61, %c0_62] : memref<2x8x64xf32, #tpu.memory_space<vmem>>, vector<1x8x64xf32>
      %100 = vector.shape_cast %99 : vector<1x8x64xf32> to vector<8x64xf32>
      %101 = vector.broadcast %98 : vector<8x1xf32> to vector<8x64xf32>
      %102 = arith.mulf %100, %101 : vector<8x64xf32>
      %103 = arith.truncf %102 : vector<8x64xf32> to vector<8x64xbf16>
      %c0_63 = arith.constant 0 : index
      %c0_64 = arith.constant 0 : index
      %c0_65 = arith.constant 0 : index
      %104 = vector.load %arg6[%c0_63, %c0_64, %c0_65] : memref<1x8x128xbf16, #tpu.memory_space<vmem>>, vector<1x8x64xbf16>
      %105 = vector.shape_cast %104 : vector<1x8x64xbf16> to vector<8x64xbf16>
      %106 = vector.shape_cast %103 : vector<8x64xbf16> to vector<1x8x64xbf16>
      tpu.vector_store %arg6[%c0_63, %c0_64, %c0_65], %106 {strides = array<i32>} : memref<1x8x128xbf16, #tpu.memory_space<vmem>>, vector<1x8x64xbf16>,
      %c1_66 = arith.constant 1 : index
      %c0_67 = arith.constant 0 : index
      %c0_68 = arith.constant 0 : index
      %107 = vector.load %arg8[%c1_66, %c0_67, %c0_68] : memref<2x8x1xf32, #tpu.memory_space<vmem>>, vector<1x8x1xf32>
      %108 = vector.shape_cast %107 : vector<1x8x1xf32> to vector<8x1xf32>
      %109 = tpu.reciprocal %108 {approx = true} : vector<8x1xf32> -> vector<8x1xf32>
      %c1_69 = arith.constant 1 : index
      %c0_70 = arith.constant 0 : index
      %c0_71 = arith.constant 0 : index
      %110 = vector.load %arg9[%c1_69, %c0_70, %c0_71] : memref<2x8x64xf32, #tpu.memory_space<vmem>>, vector<1x8x64xf32>
      %111 = vector.shape_cast %110 : vector<1x8x64xf32> to vector<8x64xf32>
      %112 = vector.broadcast %109 : vector<8x1xf32> to vector<8x64xf32>
      %113 = arith.mulf %111, %112 : vector<8x64xf32>
      %114 = arith.truncf %113 : vector<8x64xf32> to vector<8x64xbf16>
      %c0_72 = arith.constant 0 : index
      %c0_73 = arith.constant 0 : index
      %c64 = arith.constant 64 : index
      %115 = vector.load %arg6[%c0_72, %c0_73, %c64] : memref<1x8x128xbf16, #tpu.memory_space<vmem>>, vector<1x8x64xbf16>
      %116 = vector.shape_cast %115 : vector<1x8x64xbf16> to vector<8x64xbf16>
      %117 = vector.shape_cast %114 : vector<8x64xbf16> to vector<1x8x64xbf16>
      tpu.vector_store %arg6[%c0_72, %c0_73, %c64], %117 {strides = array<i32>} : memref<1x8x128xbf16, #tpu.memory_space<vmem>>, vector<1x8x64xbf16>,
    } else {
    }
    return
  }
  func.func @transform_0(%arg0: i32, %arg1: i32, %arg2: i32) -> (i32, i32, i32) {
    %c0_i32 = arith.constant 0 : i32
    %0 = arith.addi %c0_i32, %arg1 : i32
    %c0_i32_0 = arith.constant 0 : i32
    %c0_i32_1 = arith.constant 0 : i32
    return %arg0, %c0_i32_0, %0 : i32, i32, i32
  }
  func.func @transform_1(%arg0: i32, %arg1: i32, %arg2: i32) -> (i32, i32, i32) {
    %c0_i32 = arith.constant 0 : i32
    %0 = arith.addi %c0_i32, %arg1 : i32
    %c0_i32_0 = arith.constant 0 : i32
    return %arg0, %arg2, %0 : i32, i32, i32
  }
  func.func @transform_2(%arg0: i32, %arg1: i32, %arg2: i32) -> (i32, i32, i32) {
    %c2_i32 = arith.constant 2 : i32
    %0 = arith.addi %c2_i32, %arg1 : i32
    %c0_i32 = arith.constant 0 : i32
    return %arg0, %arg2, %0 : i32, i32, i32
  }
  func.func @transform_3(%arg0: i32, %arg1: i32, %arg2: i32) -> (i32, i32, i32) {
    %c0_i32 = arith.constant 0 : i32
    %c0_i32_0 = arith.constant 0 : i32
    return %arg0, %c0_i32, %arg1 : i32, i32, i32
  }
}

module attributes {stable_mosaic.version = 11 : i64} {
  func.func @_linear_kernel(%arg0: i32, %arg1: i32, %arg2: i32, %arg3: memref<16x256xbf16, #tpu.memory_space<vmem>>, %arg4: memref<256x1024xbf16, #tpu.memory_space<vmem>>, %arg5: memref<1x1024xf32, #tpu.memory_space<vmem>>, %arg6: memref<16x1024xbf16, #tpu.memory_space<vmem>>, %arg7: memref<16x1024xf32, #tpu.memory_space<vmem>>) attributes {dimension_semantics = [#tpu.dimension_semantics<parallel>, #tpu.dimension_semantics<parallel>, #tpu.dimension_semantics<arbitrary>], iteration_bounds = array<i64: 1, 1, 1>, scalar_prefetch = 0 : i64, scratch_operands = 1 : i64, tpu.core_type = #tpu.core_type<tc>, window_params = [{transform_indices = @transform_0, window_bounds = array<i64: 16, 256>}, {transform_indices = @transform_1, window_bounds = array<i64: 256, 1024>}, {transform_indices = @transform_2, window_bounds = array<i64: 1, 1024>}, {transform_indices = @transform_3, window_bounds = array<i64: 16, 1024>}]} {
    %c0_i32 = arith.constant 0 : i32
    %0 = arith.cmpi eq, %arg2, %c0_i32 : i32
    %1 = arith.extui %0 : i1 to i32
    %c0_i32_0 = arith.constant 0 : i32
    %2 = arith.cmpi ne, %1, %c0_i32_0 : i32
    scf.if %2 {
      %cst_10 = arith.constant 0.000000e+00 : f32
      %12 = vector.broadcast %cst_10 : f32 to vector<16x1024xf32>
      %c0_11 = arith.constant 0 : index
      %c0_12 = arith.constant 0 : index
      %13 = vector.load %arg7[%c0_11, %c0_12] : memref<16x1024xf32, #tpu.memory_space<vmem>>, vector<16x1024xf32>
      tpu.vector_store %arg7[%c0_11, %c0_12], %12 {strides = array<i32>} : memref<16x1024xf32, #tpu.memory_space<vmem>>, vector<16x1024xf32>,
    } else {
    }
    %c0 = arith.constant 0 : index
    %c0_1 = arith.constant 0 : index
    %3 = vector.load %arg7[%c0, %c0_1] : memref<16x1024xf32, #tpu.memory_space<vmem>>, vector<16x1024xf32>
    %c0_2 = arith.constant 0 : index
    %c0_3 = arith.constant 0 : index
    %4 = vector.load %arg3[%c0_2, %c0_3] : memref<16x256xbf16, #tpu.memory_space<vmem>>, vector<16x256xbf16>
    %c0_4 = arith.constant 0 : index
    %c0_5 = arith.constant 0 : index
    %5 = vector.load %arg4[%c0_4, %c0_5] : memref<256x1024xbf16, #tpu.memory_space<vmem>>, vector<256x1024xbf16>
    %cst = arith.constant dense<0.000000e+00> : vector<16x1024xf32>
    %6 = tpu.matmul %4, %5, %cst {dimension_numbers = #tpu.dot_dimension_numbers<[1], [0], [0], [1], [0, 0, 1, 1], [], []>} : vector<16x256xbf16>, vector<256x1024xbf16>, vector<16x1024xf32> -> vector<16x1024xf32>
    %7 = arith.addf %3, %6 : vector<16x1024xf32>
    %c0_6 = arith.constant 0 : index
    %c0_7 = arith.constant 0 : index
    %8 = vector.load %arg7[%c0_6, %c0_7] : memref<16x1024xf32, #tpu.memory_space<vmem>>, vector<16x1024xf32>
    tpu.vector_store %arg7[%c0_6, %c0_7], %7 {strides = array<i32>} : memref<16x1024xf32, #tpu.memory_space<vmem>>, vector<16x1024xf32>,
    %c0_i32_8 = arith.constant 0 : i32
    %9 = arith.cmpi eq, %arg2, %c0_i32_8 : i32
    %10 = arith.extui %9 : i1 to i32
    %c0_i32_9 = arith.constant 0 : i32
    %11 = arith.cmpi ne, %10, %c0_i32_9 : i32
    scf.if %11 {
      %c0_10 = arith.constant 0 : index
      %c0_11 = arith.constant 0 : index
      %12 = vector.load %arg7[%c0_10, %c0_11] : memref<16x1024xf32, #tpu.memory_space<vmem>>, vector<16x1024xf32>
      %c0_12 = arith.constant 0 : index
      %c0_13 = arith.constant 0 : index
      %13 = vector.load %arg5[%c0_12, %c0_13] : memref<1x1024xf32, #tpu.memory_space<vmem>>, vector<1x1024xf32>
      %14 = vector.broadcast %13 : vector<1x1024xf32> to vector<16x1024xf32>
      %15 = arith.addf %12, %14 : vector<16x1024xf32>
      %cst_14 = arith.constant 5.000000e-01 : f32
      %16 = vector.broadcast %cst_14 : f32 to vector<16x1024xf32>
      %17 = arith.mulf %16, %15 : vector<16x1024xf32>
      %cst_15 = arith.constant 4.471500e-02 : f32
      %18 = vector.broadcast %cst_15 : f32 to vector<16x1024xf32>
      %19 = arith.mulf %18, %15 : vector<16x1024xf32>
      %20 = arith.mulf %19, %15 : vector<16x1024xf32>
      %21 = arith.mulf %20, %15 : vector<16x1024xf32>
      %22 = arith.addf %15, %21 : vector<16x1024xf32>
      %cst_16 = arith.constant 0.797884583 : f32
      %23 = vector.broadcast %cst_16 : f32 to vector<16x1024xf32>
      %24 = arith.mulf %23, %22 : vector<16x1024xf32>
      %25 = math.tanh %24 : vector<16x1024xf32>
      %cst_17 = arith.constant 1.000000e+00 : f32
      %26 = vector.broadcast %cst_17 : f32 to vector<16x1024xf32>
      %27 = arith.addf %26, %25 : vector<16x1024xf32>
      %28 = arith.mulf %17, %27 : vector<16x1024xf32>
      %29 = arith.truncf %28 : vector<16x1024xf32> to vector<16x1024xbf16>
      %c0_18 = arith.constant 0 : index
      %c0_19 = arith.constant 0 : index
      %30 = vector.load %arg6[%c0_18, %c0_19] : memref<16x1024xbf16, #tpu.memory_space<vmem>>, vector<16x1024xbf16>
      tpu.vector_store %arg6[%c0_18, %c0_19], %29 {strides = array<i32>} : memref<16x1024xbf16, #tpu.memory_space<vmem>>, vector<16x1024xbf16>,
    } else {
    }
    return
  }
  func.func @transform_0(%arg0: i32, %arg1: i32, %arg2: i32) -> (i32, i32) {
    %c0_i32 = arith.constant 0 : i32
    return %arg0, %arg2 : i32, i32
  }
  func.func @transform_1(%arg0: i32, %arg1: i32, %arg2: i32) -> (i32, i32) {
    %c0_i32 = arith.constant 0 : i32
    return %arg2, %arg1 : i32, i32
  }
  func.func @transform_2(%arg0: i32, %arg1: i32, %arg2: i32) -> (i32, i32) {
    %c0_i32 = arith.constant 0 : i32
    %c0_i32_0 = arith.constant 0 : i32
    return %c0_i32, %arg1 : i32, i32
  }
  func.func @transform_3(%arg0: i32, %arg1: i32, %arg2: i32) -> (i32, i32) {
    %c0_i32 = arith.constant 0 : i32
    return %arg0, %arg1 : i32, i32
  }
}

module attributes {stable_mosaic.version = 11 : i64} {
  func.func @_linear_kernel(%arg0: i32, %arg1: i32, %arg2: i32, %arg3: memref<16x1024xbf16, #tpu.memory_space<vmem>>, %arg4: memref<1024x256xbf16, #tpu.memory_space<vmem>>, %arg5: memref<1x256xf32, #tpu.memory_space<vmem>>, %arg6: memref<16x256xbf16, #tpu.memory_space<vmem>>, %arg7: memref<16x256xbf16, #tpu.memory_space<vmem>>, %arg8: memref<16x256xf32, #tpu.memory_space<vmem>>) attributes {dimension_semantics = [#tpu.dimension_semantics<parallel>, #tpu.dimension_semantics<parallel>, #tpu.dimension_semantics<arbitrary>], iteration_bounds = array<i64: 1, 1, 1>, scalar_prefetch = 0 : i64, scratch_operands = 1 : i64, tpu.core_type = #tpu.core_type<tc>, window_params = [{transform_indices = @transform_0, window_bounds = array<i64: 16, 1024>}, {transform_indices = @transform_1, window_bounds = array<i64: 1024, 256>}, {transform_indices = @transform_2, window_bounds = array<i64: 1, 256>}, {transform_indices = @transform_3, window_bounds = array<i64: 16, 256>}, {transform_indices = @transform_4, window_bounds = array<i64: 16, 256>}]} {
    %c0_i32 = arith.constant 0 : i32
    %0 = arith.cmpi eq, %arg2, %c0_i32 : i32
    %1 = arith.extui %0 : i1 to i32
    %c0_i32_0 = arith.constant 0 : i32
    %2 = arith.cmpi ne, %1, %c0_i32_0 : i32
    scf.if %2 {
      %cst_10 = arith.constant 0.000000e+00 : f32
      %12 = vector.broadcast %cst_10 : f32 to vector<16x256xf32>
      %c0_11 = arith.constant 0 : index
      %c0_12 = arith.constant 0 : index
      %13 = vector.load %arg8[%c0_11, %c0_12] : memref<16x256xf32, #tpu.memory_space<vmem>>, vector<16x256xf32>
      tpu.vector_store %arg8[%c0_11, %c0_12], %12 {strides = array<i32>} : memref<16x256xf32, #tpu.memory_space<vmem>>, vector<16x256xf32>,
    } else {
    }
    %c0 = arith.constant 0 : index
    %c0_1 = arith.constant 0 : index
    %3 = vector.load %arg8[%c0, %c0_1] : memref<16x256xf32, #tpu.memory_space<vmem>>, vector<16x256xf32>
    %c0_2 = arith.constant 0 : index
    %c0_3 = arith.constant 0 : index
    %4 = vector.load %arg3[%c0_2, %c0_3] : memref<16x1024xbf16, #tpu.memory_space<vmem>>, vector<16x1024xbf16>
    %c0_4 = arith.constant 0 : index
    %c0_5 = arith.constant 0 : index
    %5 = vector.load %arg4[%c0_4, %c0_5] : memref<1024x256xbf16, #tpu.memory_space<vmem>>, vector<1024x256xbf16>
    %cst = arith.constant dense<0.000000e+00> : vector<16x256xf32>
    %6 = tpu.matmul %4, %5, %cst {dimension_numbers = #tpu.dot_dimension_numbers<[1], [0], [0], [1], [0, 0, 1, 1], [], []>} : vector<16x1024xbf16>, vector<1024x256xbf16>, vector<16x256xf32> -> vector<16x256xf32>
    %7 = arith.addf %3, %6 : vector<16x256xf32>
    %c0_6 = arith.constant 0 : index
    %c0_7 = arith.constant 0 : index
    %8 = vector.load %arg8[%c0_6, %c0_7] : memref<16x256xf32, #tpu.memory_space<vmem>>, vector<16x256xf32>
    tpu.vector_store %arg8[%c0_6, %c0_7], %7 {strides = array<i32>} : memref<16x256xf32, #tpu.memory_space<vmem>>, vector<16x256xf32>,
    %c0_i32_8 = arith.constant 0 : i32
    %9 = arith.cmpi eq, %arg2, %c0_i32_8 : i32
    %10 = arith.extui %9 : i1 to i32
    %c0_i32_9 = arith.constant 0 : i32
    %11 = arith.cmpi ne, %10, %c0_i32_9 : i32
    scf.if %11 {
      %c0_10 = arith.constant 0 : index
      %c0_11 = arith.constant 0 : index
      %12 = vector.load %arg8[%c0_10, %c0_11] : memref<16x256xf32, #tpu.memory_space<vmem>>, vector<16x256xf32>
      %c0_12 = arith.constant 0 : index
      %c0_13 = arith.constant 0 : index
      %13 = vector.load %arg5[%c0_12, %c0_13] : memref<1x256xf32, #tpu.memory_space<vmem>>, vector<1x256xf32>
      %14 = vector.broadcast %13 : vector<1x256xf32> to vector<16x256xf32>
      %15 = arith.addf %12, %14 : vector<16x256xf32>
      %c0_14 = arith.constant 0 : index
      %c0_15 = arith.constant 0 : index
      %16 = vector.load %arg6[%c0_14, %c0_15] : memref<16x256xbf16, #tpu.memory_space<vmem>>, vector<16x256xbf16>
      %17 = arith.extf %16 : vector<16x256xbf16> to vector<16x256xf32>
      %18 = arith.addf %15, %17 : vector<16x256xf32>
      %19 = arith.truncf %18 : vector<16x256xf32> to vector<16x256xbf16>
      %c0_16 = arith.constant 0 : index
      %c0_17 = arith.constant 0 : index
      %20 = vector.load %arg7[%c0_16, %c0_17] : memref<16x256xbf16, #tpu.memory_space<vmem>>, vector<16x256xbf16>
      tpu.vector_store %arg7[%c0_16, %c0_17], %19 {strides = array<i32>} : memref<16x256xbf16, #tpu.memory_space<vmem>>, vector<16x256xbf16>,
    } else {
    }
    return
  }
  func.func @transform_0(%arg0: i32, %arg1: i32, %arg2: i32) -> (i32, i32) {
    %c0_i32 = arith.constant 0 : i32
    return %arg0, %arg2 : i32, i32
  }
  func.func @transform_1(%arg0: i32, %arg1: i32, %arg2: i32) -> (i32, i32) {
    %c0_i32 = arith.constant 0 : i32
    return %arg2, %arg1 : i32, i32
  }
  func.func @transform_2(%arg0: i32, %arg1: i32, %arg2: i32) -> (i32, i32) {
    %c0_i32 = arith.constant 0 : i32
    %c0_i32_0 = arith.constant 0 : i32
    return %c0_i32, %arg1 : i32, i32
  }
  func.func @transform_3(%arg0: i32, %arg1: i32, %arg2: i32) -> (i32, i32) {
    %c0_i32 = arith.constant 0 : i32
    return %arg0, %arg1 : i32, i32
  }
  func.func @transform_4(%arg0: i32, %arg1: i32, %arg2: i32) -> (i32, i32) {
    %c0_i32 = arith.constant 0 : i32
    return %arg0, %arg1 : i32, i32
  }
}

module attributes {stable_mosaic.version = 11 : i64} {
  func.func @_linear_kernel(%arg0: i32, %arg1: i32, %arg2: i32, %arg3: memref<16x256xbf16, #tpu.memory_space<vmem>>, %arg4: memref<256x128xbf16, #tpu.memory_space<vmem>>, %arg5: memref<16x128xf32, #tpu.memory_space<vmem>>, %arg6: memref<16x128xf32, #tpu.memory_space<vmem>>) attributes {dimension_semantics = [#tpu.dimension_semantics<parallel>, #tpu.dimension_semantics<parallel>, #tpu.dimension_semantics<arbitrary>], iteration_bounds = array<i64: 1, 1, 1>, scalar_prefetch = 0 : i64, scratch_operands = 1 : i64, tpu.core_type = #tpu.core_type<tc>, window_params = [{transform_indices = @transform_0, window_bounds = array<i64: 16, 256>}, {transform_indices = @transform_1, window_bounds = array<i64: 256, 128>}, {transform_indices = @transform_2, window_bounds = array<i64: 16, 128>}]} {
    %c0_i32 = arith.constant 0 : i32
    %0 = arith.cmpi eq, %arg2, %c0_i32 : i32
    %1 = arith.extui %0 : i1 to i32
    %c0_i32_0 = arith.constant 0 : i32
    %2 = arith.cmpi ne, %1, %c0_i32_0 : i32
    scf.if %2 {
      %cst_10 = arith.constant 0.000000e+00 : f32
      %12 = vector.broadcast %cst_10 : f32 to vector<16x128xf32>
      %c0_11 = arith.constant 0 : index
      %c0_12 = arith.constant 0 : index
      %13 = vector.load %arg6[%c0_11, %c0_12] : memref<16x128xf32, #tpu.memory_space<vmem>>, vector<16x128xf32>
      tpu.vector_store %arg6[%c0_11, %c0_12], %12 {strides = array<i32>} : memref<16x128xf32, #tpu.memory_space<vmem>>, vector<16x128xf32>,
    } else {
    }
    %c0 = arith.constant 0 : index
    %c0_1 = arith.constant 0 : index
    %3 = vector.load %arg6[%c0, %c0_1] : memref<16x128xf32, #tpu.memory_space<vmem>>, vector<16x128xf32>
    %c0_2 = arith.constant 0 : index
    %c0_3 = arith.constant 0 : index
    %4 = vector.load %arg3[%c0_2, %c0_3] : memref<16x256xbf16, #tpu.memory_space<vmem>>, vector<16x256xbf16>
    %c0_4 = arith.constant 0 : index
    %c0_5 = arith.constant 0 : index
    %5 = vector.load %arg4[%c0_4, %c0_5] : memref<256x128xbf16, #tpu.memory_space<vmem>>, vector<256x128xbf16>
    %cst = arith.constant dense<0.000000e+00> : vector<16x128xf32>
    %6 = tpu.matmul %4, %5, %cst {dimension_numbers = #tpu.dot_dimension_numbers<[1], [0], [0], [1], [0, 0, 1, 1], [], []>} : vector<16x256xbf16>, vector<256x128xbf16>, vector<16x128xf32> -> vector<16x128xf32>
    %7 = arith.addf %3, %6 : vector<16x128xf32>
    %c0_6 = arith.constant 0 : index
    %c0_7 = arith.constant 0 : index
    %8 = vector.load %arg6[%c0_6, %c0_7] : memref<16x128xf32, #tpu.memory_space<vmem>>, vector<16x128xf32>
    tpu.vector_store %arg6[%c0_6, %c0_7], %7 {strides = array<i32>} : memref<16x128xf32, #tpu.memory_space<vmem>>, vector<16x128xf32>,
    %c0_i32_8 = arith.constant 0 : i32
    %9 = arith.cmpi eq, %arg2, %c0_i32_8 : i32
    %10 = arith.extui %9 : i1 to i32
    %c0_i32_9 = arith.constant 0 : i32
    %11 = arith.cmpi ne, %10, %c0_i32_9 : i32
    scf.if %11 {
      %c0_10 = arith.constant 0 : index
      %c0_11 = arith.constant 0 : index
      %12 = vector.load %arg6[%c0_10, %c0_11] : memref<16x128xf32, #tpu.memory_space<vmem>>, vector<16x128xf32>
      %c0_12 = arith.constant 0 : index
      %c0_13 = arith.constant 0 : index
      %13 = vector.load %arg5[%c0_12, %c0_13] : memref<16x128xf32, #tpu.memory_space<vmem>>, vector<16x128xf32>
      tpu.vector_store %arg5[%c0_12, %c0_13], %12 {strides = array<i32>} : memref<16x128xf32, #tpu.memory_space<vmem>>, vector<16x128xf32>,
    } else {
    }
    return
  }
  func.func @transform_0(%arg0: i32, %arg1: i32, %arg2: i32) -> (i32, i32) {
    %c0_i32 = arith.constant 0 : i32
    return %arg0, %arg2 : i32, i32
  }
  func.func @transform_1(%arg0: i32, %arg1: i32, %arg2: i32) -> (i32, i32) {
    %c0_i32 = arith.constant 0 : i32
    return %arg2, %arg1 : i32, i32
  }
  func.func @transform_2(%arg0: i32, %arg1: i32, %arg2: i32) -> (i32, i32) {
    %c0_i32 = arith.constant 0 : i32
    return %arg0, %arg1 : i32, i32
  }
}

</mosaic_0001>

<bundles_post_ra>
// kernel: tpu_custom_call.1
= control target key start
LH: loop header
LB: loop body
LE: loop exit
PB: predicated region body
PF: predicated region fallthrough
CT: control target
= control target key end

     0   :  { %6 = vsyncpa [#allocation3], 0  ;;  %s127_s0 = inlined_call_operand.hbm [shape: f32[8,128], index: 0, kind: input, shape index: {}]   ;;  %s128_s1 = inlined_call_operand.hbm [shape: f32[8,128], index: 1, kind: output, shape index: {}]  }
   0x1   :  { %7 = vsyncpa [#allocation4], 0  ;;  %s91_s6 = smov [#allocation2]   ;;  %s43_s10 = scalar_lea.hbm %s127_s0, 128 }
   0x2   :  { %s14_s7 = sshll.u32 %s91_s6, 4  ;;  %p44_p0 = scmp.ne.s32.totalorder %s127_s0, %s43_s10  ;;  %s15_s7 = int_to_ptr.vmem [resolvable:$true] %s14_s7 }
   0x3   :  { %p47_p1 = scmp.lt.u32.totalorder %s43_s10, %s127_s0 }
   0x5   :  { %p49_p2 = pnand %p47_p1, %p44_p0 }
   0x7   :  { %52 = shalt.err (!%p49_p2)
}
   0x8   :  { %s53_s15 = scalar_lea.vmem %s15_s7, 128  ;;  %p58_p4 = scmp.lt.s32.totalorder %s15_s7, %s15_s7 }
   0x9   :  { %p54_p3 = scmp.ne.s32.totalorder %s15_s7, %s53_s15  ;;  %p59_p5 = scmp.lt.s32.totalorder %s53_s15, %s53_s15 }
   0xb   :  { %p60_p6 = por %p59_p5, %p58_p4 }
   0xd   :  { %p61_p7 = pnand %p60_p6, %p54_p3 }
   0xf   :  { %64 = shalt.err (!%p61_p7)
}
  0x10   :  { %17 = dma.hbm_to_vmem [thread:$0]  %s127_s0, 128, %s15_s7, [#allocation3]  }
  0x11   :  { %87 = dma.done.wait [#allocation3], 128  }
  0x12   :  { %88 = vsyncadd [#allocation3], 4294967168  ;;  %v21_v0 = vld [vmem:[#allocation2] sm:$0xff]  ;;  %s92_s18 = smov [#allocation5]  }
  0x13   :  { %41 = verf.f32 %v21_v0  ;;  %s30_s19 = sshll.u32 %s92_s18, 4  ;;  %s31_s19 = int_to_ptr.vmem [resolvable:$true] %s30_s19 }
  0x14   :  { %s65_s20 = scalar_lea.vmem %s31_s19, 128  ;;  %p70_p9 = scmp.lt.s32.totalorder %s31_s19, %s31_s19 }
  0x15   :  { %p66_p8 = scmp.ne.s32.totalorder %s31_s19, %s65_s20  ;;  %p71_p10 = scmp.lt.s32.totalorder %s65_s20, %s65_s20 }
  0x17   :  { %p72_p11 = por %p71_p10, %p70_p9 }
  0x19   :  { %p73_p12 = pnand %p72_p11, %p66_p8 }
  0x1d   :  { %v42_v1 = vpop.eup %41 }
  0x1e   :  { %23 = vst [vmem:[#allocation5] sm:$0xff] %v42_v1 }
  0x1f   :  { %76 = shalt.err (!%p73_p12)
}
  0x20   :  { %s77_s0 = scalar_lea.hbm %s128_s1, 128 }
  0x21   :  { %p78_p13 = scmp.ne.s32.totalorder %s128_s1, %s77_s0  ;;  %p81_p0 = scmp.lt.u32.totalorder %s77_s0, %s128_s1 }
  0x23   :  { %p83_p1 = pnand %p81_p0, %p78_p13 }
  0x25   :  { %86 = shalt.err (!%p83_p1)
}
  0x26   :  { %33 = dma.vmem_to_hbm [thread:$0]  %s31_s19, 128, %s128_s1, [#allocation4]  }
  0x27   :  { %89 = dma.done.wait [#allocation4], 128  }
  0x28   :  { %90 = vsyncadd [#allocation4], 4294967168 }
  0x29   :  { %37 = vsyncpa [#allocation3], 1 }
  0x2a   :  { %38 = vsyncpa [#allocation4], 1 }

// kernel: text_decoder_forward.26
= control target key start
LH: loop header
LB: loop body
LE: loop exit
PB: predicated region body
PF: predicated region fallthrough
CT: control target
= control target key end

     0   :  { %v55_v24 = vlaneseq  ;;  %s149_s0 = inlined_call_operand.vmem [shape: bf16[16,256], index: 0, kind: input, shape index: {}]   ;;  %s150_s1 = inlined_call_operand.vmem [shape: f32[1,256], index: 1, kind: input, shape index: {}]   ;;  %s151_s2 = inlined_call_operand.vmem [shape: f32[1,256], index: 2, kind: input, shape index: {}]   ;;  %s152_s3 = inlined_call_operand.vmem [shape: bf16[16,256], index: 3, kind: output, shape index: {}]  }
   0x1   :  { %v14_v0 = vld [vmem:[%s149_s0] sm:$0xff]  ;;  %v15_v1 = vld [vmem:[%s149_s0 + $0x8] sm:$0xff] }
   0x2   :  { %v16_v2 = vunpack.c.l.bf16 %v14_v0  ;;  %v17_v3 = vunpack.c.h.bf16 %v14_v0  ;;  %v18_v4 = vunpack.c.l.bf16 %v15_v1  ;;  %v19_v5 = vunpack.c.h.bf16 %v15_v1  ;;  %v53_v32 = vld [vmem:[%s150_s1] sm:$0x3] }
   0x3   :  { %v56_v28 = vshrl.u32 %v55_v24, 7  ;;  %v69_v33 = vld [vmem:[%s151_s2] sm:$0x3] }
   0x4   :  { %v20_v6 = vadd.f32 %v17_v3, %v16_v2  ;;  %v23_v7 = vadd.f32 %v19_v5, %v18_v4 }
   0x5   :  { %v57_v30 = vsub.s32 0, %v56_v28  ;;  %v61_v31 = vsub.s32 1, %v56_v28 }
   0x6   :  { %21 = vadd.xlane.f32.xlu0 %v20_v6 }
   0x7   :  { %v58_v34 = vrot.slane %v53_v32, %v57_v30  ;;  %v62_v35 = vrot.slane %v53_v32, %v61_v31  ;;  %v74_v37 = vrot.slane %v69_v33, %v57_v30  ;;  %v78_v38 = vrot.slane %v69_v33, %v61_v31 }
   0xa   :  { %24 = vadd.xlane.f32.xlu0 %v23_v7 }
  0x93   :  { %v22_v8 = vpop.xlane.xlu0 %21 }
  0x94   :  { %v27_v9 = vmul.f32 0.00390625, %v22_v8 }
  0x96   :  { %v29_v10 = vsub.f32 %v16_v2, %v27_v9  ;;  %v30_v11 = vsub.f32 %v17_v3, %v27_v9 }
  0x97   :  { %v25_v12 = vpop.xlane.xlu0 %24 }
  0x98   :  { %v28_v13 = vmul.f32 0.00390625, %v25_v12  ;;  %v33_v14 = vmul.f32 %v29_v10, %v29_v10  ;;  %v34_v15 = vmul.f32 %v30_v11, %v30_v11 }
  0x9a   :  { %v31_v16 = vsub.f32 %v18_v4, %v28_v13  ;;  %v32_v17 = vsub.f32 %v19_v5, %v28_v13  ;;  %v37_v18 = vadd.f32 %v34_v15, %v33_v14 }
  0x9c   :  { %38 = vadd.xlane.f32.xlu1 %v37_v18  ;;  %v35_v19 = vmul.f32 %v31_v16, %v31_v16  ;;  %v36_v20 = vmul.f32 %v32_v17, %v32_v17 }
  0x9e   :  { %v40_v21 = vadd.f32 %v36_v20, %v35_v19 }
  0xa0   :  { %41 = vadd.xlane.f32.xlu1 %v40_v21 }
 0x129   :  { %v39_v22 = vpop.xlane.xlu1 %38 }
 0x12a   :  { %v43_v23 = vmul.f32 0.00390625, %v39_v22 }
 0x12c   :  { %v45_v25 = vadd.f32 1e-05, %v43_v23 }
 0x12d   :  { %v42_v26 = vpop.xlane.xlu1 %41 }
 0x12e   :  { %107 = vrsqrt.f32 %v45_v25  ;;  %v44_v27 = vmul.f32 0.00390625, %v42_v26 }
 0x130   :  { %v46_v29 = vadd.f32 1e-05, %v44_v27 }
 0x132   :  { %109 = vrsqrt.f32 %v46_v29 }
 0x138   :  { %v108_v36 = vpop.eup %107 }
 0x139   :  { %v49_v39 = vmul.f32 %v108_v36, %v29_v10  ;;  %v50_v40 = vmul.f32 %v108_v36, %v30_v11 }
 0x13b   :  { %v65_v41 = vmul.f32 %v58_v34, %v49_v39  ;;  %v66_v42 = vmul.f32 %v62_v35, %v50_v40 }
 0x13c   :  { %v110_v43 = vpop.eup %109 }
 0x13d   :  { %v81_v44 = vadd.f32 %v74_v37, %v65_v41  ;;  %v82_v45 = vadd.f32 %v78_v38, %v66_v42  ;;  %v51_v46 = vmul.f32 %v110_v43, %v31_v16  ;;  %v52_v47 = vmul.f32 %v110_v43, %v32_v17 }
 0x13f   :  { %v105_v48 = vpack.c.bf16 %v82_v45, %v81_v44  ;;  %v67_v49 = vmul.f32 %v58_v34, %v51_v46  ;;  %v68_v50 = vmul.f32 %v62_v35, %v52_v47 }
 0x141   :  { %97 = vst [vmem:[%s152_s3] sm:$0xff] %v105_v48  ;;  %v83_v51 = vadd.f32 %v74_v37, %v67_v49  ;;  %v84_v52 = vadd.f32 %v78_v38, %v68_v50 }
 0x143   :  { %v106_v53 = vpack.c.bf16 %v84_v52, %v83_v51 }
 0x145   :  { %98 = vst [vmem:[%s152_s3 + $0x8] sm:$0xff] %v106_v53 }

// kernel: text_decoder_forward.27
= control target key start
LH: loop header
LB: loop body
LE: loop exit
PB: predicated region body
PF: predicated region fallthrough
CT: control target
= control target key end

     0   :  { %s1490_s1 = inlined_call_operand.vmem [shape: bf16[256,768], index: 1, kind: input, shape index: {}]   ;;  %s1491_s0 = inlined_call_operand.vmem [shape: bf16[16,256], index: 0, kind: input, shape index: {}]   ;;  %s1492_s2 = inlined_call_operand.vmem [shape: f32[1,768], index: 2, kind: input, shape index: {}]   ;;  %s1493_s3 = inlined_call_operand.vmem [shape: bf16[16,768], index: 3, kind: output, shape index: {}]  }
   0x1   :  { %v998_v0 = vld [vmem:[%s1490_s1 + $0x4] ss:$24 sps:$4 sm:$0xff]   ;;  %v1000_v1 = vld [vmem:[%s1490_s1] ss:$24 sps:$4 sm:$0xff]   ;;  %v1001_v2 = vld [vmem:[%s1490_s1 + $0x34] ss:$24 sps:$4 sm:$0xff]  }
   0x2   :  { %630 = vmatprep.subr.bf16.mxu0 %v998_v0  ;;  %v1003_v3 = vld [vmem:[%s1490_s1 + $0x30] ss:$24 sps:$4 sm:$0xff]   ;;  %v1004_v4 = vld [vmem:[%s1490_s1 + $0x64] ss:$24 sps:$4 sm:$0xff]   ;;  %v1006_v5 = vld [vmem:[%s1490_s1 + $0x60] ss:$24 sps:$4 sm:$0xff]  }
   0x3   :  { %631 = vmatpush1.bf16.msra.mxu0 %v1000_v1  ;;  %v1007_v6 = vld [vmem:[%s1490_s1 + $0x94] ss:$24 sps:$4 sm:$0xff]   ;;  %v1009_v7 = vld [vmem:[%s1490_s1 + $0x90] ss:$24 sps:$4 sm:$0xff]   ;;  %v1010_v8 = vld [vmem:[%s1490_s1 + $0xc4] ss:$24 sps:$4 sm:$0xff]  }
   0x4   :  { %632 = vmatprep.subr.bf16.mxu0 %v1001_v2  ;;  %v1012_v9 = vld [vmem:[%s1490_s1 + $0xc0] ss:$24 sps:$4 sm:$0xff]   ;;  %v1013_v10 = vld [vmem:[%s1490_s1 + $0xf4] ss:$24 sps:$4 sm:$0xff]   ;;  %v1015_v11 = vld [vmem:[%s1490_s1 + $0xf0] ss:$24 sps:$4 sm:$0xff]  }
   0x5   :  { %v1016_v12 = vld [vmem:[%s1490_s1 + $0x124] ss:$24 sps:$4 sm:$0xff]   ;;  %v1048_v14 = vld [vmem:[%s1490_s1 + $0x8] ss:$24 sps:$4 sm:$0xff]   ;;  %v1019_v17 = vld [vmem:[%s1490_s1 + $0x154] ss:$24 sps:$4 sm:$0xff]  }
   0x6   :  { %v1046_v13 = vld [vmem:[%s1490_s1 + $0xc] ss:$24 sps:$4 sm:$0xff]   ;;  %v1018_v15 = vld [vmem:[%s1490_s1 + $0x120] ss:$24 sps:$4 sm:$0xff]   ;;  %v1055_v18 = vld [vmem:[%s1490_s1 + $0x3c] ss:$24 sps:$4 sm:$0xff]  }
   0x7   :  { %633 = vmatpush1.bf16.msra.mxu0 %v1003_v3  ;;  %v1216_v16 = vld [vmem:[%s1491_s0 + $0x4] ss:$8 sps:$4 sm:$0xff]   ;;  %673 = vmatprep.subr.bf16.mxu1 %v1046_v13  ;;  %v1057_v19 = vld [vmem:[%s1490_s1 + $0x38] ss:$24 sps:$4 sm:$0xff]   ;;  %v1063_v23 = vld [vmem:[%s1490_s1 + $0x68] ss:$24 sps:$4 sm:$0xff]  }
   0x8   :  { %634 = vmatprep.subr.bf16.mxu0 %v1004_v4  ;;  %674 = vmatpush1.bf16.msra.mxu1 %v1048_v14  ;;  %v1021_v20 = vld [vmem:[%s1490_s1 + $0x150] ss:$24 sps:$4 sm:$0xff]   ;;  %v1022_v21 = vld [vmem:[%s1490_s1 + $0x184] ss:$24 sps:$4 sm:$0xff]   ;;  %v1024_v24 = vld [vmem:[%s1490_s1 + $0x180] ss:$24 sps:$4 sm:$0xff]  }
   0x9   :  { %662 = vmatprep.mubr.bf16.mxu0 %v1216_v16  ;;  %705 = vmatprep.mubr.bf16.mxu1 %v1216_v16  ;;  %v1061_v22 = vld [vmem:[%s1490_s1 + $0x6c] ss:$24 sps:$4 sm:$0xff]   ;;  %v1067_v25 = vld [vmem:[%s1490_s1 + $0x9c] ss:$24 sps:$4 sm:$0xff]   ;;  %v1069_v27 = vld [vmem:[%s1490_s1 + $0x98] ss:$24 sps:$4 sm:$0xff]  }
   0xa   :  { %675 = vmatprep.subr.bf16.mxu1 %v1055_v18  ;;  %v1025_v26 = vld [vmem:[%s1490_s1 + $0x1b4] ss:$24 sps:$4 sm:$0xff]   ;;  %v1027_v29 = vld [vmem:[%s1490_s1 + $0x1b0] ss:$24 sps:$4 sm:$0xff]   ;;  %v1028_v30 = vld [vmem:[%s1490_s1 + $0x1e4] ss:$24 sps:$4 sm:$0xff]  }
   0xb   :  { %635 = vmatpush1.bf16.msra.mxu0 %v1006_v5  ;;  %v1073_v28 = vld [vmem:[%s1490_s1 + $0xcc] ss:$24 sps:$4 sm:$0xff]   ;;  %v1075_v31 = vld [vmem:[%s1490_s1 + $0xc8] ss:$24 sps:$4 sm:$0xff]   ;;  %v1079_v32 = vld [vmem:[%s1490_s1 + $0xfc] ss:$24 sps:$4 sm:$0xff]  }
   0xc   :  { %636 = vmatprep.subr.bf16.mxu0 %v1007_v6  ;;  %676 = vmatpush1.bf16.msra.mxu1 %v1057_v19  ;;  %v1030_v33 = vld [vmem:[%s1490_s1 + $0x1e0] ss:$24 sps:$4 sm:$0xff]   ;;  %v1031_v34 = vld [vmem:[%s1490_s1 + $0x214] ss:$24 sps:$4 sm:$0xff]   ;;  %v1033_v37 = vld [vmem:[%s1490_s1 + $0x210] ss:$24 sps:$4 sm:$0xff]  }
   0xd   :  { %677 = vmatprep.subr.bf16.mxu1 %v1061_v22  ;;  %v1081_v35 = vld [vmem:[%s1490_s1 + $0xf8] ss:$24 sps:$4 sm:$0xff]   ;;  %v1085_v36 = vld [vmem:[%s1490_s1 + $0x12c] ss:$24 sps:$4 sm:$0xff]   ;;  %v1087_v39 = vld [vmem:[%s1490_s1 + $0x128] ss:$24 sps:$4 sm:$0xff]  }
   0xe   :  { %v1034_v38 = vld [vmem:[%s1490_s1 + $0x244] ss:$24 sps:$4 sm:$0xff]   ;;  %v1036_v41 = vld [vmem:[%s1490_s1 + $0x240] ss:$24 sps:$4 sm:$0xff]   ;;  %v1037_v42 = vld [vmem:[%s1490_s1 + $0x274] ss:$24 sps:$4 sm:$0xff]  }
   0xf   :  { %637 = vmatpush1.bf16.msra.mxu0 %v1009_v7  ;;  %v1091_v40 = vld [vmem:[%s1490_s1 + $0x15c] ss:$24 sps:$4 sm:$0xff]   ;;  %v1093_v43 = vld [vmem:[%s1490_s1 + $0x158] ss:$24 sps:$4 sm:$0xff]   ;;  %v1097_v44 = vld [vmem:[%s1490_s1 + $0x18c] ss:$24 sps:$4 sm:$0xff]  }
  0x10   :  { %638 = vmatprep.subr.bf16.mxu0 %v1010_v8  ;;  %678 = vmatpush1.bf16.msra.mxu1 %v1063_v23  ;;  %v1039_v45 = vld [vmem:[%s1490_s1 + $0x270] ss:$24 sps:$4 sm:$0xff]   ;;  %v1040_v46 = vld [vmem:[%s1490_s1 + $0x2a4] ss:$24 sps:$4 sm:$0xff]   ;;  %v1042_v49 = vld [vmem:[%s1490_s1 + $0x2a0] ss:$24 sps:$4 sm:$0xff]  }
  0x11   :  { %679 = vmatprep.subr.bf16.mxu1 %v1067_v25  ;;  %v1099_v47 = vld [vmem:[%s1490_s1 + $0x188] ss:$24 sps:$4 sm:$0xff]   ;;  %v1103_v48 = vld [vmem:[%s1490_s1 + $0x1bc] ss:$24 sps:$4 sm:$0xff]   ;;  %v1105_v51 = vld [vmem:[%s1490_s1 + $0x1b8] ss:$24 sps:$4 sm:$0xff]  }
  0x12   :  { %v1043_v50 = vld [vmem:[%s1490_s1 + $0x2d4] ss:$24 sps:$4 sm:$0xff]   ;;  %v1045_v53 = vld [vmem:[%s1490_s1 + $0x2d0] ss:$24 sps:$4 sm:$0xff]   ;;  %v1060_v59 = vld [vmem:[%s1490_s1 + $0x44] ss:$24 sps:$4 sm:$0xff]  }
  0x13   :  { %639 = vmatpush1.bf16.msra.mxu0 %v1012_v9  ;;  %v1109_v52 = vld [vmem:[%s1490_s1 + $0x1ec] ss:$24 sps:$4 sm:$0xff]   ;;  %v1111_v55 = vld [vmem:[%s1490_s1 + $0x1e8] ss:$24 sps:$4 sm:$0xff]   ;;  %v1115_v57 = vld [vmem:[%s1490_s1 + $0x21c] ss:$24 sps:$4 sm:$0xff]  }
  0x14   :  { %640 = vmatprep.subr.bf16.mxu0 %v1013_v10  ;;  %680 = vmatpush1.bf16.msra.mxu1 %v1069_v27  ;;  %v1054_v54 = vld [vmem:[%s1490_s1 + $0x14] ss:$24 sps:$4 sm:$0xff]   ;;  %v1340_v56 = vld [vmem:[%s1491_s0] ss:$8 sps:$4 sm:$0xff]   ;;  %v1117_v60 = vld [vmem:[%s1490_s1 + $0x218] ss:$24 sps:$4 sm:$0xff]  }
  0x15   :  { %681 = vmatprep.subr.bf16.mxu1 %v1073_v28  ;;  %v1052_v58 = vld [vmem:[%s1490_s1 + $0x10] ss:$24 sps:$4 sm:$0xff]   ;;  %v1121_v61 = vld [vmem:[%s1490_s1 + $0x24c] ss:$24 sps:$4 sm:$0xff]   ;;  %v1058_v62 = vld [vmem:[%s1490_s1 + $0x40] ss:$24 sps:$4 sm:$0xff]  }
  0x16   :  { %v1066_v63 = vld [vmem:[%s1490_s1 + $0x74] ss:$24 sps:$4 sm:$0xff]   ;;  %v1123_v0 = vld [vmem:[%s1490_s1 + $0x248] ss:$24 sps:$4 sm:$0xff]   ;;  %v1072_v3 = vld [vmem:[%s1490_s1 + $0xa4] ss:$24 sps:$4 sm:$0xff]  }
  0x17   :  { %641 = vmatpush1.bf16.msra.mxu0 %v1015_v11  ;;  %v1127_v1 = vld [vmem:[%s1490_s1 + $0x27c] ss:$24 sps:$4 sm:$0xff]   ;;  %v1064_v2 = vld [vmem:[%s1490_s1 + $0x70] ss:$24 sps:$4 sm:$0xff]   ;;  %v1133_v5 = vld [vmem:[%s1490_s1 + $0x2ac] ss:$24 sps:$4 sm:$0xff]  }
  0x18   :  { %642 = vmatprep.subr.bf16.mxu0 %v1016_v12  ;;  %682 = vmatpush1.bf16.msra.mxu1 %v1075_v31  ;;  %v1129_v4 = vld [vmem:[%s1490_s1 + $0x278] ss:$24 sps:$4 sm:$0xff]   ;;  %v1078_v7 = vld [vmem:[%s1490_s1 + $0xd4] ss:$24 sps:$4 sm:$0xff]   ;;  %v1135_v8 = vld [vmem:[%s1490_s1 + $0x2a8] ss:$24 sps:$4 sm:$0xff]  }
  0x19   :  { %683 = vmatprep.subr.bf16.mxu1 %v1079_v32  ;;  %v1070_v6 = vld [vmem:[%s1490_s1 + $0xa0] ss:$24 sps:$4 sm:$0xff]   ;;  %v1139_v9 = vld [vmem:[%s1490_s1 + $0x2dc] ss:$24 sps:$4 sm:$0xff]   ;;  %v1076_v10 = vld [vmem:[%s1490_s1 + $0xd0] ss:$24 sps:$4 sm:$0xff]  }
  0x1a   :  { %v1084_v11 = vld [vmem:[%s1490_s1 + $0x104] ss:$24 sps:$4 sm:$0xff]   ;;  %v1141_v12 = vld [vmem:[%s1490_s1 + $0x2d8] ss:$24 sps:$4 sm:$0xff]   ;;  %v1090_v14 = vld [vmem:[%s1490_s1 + $0x134] ss:$24 sps:$4 sm:$0xff]  }
  0x1b   :  { %643 = vmatpush1.bf16.msra.mxu0 %v1018_v15  ;;  %v1082_v13 = vld [vmem:[%s1490_s1 + $0x100] ss:$24 sps:$4 sm:$0xff]   ;;  %v1088_v15 = vld [vmem:[%s1490_s1 + $0x130] ss:$24 sps:$4 sm:$0xff]   ;;  %v1102_v18 = vld [vmem:[%s1490_s1 + $0x194] ss:$24 sps:$4 sm:$0xff]  }
  0x1c   :  { %644 = vmatprep.subr.bf16.mxu0 %v1019_v17  ;;  %684 = vmatpush1.bf16.msra.mxu1 %v1081_v35  ;;  %v1094_v17 = vld [vmem:[%s1490_s1 + $0x160] ss:$24 sps:$4 sm:$0xff]   ;;  %v1100_v19 = vld [vmem:[%s1490_s1 + $0x190] ss:$24 sps:$4 sm:$0xff]   ;;  %v1114_v22 = vld [vmem:[%s1490_s1 + $0x1f4] ss:$24 sps:$4 sm:$0xff]  }
  0x1d   :  { %685 = vmatprep.subr.bf16.mxu1 %v1085_v36  ;;  %v1112_v23 = vld [vmem:[%s1490_s1 + $0x1f0] ss:$24 sps:$4 sm:$0xff]   ;;  %v1118_v25 = vld [vmem:[%s1490_s1 + $0x220] ss:$24 sps:$4 sm:$0xff]   ;;  %v1132_v28 = vld [vmem:[%s1490_s1 + $0x284] ss:$24 sps:$4 sm:$0xff]  }
  0x1e   :  { %v1124_v27 = vld [vmem:[%s1490_s1 + $0x250] ss:$24 sps:$4 sm:$0xff]   ;;  %v1144_v32 = vld [vmem:[%s1490_s1 + $0x2e4] ss:$24 sps:$4 sm:$0xff]  }
  0x1f   :  { %645 = vmatpush1.bf16.msra.mxu0 %v1021_v20  ;;  %v1108_v20 = vld [vmem:[%s1490_s1 + $0x1c4] ss:$24 sps:$4 sm:$0xff]   ;;  %v1136_v31 = vld [vmem:[%s1490_s1 + $0x2b0] ss:$24 sps:$4 sm:$0xff]  }
  0x20   :  { %646 = vmatprep.subr.bf16.mxu0 %v1022_v21  ;;  %686 = vmatpush1.bf16.msra.mxu1 %v1087_v39  ;;  %v1106_v21 = vld [vmem:[%s1490_s1 + $0x1c0] ss:$24 sps:$4 sm:$0xff]  }
  0x21   :  { %687 = vmatprep.subr.bf16.mxu1 %v1091_v40 }
  0x23   :  { %647 = vmatpush1.bf16.msra.mxu0 %v1024_v24  ;;  %v1120_v24 = vld [vmem:[%s1490_s1 + $0x224] ss:$24 sps:$4 sm:$0xff]  }
  0x24   :  { %648 = vmatprep.subr.bf16.mxu0 %v1025_v26  ;;  %688 = vmatpush1.bf16.msra.mxu1 %v1093_v43  ;;  %v1126_v26 = vld [vmem:[%s1490_s1 + $0x254] ss:$24 sps:$4 sm:$0xff]  }
  0x25   :  { %689 = vmatprep.subr.bf16.mxu1 %v1097_v44 }
  0x27   :  { %649 = vmatpush1.bf16.msra.mxu0 %v1027_v29  ;;  %v1130_v29 = vld [vmem:[%s1490_s1 + $0x280] ss:$24 sps:$4 sm:$0xff]  }
  0x28   :  { %650 = vmatprep.subr.bf16.mxu0 %v1028_v30  ;;  %690 = vmatpush1.bf16.msra.mxu1 %v1099_v47  ;;  %v1138_v30 = vld [vmem:[%s1490_s1 + $0x2b4] ss:$24 sps:$4 sm:$0xff]  }
  0x29   :  { %691 = vmatprep.subr.bf16.mxu1 %v1103_v48 }
  0x2b   :  { %651 = vmatpush1.bf16.msra.mxu0 %v1030_v33  ;;  %v1142_v33 = vld [vmem:[%s1490_s1 + $0x2e0] ss:$24 sps:$4 sm:$0xff]  }
  0x2c   :  { %652 = vmatprep.subr.bf16.mxu0 %v1031_v34  ;;  %692 = vmatpush1.bf16.msra.mxu1 %v1105_v51  ;;  %v800_v34 = vlaneseq }
  0x2d   :  { %693 = vmatprep.subr.bf16.mxu1 %v1109_v52 }
  0x2e   :  { %v801_v35 = vshrl.u32 %v800_v34, 7 }
  0x2f   :  { %653 = vmatpush1.bf16.msra.mxu0 %v1033_v37  ;;  %v798_v37 = vld [vmem:[%s1492_s2] sm:$0x3f] }
  0x30   :  { %654 = vmatprep.subr.bf16.mxu0 %v1034_v38  ;;  %694 = vmatpush1.bf16.msra.mxu1 %v1111_v55  ;;  %v818_v36 = vsub.s32 4, %v801_v35  ;;  %v822_v38 = vsub.s32 5, %v801_v35  ;;  %v810_v55 = vsub.s32 2, %v801_v35 }
  0x31   :  { %695 = vmatprep.subr.bf16.mxu1 %v1115_v57 }
  0x32   :  { %v819_v39 = vrot.slane %v798_v37, %v818_v36  ;;  %v823_v40 = vrot.slane %v798_v37, %v822_v38  ;;  %v811_v57 = vrot.slane %v798_v37, %v810_v55 }
  0x33   :  { %655 = vmatpush1.bf16.msra.mxu0 %v1036_v41  ;;  %v802_v41 = vsub.s32 0, %v801_v35 }
  0x34   :  { %656 = vmatprep.subr.bf16.mxu0 %v1037_v42  ;;  %696 = vmatpush1.bf16.msra.mxu1 %v1117_v60  ;;  %v806_v42 = vsub.s32 1, %v801_v35 }
  0x35   :  { %697 = vmatprep.subr.bf16.mxu1 %v1121_v61  ;;  %v803_v43 = vrot.slane %v798_v37, %v802_v41 }
  0x36   :  { %v807_v44 = vrot.slane %v798_v37, %v806_v42 }
  0x37   :  { %657 = vmatpush1.bf16.msra.mxu0 %v1039_v45 }
  0x38   :  { %658 = vmatprep.subr.bf16.mxu0 %v1040_v46  ;;  %698 = vmatpush1.bf16.msra.mxu1 %v1123_v0 }
  0x39   :  { %699 = vmatprep.subr.bf16.mxu1 %v1127_v1 }
  0x3b   :  { %659 = vmatpush1.bf16.msra.mxu0 %v1042_v49 }
  0x3c   :  { %660 = vmatprep.subr.bf16.mxu0 %v1043_v50  ;;  %700 = vmatpush1.bf16.msra.mxu1 %v1129_v4 }
  0x3d   :  { %701 = vmatprep.subr.bf16.mxu1 %v1133_v5 }
  0x3f   :  { %661 = vmatpush1.bf16.msra.mxu0 %v1045_v53 }
  0x40   :  { %716 = vmatprep.subr.bf16.mxu0 %v1054_v54  ;;  %702 = vmatpush1.bf16.msra.mxu1 %v1135_v8 }
  0x41   :  { %703 = vmatprep.subr.bf16.mxu1 %v1139_v9 }
  0x42   :  { %663 = vmatmul.mubr.bf16.vlgmr.msra.gmra.mrb[0].mxu0 %v1340_v56 }
  0x43   :  { %717 = vmatpush1.bf16.msra.mxu0 %v1052_v58  ;;  %748 = vmatprep.mubr.bf16.mxu0 %v1216_v16  ;;  %v1096_v16 = vld [vmem:[%s1490_s1 + $0x164] ss:$24 sps:$4 sm:$0xff]  }
  0x44   :  { %718 = vmatprep.subr.bf16.mxu0 %v1060_v59  ;;  %704 = vmatpush1.bf16.msra.mxu1 %v1141_v12 }
  0x47   :  { %719 = vmatpush1.bf16.msra.mxu0 %v1058_v62  ;;  %706 = vmatmul.mubr.bf16.vlgmr.msra.gmra.mrb[0].mxu1 %v1340_v56 }
  0x48   :  { %720 = vmatprep.subr.bf16.mxu0 %v1066_v63 }
  0x4b   :  { %721 = vmatpush1.bf16.msra.mxu0 %v1064_v2 }
  0x4c   :  { %722 = vmatprep.subr.bf16.mxu0 %v1072_v3 }
  0x4f   :  { %723 = vmatpush1.bf16.msra.mxu0 %v1070_v6 }
  0x50   :  { %724 = vmatprep.subr.bf16.mxu0 %v1078_v7 }
  0x53   :  { %725 = vmatpush1.bf16.msra.mxu0 %v1076_v10 }
  0x54   :  { %726 = vmatprep.subr.bf16.mxu0 %v1084_v11 }
  0x57   :  { %727 = vmatpush1.bf16.msra.mxu0 %v1082_v13 }
  0x58   :  { %728 = vmatprep.subr.bf16.mxu0 %v1090_v14 }
  0x5b   :  { %729 = vmatpush1.bf16.msra.mxu0 %v1088_v15 }
  0x5c   :  { %730 = vmatprep.subr.bf16.mxu0 %v1096_v16 }
  0x5f   :  { %731 = vmatpush1.bf16.msra.mxu0 %v1094_v17 }
  0x60   :  { %732 = vmatprep.subr.bf16.mxu0 %v1102_v18 }
  0x63   :  { %733 = vmatpush1.bf16.msra.mxu0 %v1100_v19 }
  0x64   :  { %734 = vmatprep.subr.bf16.mxu0 %v1108_v20 }
  0x67   :  { %735 = vmatpush1.bf16.msra.mxu0 %v1106_v21 }
  0x68   :  { %736 = vmatprep.subr.bf16.mxu0 %v1114_v22 }
  0x6b   :  { %737 = vmatpush1.bf16.msra.mxu0 %v1112_v23 }
  0x6c   :  { %738 = vmatprep.subr.bf16.mxu0 %v1120_v24 }
  0x6f   :  { %739 = vmatpush1.bf16.msra.mxu0 %v1118_v25 }
  0x70   :  { %740 = vmatprep.subr.bf16.mxu0 %v1126_v26 }
  0x73   :  { %741 = vmatpush1.bf16.msra.mxu0 %v1124_v27 }
  0x74   :  { %742 = vmatprep.subr.bf16.mxu0 %v1132_v28 }
  0x77   :  { %743 = vmatpush1.bf16.msra.mxu0 %v1130_v29 }
  0x78   :  { %744 = vmatprep.subr.bf16.mxu0 %v1138_v30 }
  0x7b   :  { %745 = vmatpush1.bf16.msra.mxu0 %v1136_v31 }
  0x7c   :  { %746 = vmatprep.subr.bf16.mxu0 %v1144_v32 }
  0x7f   :  { %747 = vmatpush1.bf16.msra.mxu0 %v1142_v33 }
  0x82   :  { %749 = vmatmul.mubr.bf16.vlgmr.msra.gmra.mrb[4].mxu0 %v1340_v56  ;;  %v814_v56 = vsub.s32 3, %v801_v35 }
  0x84   :  { %v815_v58 = vrot.slane %v798_v37, %v814_v56 }
 0x115   :  { %v664_v45 = vpop.f32.mrb[0].mxu0 }
 0x116   :  { %v830_v46 = vadd.f32 %v803_v43, %v664_v45  ;;  %v666_v47 = vpop.f32.mrb[1].mxu0 }
 0x117   :  { %v831_v48 = vadd.f32 %v807_v44, %v666_v47  ;;  %v668_v49 = vpop.f32.mrb[2].mxu0 }
 0x118   :  { %v836_v50 = vadd.f32 %v803_v43, %v668_v49  ;;  %v670_v51 = vpop.f32.mrb[3].mxu0 }
 0x119   :  { %v992_v52 = vpack.c.bf16 %v831_v48, %v830_v46  ;;  %v837_v53 = vadd.f32 %v807_v44, %v670_v51 }
 0x11a   :  { %v707_v59 = vpop.f32.mrb[0].mxu1 }
 0x11b   :  { %878 = vst [vmem:[%s1493_s3] sm:$0xff] %v992_v52  ;;  %v995_v54 = vpack.c.bf16 %v837_v53, %v836_v50  ;;  %v832_v60 = vadd.f32 %v811_v57, %v707_v59  ;;  %v709_v61 = vpop.f32.mrb[1].mxu1 }
 0x11c   :  { %v833_v62 = vadd.f32 %v815_v58, %v709_v61  ;;  %v711_v63 = vpop.f32.mrb[2].mxu1 }
 0x11d   :  { %881 = vst [vmem:[%s1493_s3 + $0x18] sm:$0xff] %v995_v54  ;;  %v838_v0 = vadd.f32 %v811_v57, %v711_v63  ;;  %v713_v1 = vpop.f32.mrb[3].mxu1 }
 0x11e   :  { %v993_v2 = vpack.c.bf16 %v833_v62, %v832_v60  ;;  %v839_v3 = vadd.f32 %v815_v58, %v713_v1 }
 0x120   :  { %879 = vst [vmem:[%s1493_s3 + $0x8] sm:$0xff] %v993_v2  ;;  %v996_v4 = vpack.c.bf16 %v839_v3, %v838_v0 }
 0x122   :  { %882 = vst [vmem:[%s1493_s3 + $0x20] sm:$0xff] %v996_v4 }
 0x155   :  { %v750_v5 = vpop.f32.mrb[4].mxu0 }
 0x156   :  { %v834_v6 = vadd.f32 %v819_v39, %v750_v5  ;;  %v752_v7 = vpop.f32.mrb[5].mxu0 }
 0x157   :  { %v835_v8 = vadd.f32 %v823_v40, %v752_v7  ;;  %v754_v9 = vpop.f32.mrb[6].mxu0 }
 0x158   :  { %v840_v10 = vadd.f32 %v819_v39, %v754_v9  ;;  %v756_v11 = vpop.f32.mrb[7].mxu0 }
 0x159   :  { %v994_v12 = vpack.c.bf16 %v835_v8, %v834_v6  ;;  %v841_v13 = vadd.f32 %v823_v40, %v756_v11 }
 0x15b   :  { %880 = vst [vmem:[%s1493_s3 + $0x10] sm:$0xff] %v994_v12  ;;  %v997_v14 = vpack.c.bf16 %v841_v13, %v840_v10 }
 0x15d   :  { %883 = vst [vmem:[%s1493_s3 + $0x28] sm:$0xff] %v997_v14 }

// kernel: text_decoder_forward.28
= control target key start
LH: loop header
LB: loop body
LE: loop exit
PB: predicated region body
PF: predicated region fallthrough
CT: control target
= control target key end

     0   :  { %s966_s12 = smov 0   ;;  %s968_s13 = smov 0   ;;  %s1096_s0 = inlined_call_operand.vmem [shape: bf16[2,8,768], index: 0, kind: input, shape index: {}, may-alias: {0,1,2}]   ;;  %s1097_s1 = inlined_call_operand.vmem [shape: bf16[2,8,768], index: 1, kind: input, shape index: {}, may-alias: {0,1,2}]   ;;  %s1098_s2 = inlined_call_operand.vmem [shape: bf16[2,8,768], index: 2, kind: input, shape index: {}, may-alias: {0,1,2}]   ;;  %s1099_s3 = inlined_call_operand.vmem [shape: bf16[2,8,256], index: 3, kind: output, shape index: {}]  }
   0x1   :  { %s970_s14 = smov 0   ;;  %s972_s15 = smov 0  }
   0x2   :  { %s974_s16 = smov 0  }
   0x3 LB: > { %s28_s17 = sadd.s32 1, %s931_s14  ;;  %s32_s18 = sadd.s32 1, %s935_s15  ;;  %s939_s16 = sphi %s974_s16, %s13_s16   ;;  %s935_s15 = sphi %s972_s15, %s1105_s15   ;;  %s931_s14 = sphi %s970_s14, %s1104_s14   ;;  %s927_s13 = sphi %s968_s13, %s1103_s13   ;;  %s923_s12 = sphi %s966_s12, %s1102_s12  }
   0x4   : > { %p30_p0 = scmp.ge.s32.totalorder %s28_s17, 2  ;;  %p791_p1 = scmp.ge.s32.totalorder %s939_s16, 1 }
   0x5   : > { %p213_p2 = scmp.lt.s32.totalorder %s939_s16, 5 }
   0x6   : > { %s1107_s17 = smov (%p30_p0, %s28_s17), 0  ;;  %s1109_s18 = smov (!%p30_p0, %s32_s18), %s935_s15 }
   0x7   : > { %p214_p3 = pnand %p791_p1, %p213_p2  ;;  %p34_p4 = scmp.ge.s32.totalorder %s1109_s18, 2 }
   0x8   : > { %p269_p5 = scmp.lt.s32.totalorder (!%p214_p3), %s927_s13, 1  ;;  %s277_s19 = sadd.s32 (!%p214_p3), 2, %s923_s12  ;;  %vm324_vm0 = vcmask (!%p214_p3), 523264   ;;  %v941_v0 = vmov (!%p214_p3), 0.0   ;;  %vm942_vm1 = vmmov (!%p214_p3), 0   ;;  %vm319_vm2 = vcmask (!%p214_p3), 7168  }
   0x9   : > { %s1111_s18 = smov (%p34_p4, %s1109_s18), 0  ;;  %217 = sbr.rel (%p214_p3) target bundleno = 1455 (0x5af), region = 32 }
   0xa   : > { %816 = vmatprep.subr.bf16.mxu0 (!%p214_p3), %v941_v0  ;;  %p282_p6 = scmp.lt.s32.totalorder (!%p214_p3), %s277_s19, 5  ;;  %326 = vst.msk [vmem:[#allocation4 + $0x8] sm:$0xff] (!%p214_p3), %vm324_vm0, %v941_v0  ;;  %325 = vst.msk [vmem:[#allocation4] sm:$0xff] (!%p214_p3), %vm324_vm0, %v941_v0  ;;  %818 = vmatprep.mubr.msk.bf16.mxu0 (!%p214_p3), %vm942_vm1, %v941_v0  ;;  %p271_p7 = scmp.lt.s32.totalorder (!%p214_p3), %s923_s12, 5  ;;  %v943_v5 = vmov (!%p214_p3), -1e+30   ;;  %v332_v6 = vlaneseq (!%p214_p3) }
   0xb   : > { %822 = vmatprep.subr.bf16.mxu1 (!%p214_p3), %v941_v0  ;;  %824 = vmatprep.mubr.msk.bf16.mxu1 (!%p214_p3), %vm942_vm1, %v941_v0  ;;  %320 = vst.msk [vmem:[#allocation2] sm:$0xff] (!%p214_p3), %vm319_vm2, %v943_v5  ;;  %321 = vst.msk [vmem:[#allocation2 + $0x8] sm:$0xff] (!%p214_p3), %vm319_vm2, %v943_v5  ;;  %vm390_vm6 = vcmask (!%p214_p3), 64512   ;;  %v944_v16 = vmov (!%p214_p3), 0   ;;  %s945_s5 = smov (!%p214_p3), 64   ;;  %s291_s6 = sadd.s32 (!%p214_p3), 4, %s923_s12 }
   0xc   : > { %322 = vst.msk [vmem:[#allocation3] sm:$0xff] (!%p214_p3), %vm319_vm2, %v941_v0  ;;  %323 = vst.msk [vmem:[#allocation3 + $0x8] sm:$0xff] (!%p214_p3), %vm319_vm2, %v941_v0  ;;  %v333_v7 = vand.u32 (!%p214_p3), 127, %v332_v6  ;;  %v338_v8 = vshrl.u32 (!%p214_p3), %v332_v6, 7  ;;  %886 = vset.pattern.permute.xlu0 (!%p214_p3), %v944_v16  ;;  %887 = vset.pattern.permute.xlu1 (!%p214_p3), %v944_v16  ;;  %p296_p8 = scmp.lt.s32.totalorder (!%p214_p3), %s291_s6, 5  ;;  %vm425_vm7 = vcmask (!%p214_p3), 1043456  }
   0xd   : > { %p307_p9 = scmp.lt.s32.totalorder (!%p214_p3), %s923_s12, 1  ;;  %vm630_vm8 = vcmask (!%p214_p3), 519168   ;;  %vm648_vm9 = vcmask (!%p214_p3), 1043968  }
   0xe   : > { %vm336_vm3 = vcmp.lt.s32.totalorder (!%p214_p3), %v333_v7, 8  ;;  %vm339_vm4 = vcmp.le.s32.totalorder (!%p214_p3), %v333_v7, %v338_v8 }
   0xf   : > { %vm1035_vm5 = vmand (!%p214_p3), %vm336_vm3, %vm339_vm4 }
  0x10   : > { %s1113_s13 = smov (!%p269_p5, %s927_s13), 1  ;;  %s1115_s19 = smov (!%p282_p6, %s277_s19), 5 }
  0x11   : > { %s1013_s20 = smul.u32 6, %s1113_s13  ;;  %s1117_s6 = smov (!%p296_p8, %s291_s6), 5  ;;  %v414_v8 = vld [vmem:[#allocation4] sm:$0xff] }
  0x12   : > { %s272_s21 = scalar_select %p271_p7, %s923_s12, 5  ;;  %v1044_v19 = vld [vmem:[#allocation2] sm:$0xff]  ;;  %v530_v44 = vld [vmem:[#allocation2 + $0x8] sm:$0xff] }
  0x13   : > { %s287_s22 = sadd.s32 %s1013_s20, %s1115_s19  ;;  %s301_s7 = sadd.s32 %s1013_s20, %s1117_s6  ;;  %v406_v61 = vld [vmem:[#allocation3] sm:$0xff] }
  0x14   : > { %s793_s23 = sshll.u32 %s287_s22, 2  ;;  %s274_s24 = sadd.s32 %s1013_s20, %s272_s21 }
  0x15   : > { %s289_s27 = scalar_lea.vmem %s1097_s1, %s793_s23  ;;  %s792_s28 = sshll.u32 %s274_s24, 2 }
  0x16   : > { %v329_v1 = vld [vmem:[%s289_s27] sm:$0xf]  ;;  %s276_s4 = scalar_lea.vmem %s1096_s0, %s792_s28  ;;  %s794_s8 = sshll.u32 %s301_s7, 2 }
  0x17   : > { %v346_v2 = vsel %vm324_vm0, %v329_v1, 0  ;;  %v327_v3 = vld [vmem:[%s276_s4] sm:$0xf]  ;;  %v800_v17 = vcombine.low %v329_v1, %v329_v1  ;;  %s303_s11 = scalar_lea.vmem %s1098_s2, %s794_s8  ;;  %s1119_s12 = smov (!%p307_p9, %s923_s12), 1 }
  0x18   : > { %817 = vmatpush3.bf16.xpose.msra.mxu0 %v346_v2  ;;  %v328_v4 = vmul.bf16 1040203264, %v327_v3  ;;  %v330_v23 = vld [vmem:[%s303_s11] sm:$0xf]  ;;  %v547_v3 = vld [vmem:[#allocation3 + $0x8] sm:$0xff]  ;;  %s795_s19 = sshll.u32 %s1113_s13, 1 }
  0x19   : > { %834 = vmatprep.subr.bf16.mxu0 %v941_v0  ;;  %480 = vrot.lane.b32.xlu1 %v800_v17, %s945_s5  ;;  %v427_v24 = vsel %vm425_vm7, %v330_v23, 0  ;;  %v802_v25 = vcombine.low %v330_v23, %v330_v23  ;;  %s310_s20 = sadd.s32 %s795_s19, %s1119_s12 }
  0x1a   : > { %v799_v18 = vcombine.low %v328_v4, %v328_v4  ;;  %823 = vmatpush3.bf16.msra.mxu1 %v427_v24  ;;  %s796_s21 = sshll.u32 %s310_s20, 2 }
  0x1b   : > { %828 = vmatprep.subr.bf16.mxu1 %v941_v0  ;;  %s312_s24 = scalar_lea.vmem %s1099_s3, %s796_s21 }
  0x1d   : > { %475 = vrot.lane.b32.xlu1 %v799_v18, %s945_s5  ;;  %v555_v18 = vld [vmem:[#allocation4 + $0x8] sm:$0xff] }
  0x1f   : > { %819 = vmatmul.mubr.msk.bf16.vlgmr.msra.gmra.mrb[0].mxu0 %vm324_vm0, %v328_v4 }
  0x20   : > { %836 = vmatprep.mubr.msk.bf16.mxu0 %vm942_vm1, %v941_v0 }
  0x8b   : > { %v481_v29 = vpop.permute.xlu1 %480 }
  0x8c   : > { %v486_v31 = vsel %vm324_vm0, %v481_v29, 0 }
  0x8f   : > { %v476_v33 = vpop.permute.xlu1 %475 }
  0xf2   : > { %v382_v10 = vpop.f32.mrb[0].mxu0 }
  0xf3   : > { %v388_v11 = vsel %vm1035_vm5, %v382_v10, -1e+30  ;;  %v820_v12 = vpop.f32.mrb[1].mxu0 }
  0xf4   : > { %v385_v13 = vpop.f32.mrb[2].mxu0  ;;  %v391_v14 = vsel %vm390_vm6, %v388_v11, -inf }
  0xf5   : > { %392 = vmax.xlane.f32.xlu0 %v391_v14  ;;  %v821_v15 = vpop.f32.mrb[3].mxu0 }
 0x182   : > { %v393_v20 = vpop.xlane.xlu0 %392 }
 0x183   : > { %v394_v21 = vmax.f32 %v1044_v19, %v393_v20 }
 0x185   : > { %v395_v22 = vsub.f32 %v1044_v19, %v394_v21  ;;  %471 = vst.msk [vmem:[#allocation2] sm:$0xff] %vm319_vm2, %v394_v21  ;;  %400 = vperm.xlu0 %886, %v394_v21  }
 0x187   : > { %v396_v58 = vmul.f32 1.442695, %v395_v22 }
 0x189   : > { %566 = vrot.lane.b32.xlu0 %v802_v25, %s945_s5 }
 0x204   : > { %v401_v26 = vpop.permute.xlu0 %400 }
 0x205   : > { %v403_v27 = vsub.f32 %v388_v11, %v401_v26 }
 0x207   : > { %v404_v28 = vmul.f32 1.442695, %v403_v27 }
 0x208   : > { %v567_v48 = vpop.permute.xlu0 %566 }
 0x209   : > { %889 = vpow2.f32 %v404_v28  ;;  %v572_v49 = vsel %vm425_vm7, %v567_v48, 0 }
 0x20a   : > { %835 = vmatpush3.bf16.msra.mxu0 %v572_v49 }
 0x213   : > { %v890_v30 = vpop.eup %889 }
 0x214   : > { %v421_v32 = vpack.c.bf16 %v890_v30, %v890_v30  ;;  %v408_v50 = vsel %vm390_vm6, %v890_v30, 0.0 }
 0x216   : > { %825 = vmatmul.mubr.msk.bf16.vlgmr.msra.gmra.mrb[0].mxu1 %vm390_vm6, %v421_v32 }
 0x217   : > { %829 = vmatpush3.bf16.xpose.msra.mxu1 %v486_v31  ;;  %830 = vmatprep.mubr.msk.bf16.mxu1 %vm942_vm1, %v941_v0 }
 0x21e   : > { %831 = vmatmul.mubr.msk.bf16.vlgmr.msra.gmra.mrb[4].mxu1 %vm324_vm0, %v476_v33 }
 0x2e9   : > { %v463_v34 = vpop.f32.mrb[0].mxu1 }
 0x2ea   : > { %v826_v35 = vpop.f32.mrb[1].mxu1 }
 0x2eb   : > { %v466_v36 = vpop.f32.mrb[2].mxu1 }
 0x2ec   : > { %v827_v37 = vpop.f32.mrb[3].mxu1 }
 0x2f1   : > { %v522_v38 = vpop.f32.mrb[4].mxu1 }
 0x2f2   : > { %v528_v39 = vsel %vm1035_vm5, %v522_v38, -1e+30  ;;  %v832_v40 = vpop.f32.mrb[5].mxu1 }
 0x2f3   : > { %v525_v41 = vpop.f32.mrb[6].mxu1  ;;  %v531_v42 = vsel %vm390_vm6, %v528_v39, -inf }
 0x2f4   : > { %532 = vmax.xlane.f32.xlu1 %v531_v42  ;;  %v833_v43 = vpop.f32.mrb[7].mxu1 }
 0x381   : > { %v533_v45 = vpop.xlane.xlu1 %532 }
 0x382   : > { %v534_v46 = vmax.f32 %v530_v44, %v533_v45 }
 0x384   : > { %v535_v47 = vsub.f32 %v530_v44, %v534_v46  ;;  %616 = vst.msk [vmem:[#allocation2 + $0x8] sm:$0xff] %vm319_vm2, %v534_v46  ;;  %540 = vperm.xlu1 %887, %v534_v46  }
 0x386   : > { %v536_v57 = vmul.f32 1.442695, %v535_v47 }
 0x3a8   : > { %409 = vadd.xlane.f32.xlu1 %v408_v50 }
 0x403   : > { %v541_v51 = vpop.permute.xlu1 %540 }
 0x404   : > { %v543_v52 = vsub.f32 %v528_v39, %v541_v51 }
 0x406   : > { %v544_v53 = vmul.f32 1.442695, %v543_v52 }
 0x408   : > { %891 = vpow2.f32 %v544_v53 }
 0x409   : > { %893 = vpow2.f32 %v536_v57 }
 0x40a   : > { %895 = vpow2.f32 %v396_v58 }
 0x412   : > { %v892_v54 = vpop.eup %891 }
 0x413   : > { %v549_v55 = vsel %vm390_vm6, %v892_v54, 0.0  ;;  %v562_v56 = vpack.c.bf16 %v892_v54, %v892_v54  ;;  %v894_v59 = vpop.eup %893 }
 0x414   : > { %550 = vadd.xlane.f32.xlu0 %v549_v55  ;;  %v896_v60 = vpop.eup %895  ;;  %v548_v4 = vmul.f32 %v894_v59, %v547_v3 }
 0x415   : > { %837 = vmatmul.mubr.msk.bf16.vlgmr.msra.gmra.mrb[4].mxu0 %vm390_vm6, %v562_v56  ;;  %v407_v62 = vmul.f32 %v896_v60, %v406_v61 }
 0x42a   : > { %558 = vperm.xlu0 %886, %v894_v59  }
 0x42e   : > { %417 = vperm.xlu0 %886, %v896_v60  }
 0x435   : > { %v410_v63 = vpop.xlane.xlu1 %409 }
 0x436   : > { %v411_v0 = vadd.f32 %v410_v63, %v407_v62 }
 0x438   : > { %413 = vst.msk [vmem:[#allocation3] sm:$0xff] %vm319_vm2, %v411_v0 }
 0x43f   : > { %v620_v1 = vld [vmem:[#allocation3] sm:$0xff] }
 0x440   : > { %897 = vrcp.f32 %v620_v1 }
 0x44a   : > { %v898_v2 = vpop.eup %897 }
 0x44b   : > { %625 = vperm.xlu0 %886, %v898_v2  }
 0x4a1   : > { %v551_v5 = vpop.xlane.xlu0 %550 }
 0x4a2   : > { %v552_v6 = vadd.f32 %v551_v5, %v548_v4 }
 0x4a4   : > { %553 = vst.msk [vmem:[#allocation3 + $0x8] sm:$0xff] %vm319_vm2, %v552_v6 }
 0x4a9   : > { %v559_v7 = vpop.permute.xlu0 %558 }
 0x4aa   : > { %v561_v19 = vmul.f32 %v559_v7, %v555_v18 }
 0x4ab   : > { %v632_v9 = vld [vmem:[#allocation3 + $0x8] sm:$0xff] }
 0x4ac   : > { %899 = vrcp.f32 %v632_v9 }
 0x4ad   : > { %v418_v10 = vpop.permute.xlu0 %417 }
 0x4ae   : > { %v420_v11 = vmul.f32 %v418_v10, %v414_v8 }
 0x4b0   : > { %v469_v12 = vadd.f32 %v463_v34, %v420_v11 }
 0x4b2   : > { %470 = vst.msk [vmem:[#allocation4] sm:$0xff] %vm324_vm0, %v469_v12 }
 0x4b6   : > { %v900_v13 = vpop.eup %899 }
 0x4b7   : > { %637 = vperm.xlu1 %887, %v900_v13  }
 0x4b9   : > { %v622_v14 = vld [vmem:[#allocation4] sm:$0xff] }
 0x4ca   : > { %v626_v15 = vpop.permute.xlu0 %625 }
 0x4cb   : > { %v628_v16 = vmul.f32 %v626_v15, %v622_v14 }
 0x4cd   : > { %v629_v17 = vpack.c.bf16 %v628_v16, %v628_v16 }
 0x4cf   : > { %631 = vst.msk [vmem:[%s312_s24] sm:$0xf] %vm630_vm8, %v629_v17 }
 0x4e8   : > { %v608_v20 = vpop.f32.mrb[4].mxu0 }
 0x4e9   : > { %v614_v21 = vadd.f32 %v608_v20, %v561_v19  ;;  %v838_v22 = vpop.f32.mrb[5].mxu0 }
 0x4ea   : > { %v611_v23 = vpop.f32.mrb[6].mxu0 }
 0x4eb   : > { %615 = vst.msk [vmem:[#allocation4 + $0x8] sm:$0xff] %vm324_vm0, %v614_v21  ;;  %v839_v24 = vpop.f32.mrb[7].mxu0 }
 0x4f2   : > { %v634_v26 = vld [vmem:[#allocation4 + $0x8] sm:$0xff] }
 0x536   : > { %v638_v25 = vpop.permute.xlu1 %637 }
 0x537   : > { %v640_v27 = vmul.f32 %v638_v25, %v634_v26 }
 0x539   : > { %v807_v28 = vpack.c.bf16 %v640_v27, %v640_v27 }
 0x53b   : > { %645 = vrot.lane.b32.xlu0 %v807_v28, %s945_s5 }
 0x5ad   : > { %v646_v29 = vpop.permute.xlu0 %645 }
 0x5ae   : > { %649 = vst.msk [vmem:[%s312_s24] sm:$0xf] %vm648_vm9, %v646_v29 }
 0x5af PF: > { %s13_s16 = sadd.s32 1, %s939_s16   ;;  %s1102_s12 = smov %s931_s14 }
 0x5b0   : > { %p10_p10 = scmp.ge.s32.totalorder %s13_s16, 6   ;;  %s1103_s13 = smov %s935_s15 }
 0x5b1   : > { %s1104_s14 = smov %s1107_s17  ;;  %s1105_s15 = smov %s1111_s18 }
 0x5b2   :  { %12 = sbr.rel (!%p10_p10) target bundleno = 3 (0x3), region = 79 }

// kernel: text_decoder_forward.29
= control target key start
LH: loop header
LB: loop body
LE: loop exit
PB: predicated region body
PF: predicated region fallthrough
CT: control target
= control target key end

     0   :  { %v293_v34 = vlaneseq  ;;  %s566_s1 = inlined_call_operand.vmem [shape: bf16[256,256], index: 1, kind: input, shape index: {}]   ;;  %s567_s0 = inlined_call_operand.vmem [shape: bf16[16,256], index: 0, kind: input, shape index: {}]   ;;  %s568_s2 = inlined_call_operand.vmem [shape: f32[1,256], index: 2, kind: input, shape index: {}]   ;;  %s569_s3 = inlined_call_operand.vmem [shape: bf16[16,256], index: 3, kind: input, shape index: {}]   ;;  %s570_s4 = inlined_call_operand.vmem [shape: bf16[16,256], index: 4, kind: output, shape index: {}]  }
   0x1   :  { %v373_v0 = vld [vmem:[%s566_s1 + $0x4] ss:$8 sps:$4 sm:$0xff]   ;;  %v375_v1 = vld [vmem:[%s566_s1] ss:$8 sps:$4 sm:$0xff]   ;;  %v376_v2 = vld [vmem:[%s566_s1 + $0x14] ss:$8 sps:$4 sm:$0xff]  }
   0x2   :  { %233 = vmatprep.subr.bf16.mxu0 %v373_v0  ;;  %v378_v3 = vld [vmem:[%s566_s1 + $0x10] ss:$8 sps:$4 sm:$0xff]   ;;  %v379_v4 = vld [vmem:[%s566_s1 + $0x24] ss:$8 sps:$4 sm:$0xff]   ;;  %v381_v5 = vld [vmem:[%s566_s1 + $0x20] ss:$8 sps:$4 sm:$0xff]  }
   0x3   :  { %234 = vmatpush1.bf16.msra.mxu0 %v375_v1  ;;  %v382_v6 = vld [vmem:[%s566_s1 + $0x34] ss:$8 sps:$4 sm:$0xff]   ;;  %v384_v7 = vld [vmem:[%s566_s1 + $0x30] ss:$8 sps:$4 sm:$0xff]   ;;  %v385_v8 = vld [vmem:[%s566_s1 + $0x44] ss:$8 sps:$4 sm:$0xff]  }
   0x4   :  { %235 = vmatprep.subr.bf16.mxu0 %v376_v2  ;;  %v387_v9 = vld [vmem:[%s566_s1 + $0x40] ss:$8 sps:$4 sm:$0xff]   ;;  %v388_v10 = vld [vmem:[%s566_s1 + $0x54] ss:$8 sps:$4 sm:$0xff]   ;;  %v390_v11 = vld [vmem:[%s566_s1 + $0x50] ss:$8 sps:$4 sm:$0xff]  }
   0x5   :  { %v391_v12 = vld [vmem:[%s566_s1 + $0x64] ss:$8 sps:$4 sm:$0xff]   ;;  %v393_v14 = vld [vmem:[%s566_s1 + $0x60] ss:$8 sps:$4 sm:$0xff]   ;;  %v394_v15 = vld [vmem:[%s566_s1 + $0x74] ss:$8 sps:$4 sm:$0xff]  }
   0x6   :  { %v423_v13 = vld [vmem:[%s567_s0 + $0x4] ss:$8 sps:$4 sm:$0xff]   ;;  %v396_v16 = vld [vmem:[%s566_s1 + $0x70] ss:$8 sps:$4 sm:$0xff]   ;;  %v399_v18 = vld [vmem:[%s566_s1 + $0x80] ss:$8 sps:$4 sm:$0xff]  }
   0x7   :  { %236 = vmatpush1.bf16.msra.mxu0 %v378_v3  ;;  %265 = vmatprep.mubr.bf16.mxu0 %v423_v13  ;;  %v397_v17 = vld [vmem:[%s566_s1 + $0x84] ss:$8 sps:$4 sm:$0xff]   ;;  %v400_v19 = vld [vmem:[%s566_s1 + $0x94] ss:$8 sps:$4 sm:$0xff]   ;;  %v402_v20 = vld [vmem:[%s566_s1 + $0x90] ss:$8 sps:$4 sm:$0xff]  }
   0x8   :  { %237 = vmatprep.subr.bf16.mxu0 %v379_v4  ;;  %v403_v21 = vld [vmem:[%s566_s1 + $0xa4] ss:$8 sps:$4 sm:$0xff]   ;;  %v405_v22 = vld [vmem:[%s566_s1 + $0xa0] ss:$8 sps:$4 sm:$0xff]   ;;  %v406_v23 = vld [vmem:[%s566_s1 + $0xb4] ss:$8 sps:$4 sm:$0xff]  }
   0x9   :  { %v408_v24 = vld [vmem:[%s566_s1 + $0xb0] ss:$8 sps:$4 sm:$0xff]   ;;  %v409_v25 = vld [vmem:[%s566_s1 + $0xc4] ss:$8 sps:$4 sm:$0xff]   ;;  %v411_v26 = vld [vmem:[%s566_s1 + $0xc0] ss:$8 sps:$4 sm:$0xff]  }
   0xa   :  { %v412_v27 = vld [vmem:[%s566_s1 + $0xd4] ss:$8 sps:$4 sm:$0xff]   ;;  %v414_v28 = vld [vmem:[%s566_s1 + $0xd0] ss:$8 sps:$4 sm:$0xff]   ;;  %v415_v29 = vld [vmem:[%s566_s1 + $0xe4] ss:$8 sps:$4 sm:$0xff]  }
   0xb   :  { %238 = vmatpush1.bf16.msra.mxu0 %v381_v5  ;;  %v417_v30 = vld [vmem:[%s566_s1 + $0xe0] ss:$8 sps:$4 sm:$0xff]   ;;  %v418_v31 = vld [vmem:[%s566_s1 + $0xf4] ss:$8 sps:$4 sm:$0xff]   ;;  %v420_v32 = vld [vmem:[%s566_s1 + $0xf0] ss:$8 sps:$4 sm:$0xff]  }
   0xc   :  { %239 = vmatprep.subr.bf16.mxu0 %v382_v6  ;;  %v421_v33 = vld [vmem:[%s567_s0] ss:$8 sps:$4 sm:$0xff]   ;;  %v294_v35 = vshrl.u32 %v293_v34, 7 }
   0xd   :  { %v291_v37 = vld [vmem:[%s568_s2] sm:$0x3]  ;;  %v308_v42 = vld [vmem:[%s569_s3 + $0x8] sm:$0xff] }
   0xe   :  { %v295_v36 = vsub.s32 0, %v294_v35  ;;  %v299_v38 = vsub.s32 1, %v294_v35  ;;  %v307_v39 = vld [vmem:[%s569_s3] sm:$0xff]  ;;  %v311_v48 = vunpack.c.l.bf16 %v308_v42  ;;  %v312_v51 = vunpack.c.h.bf16 %v308_v42 }
   0xf   :  { %240 = vmatpush1.bf16.msra.mxu0 %v384_v7  ;;  %v309_v43 = vunpack.c.l.bf16 %v307_v39  ;;  %v310_v45 = vunpack.c.h.bf16 %v307_v39 }
  0x10   :  { %241 = vmatprep.subr.bf16.mxu0 %v385_v8  ;;  %v296_v40 = vrot.slane %v291_v37, %v295_v36  ;;  %v300_v41 = vrot.slane %v291_v37, %v299_v38 }
  0x13   :  { %242 = vmatpush1.bf16.msra.mxu0 %v387_v9 }
  0x14   :  { %243 = vmatprep.subr.bf16.mxu0 %v388_v10 }
  0x17   :  { %244 = vmatpush1.bf16.msra.mxu0 %v390_v11 }
  0x18   :  { %245 = vmatprep.subr.bf16.mxu0 %v391_v12 }
  0x1b   :  { %246 = vmatpush1.bf16.msra.mxu0 %v393_v14 }
  0x1c   :  { %247 = vmatprep.subr.bf16.mxu0 %v394_v15 }
  0x1f   :  { %248 = vmatpush1.bf16.msra.mxu0 %v396_v16 }
  0x20   :  { %249 = vmatprep.subr.bf16.mxu0 %v397_v17 }
  0x23   :  { %250 = vmatpush1.bf16.msra.mxu0 %v399_v18 }
  0x24   :  { %251 = vmatprep.subr.bf16.mxu0 %v400_v19 }
  0x27   :  { %252 = vmatpush1.bf16.msra.mxu0 %v402_v20 }
  0x28   :  { %253 = vmatprep.subr.bf16.mxu0 %v403_v21 }
  0x2b   :  { %254 = vmatpush1.bf16.msra.mxu0 %v405_v22 }
  0x2c   :  { %255 = vmatprep.subr.bf16.mxu0 %v406_v23 }
  0x2f   :  { %256 = vmatpush1.bf16.msra.mxu0 %v408_v24 }
  0x30   :  { %257 = vmatprep.subr.bf16.mxu0 %v409_v25 }
  0x33   :  { %258 = vmatpush1.bf16.msra.mxu0 %v411_v26 }
  0x34   :  { %259 = vmatprep.subr.bf16.mxu0 %v412_v27 }
  0x37   :  { %260 = vmatpush1.bf16.msra.mxu0 %v414_v28 }
  0x38   :  { %261 = vmatprep.subr.bf16.mxu0 %v415_v29 }
  0x3b   :  { %262 = vmatpush1.bf16.msra.mxu0 %v417_v30 }
  0x3c   :  { %263 = vmatprep.subr.bf16.mxu0 %v418_v31 }
  0x3f   :  { %264 = vmatpush1.bf16.msra.mxu0 %v420_v32 }
  0x42   :  { %266 = vmatmul.mubr.bf16.vlgmr.msra.gmra.mrb[0].mxu0 %v421_v33 }
 0x115   :  { %v267_v44 = vpop.f32.mrb[0].mxu0 }
 0x116   :  { %v303_v46 = vadd.f32 %v296_v40, %v267_v44  ;;  %v269_v47 = vpop.f32.mrb[1].mxu0 }
 0x117   :  { %v304_v49 = vadd.f32 %v300_v41, %v269_v47  ;;  %v271_v50 = vpop.f32.mrb[2].mxu0 }
 0x118   :  { %v313_v52 = vadd.f32 %v309_v43, %v303_v46  ;;  %v305_v53 = vadd.f32 %v296_v40, %v271_v50  ;;  %v273_v54 = vpop.f32.mrb[3].mxu0 }
 0x119   :  { %v314_v55 = vadd.f32 %v310_v45, %v304_v49  ;;  %v306_v56 = vadd.f32 %v300_v41, %v273_v54 }
 0x11a   :  { %v315_v57 = vadd.f32 %v311_v48, %v305_v53 }
 0x11b   :  { %v371_v58 = vpack.c.bf16 %v314_v55, %v313_v52  ;;  %v316_v59 = vadd.f32 %v312_v51, %v306_v56 }
 0x11d   :  { %329 = vst [vmem:[%s570_s4] sm:$0xff] %v371_v58  ;;  %v372_v60 = vpack.c.bf16 %v316_v59, %v315_v57 }
 0x11f   :  { %330 = vst [vmem:[%s570_s4 + $0x8] sm:$0xff] %v372_v60 }

// kernel: text_decoder_forward.31
= control target key start
LH: loop header
LB: loop body
LE: loop exit
PB: predicated region body
PF: predicated region fallthrough
CT: control target
= control target key end

     0   :  { %v290_v34 = vlaneseq  ;;  %s542_s1 = inlined_call_operand.vmem [shape: bf16[256,256], index: 1, kind: input, shape index: {}]   ;;  %s543_s0 = inlined_call_operand.vmem [shape: bf16[16,256], index: 0, kind: input, shape index: {}]   ;;  %s544_s2 = inlined_call_operand.vmem [shape: f32[1,256], index: 2, kind: input, shape index: {}]   ;;  %s545_s3 = inlined_call_operand.vmem [shape: bf16[16,256], index: 3, kind: output, shape index: {}]  }
   0x1   :  { %v360_v0 = vld [vmem:[%s542_s1 + $0x4] ss:$8 sps:$4 sm:$0xff]   ;;  %v362_v1 = vld [vmem:[%s542_s1] ss:$8 sps:$4 sm:$0xff]   ;;  %v363_v2 = vld [vmem:[%s542_s1 + $0x14] ss:$8 sps:$4 sm:$0xff]  }
   0x2   :  { %230 = vmatprep.subr.bf16.mxu0 %v360_v0  ;;  %v365_v3 = vld [vmem:[%s542_s1 + $0x10] ss:$8 sps:$4 sm:$0xff]   ;;  %v366_v4 = vld [vmem:[%s542_s1 + $0x24] ss:$8 sps:$4 sm:$0xff]   ;;  %v368_v5 = vld [vmem:[%s542_s1 + $0x20] ss:$8 sps:$4 sm:$0xff]  }
   0x3   :  { %231 = vmatpush1.bf16.msra.mxu0 %v362_v1  ;;  %v369_v6 = vld [vmem:[%s542_s1 + $0x34] ss:$8 sps:$4 sm:$0xff]   ;;  %v371_v7 = vld [vmem:[%s542_s1 + $0x30] ss:$8 sps:$4 sm:$0xff]   ;;  %v372_v8 = vld [vmem:[%s542_s1 + $0x44] ss:$8 sps:$4 sm:$0xff]  }
   0x4   :  { %232 = vmatprep.subr.bf16.mxu0 %v363_v2  ;;  %v374_v9 = vld [vmem:[%s542_s1 + $0x40] ss:$8 sps:$4 sm:$0xff]   ;;  %v375_v10 = vld [vmem:[%s542_s1 + $0x54] ss:$8 sps:$4 sm:$0xff]   ;;  %v377_v11 = vld [vmem:[%s542_s1 + $0x50] ss:$8 sps:$4 sm:$0xff]  }
   0x5   :  { %v378_v12 = vld [vmem:[%s542_s1 + $0x64] ss:$8 sps:$4 sm:$0xff]   ;;  %v380_v14 = vld [vmem:[%s542_s1 + $0x60] ss:$8 sps:$4 sm:$0xff]   ;;  %v381_v15 = vld [vmem:[%s542_s1 + $0x74] ss:$8 sps:$4 sm:$0xff]  }
   0x6   :  { %v410_v13 = vld [vmem:[%s543_s0 + $0x4] ss:$8 sps:$4 sm:$0xff]   ;;  %v383_v16 = vld [vmem:[%s542_s1 + $0x70] ss:$8 sps:$4 sm:$0xff]   ;;  %v386_v18 = vld [vmem:[%s542_s1 + $0x80] ss:$8 sps:$4 sm:$0xff]  }
   0x7   :  { %233 = vmatpush1.bf16.msra.mxu0 %v365_v3  ;;  %262 = vmatprep.mubr.bf16.mxu0 %v410_v13  ;;  %v384_v17 = vld [vmem:[%s542_s1 + $0x84] ss:$8 sps:$4 sm:$0xff]   ;;  %v387_v19 = vld [vmem:[%s542_s1 + $0x94] ss:$8 sps:$4 sm:$0xff]   ;;  %v389_v20 = vld [vmem:[%s542_s1 + $0x90] ss:$8 sps:$4 sm:$0xff]  }
   0x8   :  { %234 = vmatprep.subr.bf16.mxu0 %v366_v4  ;;  %v390_v21 = vld [vmem:[%s542_s1 + $0xa4] ss:$8 sps:$4 sm:$0xff]   ;;  %v392_v22 = vld [vmem:[%s542_s1 + $0xa0] ss:$8 sps:$4 sm:$0xff]   ;;  %v393_v23 = vld [vmem:[%s542_s1 + $0xb4] ss:$8 sps:$4 sm:$0xff]  }
   0x9   :  { %v395_v24 = vld [vmem:[%s542_s1 + $0xb0] ss:$8 sps:$4 sm:$0xff]   ;;  %v396_v25 = vld [vmem:[%s542_s1 + $0xc4] ss:$8 sps:$4 sm:$0xff]   ;;  %v398_v26 = vld [vmem:[%s542_s1 + $0xc0] ss:$8 sps:$4 sm:$0xff]  }
   0xa   :  { %v399_v27 = vld [vmem:[%s542_s1 + $0xd4] ss:$8 sps:$4 sm:$0xff]   ;;  %v401_v28 = vld [vmem:[%s542_s1 + $0xd0] ss:$8 sps:$4 sm:$0xff]   ;;  %v402_v29 = vld [vmem:[%s542_s1 + $0xe4] ss:$8 sps:$4 sm:$0xff]  }
   0xb   :  { %235 = vmatpush1.bf16.msra.mxu0 %v368_v5  ;;  %v404_v30 = vld [vmem:[%s542_s1 + $0xe0] ss:$8 sps:$4 sm:$0xff]   ;;  %v405_v31 = vld [vmem:[%s542_s1 + $0xf4] ss:$8 sps:$4 sm:$0xff]   ;;  %v407_v32 = vld [vmem:[%s542_s1 + $0xf0] ss:$8 sps:$4 sm:$0xff]  }
   0xc   :  { %236 = vmatprep.subr.bf16.mxu0 %v369_v6  ;;  %v408_v33 = vld [vmem:[%s543_s0] ss:$8 sps:$4 sm:$0xff]   ;;  %v291_v35 = vshrl.u32 %v290_v34, 7 }
   0xd   :  { %v288_v37 = vld [vmem:[%s544_s2] sm:$0x3] }
   0xe   :  { %v292_v36 = vsub.s32 0, %v291_v35  ;;  %v296_v38 = vsub.s32 1, %v291_v35 }
   0xf   :  { %237 = vmatpush1.bf16.msra.mxu0 %v371_v7 }
  0x10   :  { %238 = vmatprep.subr.bf16.mxu0 %v372_v8  ;;  %v293_v39 = vrot.slane %v288_v37, %v292_v36  ;;  %v297_v40 = vrot.slane %v288_v37, %v296_v38 }
  0x13   :  { %239 = vmatpush1.bf16.msra.mxu0 %v374_v9 }
  0x14   :  { %240 = vmatprep.subr.bf16.mxu0 %v375_v10 }
  0x17   :  { %241 = vmatpush1.bf16.msra.mxu0 %v377_v11 }
  0x18   :  { %242 = vmatprep.subr.bf16.mxu0 %v378_v12 }
  0x1b   :  { %243 = vmatpush1.bf16.msra.mxu0 %v380_v14 }
  0x1c   :  { %244 = vmatprep.subr.bf16.mxu0 %v381_v15 }
  0x1f   :  { %245 = vmatpush1.bf16.msra.mxu0 %v383_v16 }
  0x20   :  { %246 = vmatprep.subr.bf16.mxu0 %v384_v17 }
  0x23   :  { %247 = vmatpush1.bf16.msra.mxu0 %v386_v18 }
  0x24   :  { %248 = vmatprep.subr.bf16.mxu0 %v387_v19 }
  0x27   :  { %249 = vmatpush1.bf16.msra.mxu0 %v389_v20 }
  0x28   :  { %250 = vmatprep.subr.bf16.mxu0 %v390_v21 }
  0x2b   :  { %251 = vmatpush1.bf16.msra.mxu0 %v392_v22 }
  0x2c   :  { %252 = vmatprep.subr.bf16.mxu0 %v393_v23 }
  0x2f   :  { %253 = vmatpush1.bf16.msra.mxu0 %v395_v24 }
  0x30   :  { %254 = vmatprep.subr.bf16.mxu0 %v396_v25 }
  0x33   :  { %255 = vmatpush1.bf16.msra.mxu0 %v398_v26 }
  0x34   :  { %256 = vmatprep.subr.bf16.mxu0 %v399_v27 }
  0x37   :  { %257 = vmatpush1.bf16.msra.mxu0 %v401_v28 }
  0x38   :  { %258 = vmatprep.subr.bf16.mxu0 %v402_v29 }
  0x3b   :  { %259 = vmatpush1.bf16.msra.mxu0 %v404_v30 }
  0x3c   :  { %260 = vmatprep.subr.bf16.mxu0 %v405_v31 }
  0x3f   :  { %261 = vmatpush1.bf16.msra.mxu0 %v407_v32 }
  0x42   :  { %263 = vmatmul.mubr.bf16.vlgmr.msra.gmra.mrb[0].mxu0 %v408_v33 }
 0x115   :  { %v264_v41 = vpop.f32.mrb[0].mxu0 }
 0x116   :  { %v300_v42 = vadd.f32 %v293_v39, %v264_v41  ;;  %v266_v43 = vpop.f32.mrb[1].mxu0 }
 0x117   :  { %v301_v44 = vadd.f32 %v297_v40, %v266_v43  ;;  %v268_v45 = vpop.f32.mrb[2].mxu0 }
 0x118   :  { %v302_v46 = vadd.f32 %v293_v39, %v268_v45  ;;  %v270_v47 = vpop.f32.mrb[3].mxu0 }
 0x119   :  { %v358_v48 = vpack.c.bf16 %v301_v44, %v300_v42  ;;  %v303_v49 = vadd.f32 %v297_v40, %v270_v47 }
 0x11b   :  { %316 = vst [vmem:[%s545_s3] sm:$0xff] %v358_v48  ;;  %v359_v50 = vpack.c.bf16 %v303_v49, %v302_v46 }
 0x11d   :  { %317 = vst [vmem:[%s545_s3 + $0x8] sm:$0xff] %v359_v50 }

// kernel: text_decoder_forward.32
= control target key start
LH: loop header
LB: loop body
LE: loop exit
PB: predicated region body
PF: predicated region fallthrough
CT: control target
= control target key end

     0   :  { %s1150_s1 = inlined_call_operand.vmem [shape: bf16[256,512], index: 1, kind: input, shape index: {}]   ;;  %s1151_s0 = inlined_call_operand.vmem [shape: bf16[32,256], index: 0, kind: input, shape index: {}]   ;;  %s1152_s2 = inlined_call_operand.vmem [shape: f32[1,512], index: 2, kind: input, shape index: {}]   ;;  %s1153_s3 = inlined_call_operand.vmem [shape: bf16[32,512], index: 3, kind: output, shape index: {}]  }
   0x1   :  { %v797_v0 = vld [vmem:[%s1150_s1 + $0x4] ss:$16 sps:$4 sm:$0xff]   ;;  %v799_v1 = vld [vmem:[%s1150_s1 + $0xc] ss:$16 sps:$4 sm:$0xff]   ;;  %v801_v2 = vld [vmem:[%s1150_s1] ss:$16 sps:$4 sm:$0xff]  }
   0x2   :  { %458 = vmatprep.subr.bf16.mxu0 %v797_v0  ;;  %v802_v3 = vld [vmem:[%s1150_s1 + $0x8] ss:$16 sps:$4 sm:$0xff]   ;;  %511 = vmatprep.subr.bf16.mxu1 %v799_v1  ;;  %v803_v4 = vld [vmem:[%s1150_s1 + $0x24] ss:$16 sps:$4 sm:$0xff]   ;;  %v805_v5 = vld [vmem:[%s1150_s1 + $0x2c] ss:$16 sps:$4 sm:$0xff]  }
   0x3   :  { %459 = vmatpush1.bf16.msra.mxu0 %v801_v2  ;;  %512 = vmatpush1.bf16.msra.mxu1 %v802_v3  ;;  %v807_v6 = vld [vmem:[%s1150_s1 + $0x20] ss:$16 sps:$4 sm:$0xff]   ;;  %v808_v7 = vld [vmem:[%s1150_s1 + $0x28] ss:$16 sps:$4 sm:$0xff]   ;;  %v809_v8 = vld [vmem:[%s1150_s1 + $0x44] ss:$16 sps:$4 sm:$0xff]  }
   0x4   :  { %460 = vmatprep.subr.bf16.mxu0 %v803_v4  ;;  %513 = vmatprep.subr.bf16.mxu1 %v805_v5  ;;  %v811_v9 = vld [vmem:[%s1150_s1 + $0x4c] ss:$16 sps:$4 sm:$0xff]   ;;  %v813_v10 = vld [vmem:[%s1150_s1 + $0x40] ss:$16 sps:$4 sm:$0xff]   ;;  %v814_v11 = vld [vmem:[%s1150_s1 + $0x48] ss:$16 sps:$4 sm:$0xff]   ;;  %v617_v4 = vlaneseq }
   0x5   :  { %v815_v12 = vld [vmem:[%s1150_s1 + $0x64] ss:$16 sps:$4 sm:$0xff]   ;;  %v817_v13 = vld [vmem:[%s1150_s1 + $0x6c] ss:$16 sps:$4 sm:$0xff]   ;;  %v819_v14 = vld [vmem:[%s1150_s1 + $0x60] ss:$16 sps:$4 sm:$0xff]  }
   0x6   :  { %v820_v15 = vld [vmem:[%s1150_s1 + $0x68] ss:$16 sps:$4 sm:$0xff]   ;;  %v821_v16 = vld [vmem:[%s1150_s1 + $0x84] ss:$16 sps:$4 sm:$0xff]   ;;  %v823_v17 = vld [vmem:[%s1150_s1 + $0x8c] ss:$16 sps:$4 sm:$0xff]  }
   0x7   :  { %461 = vmatpush1.bf16.msra.mxu0 %v807_v6  ;;  %514 = vmatpush1.bf16.msra.mxu1 %v808_v7  ;;  %v825_v18 = vld [vmem:[%s1150_s1 + $0x80] ss:$16 sps:$4 sm:$0xff]   ;;  %v826_v19 = vld [vmem:[%s1150_s1 + $0x88] ss:$16 sps:$4 sm:$0xff]   ;;  %v827_v20 = vld [vmem:[%s1150_s1 + $0xa4] ss:$16 sps:$4 sm:$0xff]  }
   0x8   :  { %462 = vmatprep.subr.bf16.mxu0 %v809_v8  ;;  %515 = vmatprep.subr.bf16.mxu1 %v811_v9  ;;  %v829_v21 = vld [vmem:[%s1150_s1 + $0xac] ss:$16 sps:$4 sm:$0xff]   ;;  %v831_v22 = vld [vmem:[%s1150_s1 + $0xa0] ss:$16 sps:$4 sm:$0xff]   ;;  %v832_v23 = vld [vmem:[%s1150_s1 + $0xa8] ss:$16 sps:$4 sm:$0xff]  }
   0x9   :  { %v833_v24 = vld [vmem:[%s1150_s1 + $0xc4] ss:$16 sps:$4 sm:$0xff]   ;;  %v835_v25 = vld [vmem:[%s1150_s1 + $0xcc] ss:$16 sps:$4 sm:$0xff]   ;;  %v837_v26 = vld [vmem:[%s1150_s1 + $0xc0] ss:$16 sps:$4 sm:$0xff]  }
   0xa   :  { %v838_v27 = vld [vmem:[%s1150_s1 + $0xc8] ss:$16 sps:$4 sm:$0xff]   ;;  %v839_v28 = vld [vmem:[%s1150_s1 + $0xe4] ss:$16 sps:$4 sm:$0xff]   ;;  %v841_v29 = vld [vmem:[%s1150_s1 + $0xec] ss:$16 sps:$4 sm:$0xff]  }
   0xb   :  { %463 = vmatpush1.bf16.msra.mxu0 %v813_v10  ;;  %516 = vmatpush1.bf16.msra.mxu1 %v814_v11  ;;  %v843_v30 = vld [vmem:[%s1150_s1 + $0xe0] ss:$16 sps:$4 sm:$0xff]   ;;  %v844_v31 = vld [vmem:[%s1150_s1 + $0xe8] ss:$16 sps:$4 sm:$0xff]   ;;  %v845_v32 = vld [vmem:[%s1150_s1 + $0x104] ss:$16 sps:$4 sm:$0xff]  }
   0xc   :  { %464 = vmatprep.subr.bf16.mxu0 %v815_v12  ;;  %517 = vmatprep.subr.bf16.mxu1 %v817_v13  ;;  %v847_v33 = vld [vmem:[%s1150_s1 + $0x10c] ss:$16 sps:$4 sm:$0xff]   ;;  %v849_v34 = vld [vmem:[%s1150_s1 + $0x100] ss:$16 sps:$4 sm:$0xff]   ;;  %v850_v35 = vld [vmem:[%s1150_s1 + $0x108] ss:$16 sps:$4 sm:$0xff]  }
   0xd   :  { %v851_v36 = vld [vmem:[%s1150_s1 + $0x124] ss:$16 sps:$4 sm:$0xff]   ;;  %v853_v37 = vld [vmem:[%s1150_s1 + $0x12c] ss:$16 sps:$4 sm:$0xff]   ;;  %v855_v38 = vld [vmem:[%s1150_s1 + $0x120] ss:$16 sps:$4 sm:$0xff]  }
   0xe   :  { %v856_v39 = vld [vmem:[%s1150_s1 + $0x128] ss:$16 sps:$4 sm:$0xff]   ;;  %v857_v40 = vld [vmem:[%s1150_s1 + $0x144] ss:$16 sps:$4 sm:$0xff]   ;;  %v859_v41 = vld [vmem:[%s1150_s1 + $0x14c] ss:$16 sps:$4 sm:$0xff]  }
   0xf   :  { %465 = vmatpush1.bf16.msra.mxu0 %v819_v14  ;;  %518 = vmatpush1.bf16.msra.mxu1 %v820_v15  ;;  %v861_v42 = vld [vmem:[%s1150_s1 + $0x140] ss:$16 sps:$4 sm:$0xff]   ;;  %v862_v43 = vld [vmem:[%s1150_s1 + $0x148] ss:$16 sps:$4 sm:$0xff]   ;;  %v863_v44 = vld [vmem:[%s1150_s1 + $0x164] ss:$16 sps:$4 sm:$0xff]  }
  0x10   :  { %466 = vmatprep.subr.bf16.mxu0 %v821_v16  ;;  %519 = vmatprep.subr.bf16.mxu1 %v823_v17  ;;  %v865_v45 = vld [vmem:[%s1150_s1 + $0x16c] ss:$16 sps:$4 sm:$0xff]   ;;  %v867_v46 = vld [vmem:[%s1150_s1 + $0x160] ss:$16 sps:$4 sm:$0xff]   ;;  %v868_v48 = vld [vmem:[%s1150_s1 + $0x168] ss:$16 sps:$4 sm:$0xff]  }
  0x11   :  { %v895_v47 = vld [vmem:[%s1151_s0 + $0x4] ss:$8 sps:$4 sm:$0xff]   ;;  %v873_v51 = vld [vmem:[%s1150_s1 + $0x180] ss:$16 sps:$4 sm:$0xff]   ;;  %v874_v52 = vld [vmem:[%s1150_s1 + $0x188] ss:$16 sps:$4 sm:$0xff]  }
  0x12   :  { %v869_v49 = vld [vmem:[%s1150_s1 + $0x184] ss:$16 sps:$4 sm:$0xff]   ;;  %v871_v50 = vld [vmem:[%s1150_s1 + $0x18c] ss:$16 sps:$4 sm:$0xff]   ;;  %490 = vmatprep.mubr.bf16.mxu0 %v895_v47  ;;  %543 = vmatprep.mubr.bf16.mxu1 %v895_v47  ;;  %v879_v55 = vld [vmem:[%s1150_s1 + $0x1a0] ss:$16 sps:$4 sm:$0xff]  }
  0x13   :  { %467 = vmatpush1.bf16.msra.mxu0 %v825_v18  ;;  %520 = vmatpush1.bf16.msra.mxu1 %v826_v19  ;;  %v875_v53 = vld [vmem:[%s1150_s1 + $0x1a4] ss:$16 sps:$4 sm:$0xff]   ;;  %v877_v54 = vld [vmem:[%s1150_s1 + $0x1ac] ss:$16 sps:$4 sm:$0xff]   ;;  %v880_v56 = vld [vmem:[%s1150_s1 + $0x1a8] ss:$16 sps:$4 sm:$0xff]  }
  0x14   :  { %468 = vmatprep.subr.bf16.mxu0 %v827_v20  ;;  %521 = vmatprep.subr.bf16.mxu1 %v829_v21  ;;  %v881_v57 = vld [vmem:[%s1150_s1 + $0x1c4] ss:$16 sps:$4 sm:$0xff]   ;;  %v883_v58 = vld [vmem:[%s1150_s1 + $0x1cc] ss:$16 sps:$4 sm:$0xff]   ;;  %v885_v59 = vld [vmem:[%s1150_s1 + $0x1c0] ss:$16 sps:$4 sm:$0xff]  }
  0x15   :  { %v886_v60 = vld [vmem:[%s1150_s1 + $0x1c8] ss:$16 sps:$4 sm:$0xff]   ;;  %v887_v61 = vld [vmem:[%s1150_s1 + $0x1e4] ss:$16 sps:$4 sm:$0xff]   ;;  %v889_v62 = vld [vmem:[%s1150_s1 + $0x1ec] ss:$16 sps:$4 sm:$0xff]  }
  0x16   :  { %v891_v63 = vld [vmem:[%s1150_s1 + $0x1e0] ss:$16 sps:$4 sm:$0xff]   ;;  %v892_v0 = vld [vmem:[%s1150_s1 + $0x1e8] ss:$16 sps:$4 sm:$0xff]   ;;  %v896_v2 = vld [vmem:[%s1151_s0 + $0x14] ss:$8 sps:$4 sm:$0xff]  }
  0x17   :  { %469 = vmatpush1.bf16.msra.mxu0 %v831_v22  ;;  %522 = vmatpush1.bf16.msra.mxu1 %v832_v23  ;;  %v893_v1 = vld [vmem:[%s1151_s0] ss:$8 sps:$4 sm:$0xff]   ;;  %v898_v3 = vld [vmem:[%s1151_s0 + $0x10] ss:$8 sps:$4 sm:$0xff]   ;;  %v618_v5 = vshrl.u32 %v617_v4, 7 }
  0x18   :  { %470 = vmatprep.subr.bf16.mxu0 %v833_v24  ;;  %523 = vmatprep.subr.bf16.mxu1 %v835_v25  ;;  %v615_v8 = vld [vmem:[%s1152_s2] sm:$0xf] }
  0x19   :  { %v619_v6 = vsub.s32 0, %v618_v5  ;;  %v627_v7 = vsub.s32 2, %v618_v5  ;;  %v623_v9 = vsub.s32 1, %v618_v5  ;;  %v631_v10 = vsub.s32 3, %v618_v5 }
  0x1b   :  { %471 = vmatpush1.bf16.msra.mxu0 %v837_v26  ;;  %524 = vmatpush1.bf16.msra.mxu1 %v838_v27  ;;  %v620_v11 = vrot.slane %v615_v8, %v619_v6  ;;  %v628_v12 = vrot.slane %v615_v8, %v627_v7  ;;  %v624_v13 = vrot.slane %v615_v8, %v623_v9 }
  0x1c   :  { %472 = vmatprep.subr.bf16.mxu0 %v839_v28  ;;  %525 = vmatprep.subr.bf16.mxu1 %v841_v29  ;;  %v632_v14 = vrot.slane %v615_v8, %v631_v10 }
  0x1f   :  { %473 = vmatpush1.bf16.msra.mxu0 %v843_v30  ;;  %526 = vmatpush1.bf16.msra.mxu1 %v844_v31 }
  0x20   :  { %474 = vmatprep.subr.bf16.mxu0 %v845_v32  ;;  %527 = vmatprep.subr.bf16.mxu1 %v847_v33 }
  0x23   :  { %475 = vmatpush1.bf16.msra.mxu0 %v849_v34  ;;  %528 = vmatpush1.bf16.msra.mxu1 %v850_v35 }
  0x24   :  { %476 = vmatprep.subr.bf16.mxu0 %v851_v36  ;;  %529 = vmatprep.subr.bf16.mxu1 %v853_v37 }
  0x27   :  { %477 = vmatpush1.bf16.msra.mxu0 %v855_v38  ;;  %530 = vmatpush1.bf16.msra.mxu1 %v856_v39 }
  0x28   :  { %478 = vmatprep.subr.bf16.mxu0 %v857_v40  ;;  %531 = vmatprep.subr.bf16.mxu1 %v859_v41 }
  0x2b   :  { %479 = vmatpush1.bf16.msra.mxu0 %v861_v42  ;;  %532 = vmatpush1.bf16.msra.mxu1 %v862_v43 }
  0x2c   :  { %480 = vmatprep.subr.bf16.mxu0 %v863_v44  ;;  %533 = vmatprep.subr.bf16.mxu1 %v865_v45 }
  0x2f   :  { %481 = vmatpush1.bf16.msra.mxu0 %v867_v46  ;;  %534 = vmatpush1.bf16.msra.mxu1 %v868_v48 }
  0x30   :  { %482 = vmatprep.subr.bf16.mxu0 %v869_v49  ;;  %535 = vmatprep.subr.bf16.mxu1 %v871_v50 }
  0x33   :  { %483 = vmatpush1.bf16.msra.mxu0 %v873_v51  ;;  %536 = vmatpush1.bf16.msra.mxu1 %v874_v52 }
  0x34   :  { %484 = vmatprep.subr.bf16.mxu0 %v875_v53  ;;  %537 = vmatprep.subr.bf16.mxu1 %v877_v54 }
  0x37   :  { %485 = vmatpush1.bf16.msra.mxu0 %v879_v55  ;;  %538 = vmatpush1.bf16.msra.mxu1 %v880_v56 }
  0x38   :  { %486 = vmatprep.subr.bf16.mxu0 %v881_v57  ;;  %539 = vmatprep.subr.bf16.mxu1 %v883_v58 }
  0x3b   :  { %487 = vmatpush1.bf16.msra.mxu0 %v885_v59  ;;  %540 = vmatpush1.bf16.msra.mxu1 %v886_v60 }
  0x3c   :  { %488 = vmatprep.subr.bf16.mxu0 %v887_v61  ;;  %541 = vmatprep.subr.bf16.mxu1 %v889_v62 }
  0x3f   :  { %489 = vmatpush1.bf16.msra.mxu0 %v891_v63  ;;  %542 = vmatpush1.bf16.msra.mxu1 %v892_v0 }
  0x42   :  { %491 = vmatmul.mubr.bf16.vlgmr.msra.gmra.mrb[0].mxu0 %v893_v1  ;;  %544 = vmatmul.mubr.bf16.vlgmr.msra.gmra.mrb[0].mxu1 %v893_v1 }
  0x43   :  { %500 = vmatprep.mubr.bf16.mxu0 %v896_v2  ;;  %553 = vmatprep.mubr.bf16.mxu1 %v896_v2 }
  0x4a   :  { %501 = vmatmul.mubr.bf16.gmra.mrb[4].mxu0 %v898_v3  ;;  %554 = vmatmul.mubr.bf16.gmra.mrb[4].mxu1 %v898_v3 }
 0x115   :  { %v492_v15 = vpop.f32.mrb[0].mxu0  ;;  %v545_v16 = vpop.f32.mrb[0].mxu1 }
 0x116   :  { %v637_v17 = vadd.f32 %v620_v11, %v492_v15  ;;  %v639_v18 = vadd.f32 %v628_v12, %v545_v16  ;;  %v494_v19 = vpop.f32.mrb[1].mxu0  ;;  %v547_v20 = vpop.f32.mrb[1].mxu1 }
 0x117   :  { %v638_v21 = vadd.f32 %v624_v13, %v494_v19  ;;  %v640_v22 = vadd.f32 %v632_v14, %v547_v20  ;;  %v496_v23 = vpop.f32.mrb[2].mxu0  ;;  %v549_v24 = vpop.f32.mrb[2].mxu1 }
 0x118   :  { %v641_v25 = vadd.f32 %v620_v11, %v496_v23  ;;  %v643_v26 = vadd.f32 %v628_v12, %v549_v24  ;;  %v498_v27 = vpop.f32.mrb[3].mxu0  ;;  %v551_v28 = vpop.f32.mrb[3].mxu1 }
 0x119   :  { %v789_v29 = vpack.c.bf16 %v638_v21, %v637_v17  ;;  %v790_v30 = vpack.c.bf16 %v640_v22, %v639_v18  ;;  %v642_v31 = vadd.f32 %v624_v13, %v498_v27  ;;  %v644_v32 = vadd.f32 %v632_v14, %v551_v28 }
 0x11b   :  { %701 = vst [vmem:[%s1153_s3] sm:$0xff] %v789_v29  ;;  %702 = vst [vmem:[%s1153_s3 + $0x8] sm:$0xff] %v790_v30  ;;  %v791_v33 = vpack.c.bf16 %v642_v31, %v641_v25  ;;  %v792_v34 = vpack.c.bf16 %v644_v32, %v643_v26 }
 0x11d   :  { %703 = vst [vmem:[%s1153_s3 + $0x10] sm:$0xff] %v791_v33  ;;  %704 = vst [vmem:[%s1153_s3 + $0x18] sm:$0xff] %v792_v34  ;;  %v502_v35 = vpop.f32.mrb[4].mxu0  ;;  %v555_v36 = vpop.f32.mrb[4].mxu1 }
 0x11e   :  { %v645_v37 = vadd.f32 %v620_v11, %v502_v35  ;;  %v647_v38 = vadd.f32 %v628_v12, %v555_v36  ;;  %v504_v39 = vpop.f32.mrb[5].mxu0  ;;  %v557_v40 = vpop.f32.mrb[5].mxu1 }
 0x11f   :  { %v646_v41 = vadd.f32 %v624_v13, %v504_v39  ;;  %v648_v42 = vadd.f32 %v632_v14, %v557_v40  ;;  %v506_v43 = vpop.f32.mrb[6].mxu0  ;;  %v559_v44 = vpop.f32.mrb[6].mxu1 }
 0x120   :  { %v649_v45 = vadd.f32 %v620_v11, %v506_v43  ;;  %v651_v46 = vadd.f32 %v628_v12, %v559_v44  ;;  %v508_v47 = vpop.f32.mrb[7].mxu0  ;;  %v561_v48 = vpop.f32.mrb[7].mxu1 }
 0x121   :  { %v793_v49 = vpack.c.bf16 %v646_v41, %v645_v37  ;;  %v794_v50 = vpack.c.bf16 %v648_v42, %v647_v38  ;;  %v650_v51 = vadd.f32 %v624_v13, %v508_v47  ;;  %v652_v52 = vadd.f32 %v632_v14, %v561_v48 }
 0x123   :  { %705 = vst [vmem:[%s1153_s3 + $0x20] sm:$0xff] %v793_v49  ;;  %706 = vst [vmem:[%s1153_s3 + $0x28] sm:$0xff] %v794_v50  ;;  %v795_v53 = vpack.c.bf16 %v650_v51, %v649_v45  ;;  %v796_v54 = vpack.c.bf16 %v652_v52, %v651_v46 }
 0x125   :  { %707 = vst [vmem:[%s1153_s3 + $0x30] sm:$0xff] %v795_v53  ;;  %708 = vst [vmem:[%s1153_s3 + $0x38] sm:$0xff] %v796_v54 }

// kernel: text_decoder_forward.33
= control target key start
LH: loop header
LB: loop body
LE: loop exit
PB: predicated region body
PF: predicated region fallthrough
CT: control target
= control target key end

     0   :  { %s1083_s12 = smov 0   ;;  %s1085_s13 = smov 0   ;;  %s1275_s0 = inlined_call_operand.vmem [shape: bf16[2,8,256], index: 0, kind: input, shape index: {}]   ;;  %s1276_s1 = inlined_call_operand.vmem [shape: bf16[2,16,512], index: 1, kind: input, shape index: {}, may-alias: {1,2}]   ;;  %s1277_s2 = inlined_call_operand.vmem [shape: bf16[2,16,512], index: 2, kind: input, shape index: {}, may-alias: {1,2}]   ;;  %s1278_s3 = inlined_call_operand.vmem [shape: bf16[2,8,256], index: 3, kind: output, shape index: {}]  }
   0x1   :  { %s1087_s14 = smov 0   ;;  %s1089_s15 = smov 0  }
   0x2   :  { %s1091_s16 = smov 0   ;;  %s1093_s17 = smov 0  }
   0x3   :  { %s1095_s18 = smov 0   ;;  %s1097_s19 = smov 0  }
   0x4   :  { %s1099_s20 = smov 0  }
   0x5 LB: > { %s28_s21 = sadd.s32 1, %s1048_s18  ;;  %s32_s22 = sadd.s32 1, %s1052_s19  ;;  %s1056_s20 = sphi %s1099_s20, %s13_s20   ;;  %s1052_s19 = sphi %s1097_s19, %s1288_s19   ;;  %s1048_s18 = sphi %s1095_s18, %s1287_s18   ;;  %s1044_s17 = sphi %s1093_s17, %s1286_s17   ;;  %s1040_s16 = sphi %s1091_s16, %s1285_s16   ;;  %s1036_s15 = sphi %s1089_s15, %s1284_s15   ;;  %s1032_s14 = sphi %s1087_s14, %s1283_s14   ;;  %s1028_s13 = sphi %s1085_s13, %s1282_s13   ;;  %s1024_s12 = sphi %s1083_s12, %s1281_s12  }
   0x6   : > { %p30_p0 = scmp.ge.s32.totalorder %s28_s21, 2  ;;  %p78_p1 = scmp.ne.s32.totalorder %s1036_s15, %s1032_s14 }
   0x7   : > { %p79_p2 = scmp.eq.s32.totalorder %s1056_s20, 0  ;;  %s71_s23 = sadd.s32 1, %s1036_s15 }
   0x8   : > { %s1290_s21 = smov (%p30_p0, %s28_s21), 0  ;;  %s1292_s22 = smov (!%p30_p0, %s32_s22), %s1052_s19 }
   0x9   : > { %p1139_p3 = por %p79_p2, %p78_p1  ;;  %p34_p4 = scmp.ge.s32.totalorder %s1292_s22, 2 }
   0xa   : > { %s94_s25 = sadd.s32 2, %s1048_s18  ;;  %s67_s26 = ssub.s32 %s1048_s18, %s1290_s21 }
   0xb   : > { %s95_s27 = sadd.s32 2, %s1290_s21  ;;  %s1294_s22 = smov (%p34_p4, %s1292_s22), 0 }
   0xc   : > { %s99_s28 = ssub.s32 %s94_s25, %s95_s27  ;;  %p110_p5 = scmp.ne.s32.totalorder %s1028_s13, %s1024_s12 }
   0xd   : > { %s64_s29 = ssub.s32 %s1052_s19, %s1294_s22  ;;  %s103_s30 = sadd.s32 1, %s1028_s13 }
   0xe   : > { %s68_s4 = sor.u32 %s67_s26, %s64_s29  ;;  %s100_s5 = sor.u32 %s99_s28, %s64_s29 }
   0xf   : > { %p69_p6 = scmp.eq.s32.totalorder %s68_s4, 0  ;;  %p101_p7 = scmp.eq.s32.totalorder %s100_s5, 0 }
  0x10   : > { %p1156_p8 = por %p110_p5, %p79_p2  ;;  %p834_p9 = scmp.ge.s32.totalorder %s1056_s20, 4 }
  0x11   : > { %s1161_s7 = scalar_select %p69_p6, %s1036_s15, %s71_s23  }
  0x12   : > { %s1164_s8 = scalar_select %p101_p7, %s1028_s13, %s103_s30  }
  0x13   : > { %164 = sbr.rel (%p834_p9) target bundleno = 40 (0x28), region = 16 }
  0x1a   : > { %178 = sbr.rel (!%p1139_p3) target bundleno = 33 (0x21), region = 24  ;;  %s180_s9 = sand.u32 (%p1139_p3), 1, %s1036_s15  }
  0x1b   : > { %s836_s10 = sshll.u32 (%p1139_p3), %s1052_s19, 3  ;;  %s835_s11 = sshll.u32 (%p1139_p3), %s180_s9, 3 }
  0x1c   : > { %s187_s25 = sadd.s32 (%p1139_p3), %s1048_s18, %s836_s10  ;;  %s182_s29 = scalar_lea.vmem (%p1139_p3), [#allocation5], %s835_s11 }
  0x1d   : > { %s837_s26 = sshll.u32 (%p1139_p3), %s187_s25, 2 }
  0x1e   : > { %s189_s23 = scalar_lea.vmem (%p1139_p3), %s1276_s1, %s837_s26 }
  0x1f   : > { %v205_v0 = vld [vmem:[%s189_s23] sm:$0xf] (%p1139_p3)  ;;  %v207_v1 = vld [vmem:[%s189_s23 + $0x10] sm:$0xf] (%p1139_p3) }
  0x20   : > { %206 = vst [vmem:[%s182_s29] sm:$0xf] (%p1139_p3), %v205_v0  ;;  %208 = vst [vmem:[%s182_s29 + $0x4] sm:$0xf] (%p1139_p3), %v207_v1 }
  0x21 PF: > { %235 = sbr.rel (!%p1156_p8) target bundleno = 40 (0x28), region = 65  ;;  %s237_s24 = sand.u32 (%p1156_p8), 1, %s1028_s13  }
  0x22   : > { %s839_s30 = sshll.u32 (%p1156_p8), %s1052_s19, 3  ;;  %s838_s4 = sshll.u32 (%p1156_p8), %s237_s24, 3 }
  0x23   : > { %s741_s5 = sadd.s32 (%p1156_p8), %s1048_s18, %s839_s30  ;;  %s239_s11 = scalar_lea.vmem (%p1156_p8), [#allocation6], %s838_s4 }
  0x24   : > { %s840_s9 = sshll.u32 (%p1156_p8), %s741_s5, 2 }
  0x25   : > { %s743_s26 = scalar_lea.vmem (%p1156_p8), %s1277_s2, %s840_s9 }
  0x26   : > { %v841_v2 = vld [vmem:[%s743_s26 + $0x8] sm:$0xf] (%p1156_p8)  ;;  %v842_v3 = vld [vmem:[%s743_s26 + $0x18] sm:$0xf] (%p1156_p8) }
  0x27   : > { %264 = vst [vmem:[%s239_s11] sm:$0xf] (%p1156_p8), %v841_v2  ;;  %266 = vst [vmem:[%s239_s11 + $0x4] sm:$0xf] (%p1156_p8), %v842_v3 }
  0x28 PF: > { %p843_p10 = scmp.ge.s32.totalorder %s1056_s20, 1  ;;  %p292_p11 = scmp.lt.s32.totalorder %s1056_s20, 5 }
  0x2a   : > { %p293_p12 = pnand %p843_p10, %p292_p11 }
  0x2b   : > { %s299_s6 = sand.u32 (!%p293_p12), 1, %s1032_s14   ;;  %vm374_vm0 = vcmask (!%p293_p12), 523264   ;;  %p344_p13 = scmp.lt.s32.totalorder (!%p293_p12), %s1044_s17, 1  ;;  %v1058_v4 = vmov (!%p293_p12), 0.0   ;;  %vm1059_vm1 = vmmov (!%p293_p12), 0   ;;  %vm369_vm2 = vcmask (!%p293_p12), 7168  }
  0x2c   : > { %296 = sbr.rel (%p293_p12) target bundleno = 1483 (0x5cb), region = 106  ;;  %869 = vmatprep.subr.bf16.mxu0 (!%p293_p12), %v1058_v4  ;;  %s844_s27 = sshll.u32 (!%p293_p12), %s299_s6, 3  ;;  %376 = vst.msk [vmem:[#allocation4 + $0x8] sm:$0xff] (!%p293_p12), %vm374_vm0, %v1058_v4  ;;  %375 = vst.msk [vmem:[#allocation4] sm:$0xff] (!%p293_p12), %vm374_vm0, %v1058_v4  ;;  %871 = vmatprep.mubr.msk.bf16.mxu0 (!%p293_p12), %vm1059_vm1, %v1058_v4  ;;  %v1060_v9 = vmov (!%p293_p12), -1e+30   ;;  %v384_v10 = vlaneseq (!%p293_p12) }
  0x2d   : > { %p346_p0 = scmp.lt.s32.totalorder (!%p293_p12), %s1040_s16, 1  ;;  %875 = vmatprep.subr.bf16.mxu1 (!%p293_p12), %v1058_v4  ;;  %877 = vmatprep.mubr.msk.bf16.mxu1 (!%p293_p12), %vm1059_vm1, %v1058_v4  ;;  %s301_s14 = scalar_lea.vmem (!%p293_p12), [#allocation5], %s844_s27  ;;  %370 = vst.msk [vmem:[#allocation2] sm:$0xff] (!%p293_p12), %vm369_vm2, %v1060_v9  ;;  %371 = vst.msk [vmem:[#allocation2 + $0x8] sm:$0xff] (!%p293_p12), %vm369_vm2, %v1060_v9  ;;  %vm443_vm4 = vcmask (!%p293_p12), 130048   ;;  %v1061_v18 = vmov (!%p293_p12), 0  }
  0x2e   : > { %v972_v5 = vld [vmem:[%s301_s14] sm:$0xff] (!%p293_p12)   ;;  %372 = vst.msk [vmem:[#allocation3] sm:$0xff] (!%p293_p12), %vm369_vm2, %v1058_v4  ;;  %373 = vst.msk [vmem:[#allocation3 + $0x8] sm:$0xff] (!%p293_p12), %vm369_vm2, %v1058_v4  ;;  %v385_v11 = vand.u32 (!%p293_p12), 127, %v384_v10  ;;  %970 = vset.pattern.permute.xlu0 (!%p293_p12), %v1061_v18  ;;  %971 = vset.pattern.permute.xlu1 (!%p293_p12), %v1061_v18  ;;  %vm677_vm5 = vcmask (!%p293_p12), 519168   ;;  %vm695_vm6 = vcmask (!%p293_p12), 1043968  }
  0x2f   : > { %v399_v6 = vsel (!%p293_p12), %vm374_vm0, %v972_v5, 0 }
  0x30   : > { %870 = vmatpush3.bf16.xpose.msra.mxu0 (!%p293_p12), %v399_v6  ;;  %vm388_vm3 = vcmp.lt.s32.totalorder (!%p293_p12), %v385_v11, 16 }
  0x31   : > { %887 = vmatprep.subr.bf16.mxu0 (!%p293_p12), %v1058_v4 }
  0x33   : > { %s1296_s17 = smov (!%p344_p13, %s1044_s17), 1  ;;  %s1298_s16 = smov (!%p346_p0, %s1040_s16), 1  ;;  %v467_v6 = vld [vmem:[#allocation4] sm:$0xff] }
  0x34   : > { %s846_s28 = sshll.u32 %s1296_s17, 1  ;;  %v442_v20 = vld [vmem:[#allocation2] sm:$0xff]  ;;  %s306_s17 = sand.u32 1, %s1024_s12   ;;  %v582_v43 = vld [vmem:[#allocation2 + $0x8] sm:$0xff] }
  0x35   : > { %s1201_s23 = sadd.s32 %s846_s28, %s1298_s16  ;;  %s1062_s16 = smov 64   ;;  %v459_v59 = vld [vmem:[#allocation3] sm:$0xff]  ;;  %v599_v1 = vld [vmem:[#allocation3 + $0x8] sm:$0xff] }
  0x36   : > { %s847_s29 = sshll.u32 %s1201_s23, 2  ;;  %532 = vrot.lane.b32.xlu1 %v972_v5, %s1062_s16  ;;  %s845_s5 = sshll.u32 %s306_s17, 3 }
  0x37   : > { %s351_s4 = scalar_lea.vmem %s1275_s0, %s847_s29  ;;  %s308_s9 = scalar_lea.vmem [#allocation6], %s845_s5 }
  0x38   : > { %v377_v7 = vld [vmem:[%s351_s4] sm:$0xf]  ;;  %s362_s25 = scalar_lea.vmem %s1278_s3, %s847_s29 }
  0x39   : > { %v378_v8 = vmul.bf16 1040203264, %v377_v7  ;;  %v973_v24 = vld [vmem:[%s308_s9] sm:$0xff]  }
  0x3a   : > { %876 = vmatpush3.bf16.msra.mxu1 %v973_v24 }
  0x3b   : > { %872 = vmatmul.mubr.msk.bf16.vlgmr.msra.gmra.mrb[0].mxu0 %vm374_vm0, %v378_v8  ;;  %v854_v19 = vcombine.low %v378_v8, %v378_v8  ;;  %881 = vmatprep.subr.bf16.mxu1 %v1058_v4 }
  0x3c   : > { %889 = vmatprep.mubr.msk.bf16.mxu0 %vm1059_vm1, %v1058_v4 }
  0x3d   : > { %530 = vrot.lane.b32.xlu1 %v854_v19, %s1062_s16 }
  0xa8   : > { %v533_v28 = vpop.permute.xlu1 %532 }
  0xa9   : > { %v538_v30 = vsel %vm374_vm0, %v533_v28, 0 }
  0xaf   : > { %v531_v32 = vpop.permute.xlu1 %530 }
 0x10e   : > { %v435_v12 = vpop.f32.mrb[0].mxu0 }
 0x10f   : > { %v441_v13 = vsel %vm388_vm3, %v435_v12, -1e+30  ;;  %v873_v14 = vpop.f32.mrb[1].mxu0 }
 0x110   : > { %v438_v15 = vpop.f32.mrb[2].mxu0  ;;  %v444_v16 = vsel %vm443_vm4, %v441_v13, -inf }
 0x111   : > { %445 = vmax.xlane.f32.xlu0 %v444_v16  ;;  %v874_v17 = vpop.f32.mrb[3].mxu0  ;;  %v607_v16 = vld [vmem:[#allocation4 + $0x8] sm:$0xff] }
 0x19e   : > { %v446_v21 = vpop.xlane.xlu0 %445 }
 0x19f   : > { %v447_v22 = vmax.f32 %v442_v20, %v446_v21 }
 0x1a1   : > { %v448_v23 = vsub.f32 %v442_v20, %v447_v22  ;;  %526 = vst.msk [vmem:[#allocation2] sm:$0xff] %vm369_vm2, %v447_v22  ;;  %453 = vperm.xlu0 %970, %v447_v22  }
 0x1a3   : > { %v449_v56 = vmul.f32 1.442695, %v448_v23 }
 0x1a5   : > { %615 = vrot.lane.b32.xlu0 %v973_v24, %s1062_s16 }
 0x220   : > { %v454_v25 = vpop.permute.xlu0 %453 }
 0x221   : > { %v456_v26 = vsub.f32 %v441_v13, %v454_v25 }
 0x223   : > { %v457_v27 = vmul.f32 1.442695, %v456_v26 }
 0x224   : > { %v616_v47 = vpop.permute.xlu0 %615 }
 0x225   : > { %974 = vpow2.f32 %v457_v27  ;;  %888 = vmatpush3.bf16.msra.mxu0 %v616_v47 }
 0x22f   : > { %v975_v29 = vpop.eup %974 }
 0x230   : > { %v474_v31 = vpack.c.bf16 %v975_v29, %v975_v29  ;;  %v461_v48 = vsel %vm443_vm4, %v975_v29, 0.0 }
 0x232   : > { %878 = vmatmul.mubr.msk.bf16.vlgmr.msra.gmra.mrb[0].mxu1 %vm443_vm4, %v474_v31 }
 0x233   : > { %882 = vmatpush3.bf16.xpose.msra.mxu1 %v538_v30  ;;  %883 = vmatprep.mubr.msk.bf16.mxu1 %vm1059_vm1, %v1058_v4 }
 0x23a   : > { %884 = vmatmul.mubr.msk.bf16.vlgmr.msra.gmra.mrb[4].mxu1 %vm374_vm0, %v531_v32 }
 0x305   : > { %v518_v33 = vpop.f32.mrb[0].mxu1 }
 0x306   : > { %v879_v34 = vpop.f32.mrb[1].mxu1 }
 0x307   : > { %v521_v35 = vpop.f32.mrb[2].mxu1 }
 0x308   : > { %v880_v36 = vpop.f32.mrb[3].mxu1 }
 0x30d   : > { %v574_v37 = vpop.f32.mrb[4].mxu1 }
 0x30e   : > { %v580_v38 = vsel %vm388_vm3, %v574_v37, -1e+30  ;;  %v885_v39 = vpop.f32.mrb[5].mxu1 }
 0x30f   : > { %v577_v40 = vpop.f32.mrb[6].mxu1  ;;  %v583_v41 = vsel %vm443_vm4, %v580_v38, -inf }
 0x310   : > { %584 = vmax.xlane.f32.xlu1 %v583_v41  ;;  %v886_v42 = vpop.f32.mrb[7].mxu1 }
 0x39d   : > { %v585_v44 = vpop.xlane.xlu1 %584 }
 0x39e   : > { %v586_v45 = vmax.f32 %v582_v43, %v585_v44 }
 0x3a0   : > { %v587_v46 = vsub.f32 %v582_v43, %v586_v45  ;;  %663 = vst.msk [vmem:[#allocation2 + $0x8] sm:$0xff] %vm369_vm2, %v586_v45  ;;  %592 = vperm.xlu1 %971, %v586_v45  }
 0x3a2   : > { %v588_v55 = vmul.f32 1.442695, %v587_v46 }
 0x3c4   : > { %462 = vadd.xlane.f32.xlu1 %v461_v48 }
 0x41f   : > { %v593_v49 = vpop.permute.xlu1 %592 }
 0x420   : > { %v595_v50 = vsub.f32 %v580_v38, %v593_v49 }
 0x422   : > { %v596_v51 = vmul.f32 1.442695, %v595_v50 }
 0x424   : > { %976 = vpow2.f32 %v596_v51 }
 0x425   : > { %978 = vpow2.f32 %v588_v55 }
 0x426   : > { %980 = vpow2.f32 %v449_v56 }
 0x42e   : > { %v977_v52 = vpop.eup %976 }
 0x42f   : > { %v601_v53 = vsel %vm443_vm4, %v977_v52, 0.0  ;;  %v614_v54 = vpack.c.bf16 %v977_v52, %v977_v52  ;;  %v979_v57 = vpop.eup %978 }
 0x430   : > { %602 = vadd.xlane.f32.xlu0 %v601_v53  ;;  %v981_v58 = vpop.eup %980  ;;  %v600_v2 = vmul.f32 %v979_v57, %v599_v1 }
 0x431   : > { %890 = vmatmul.mubr.msk.bf16.vlgmr.msra.gmra.mrb[4].mxu0 %vm443_vm4, %v614_v54  ;;  %v460_v60 = vmul.f32 %v981_v58, %v459_v59 }
 0x446   : > { %610 = vperm.xlu0 %970, %v979_v57  }
 0x44a   : > { %470 = vperm.xlu0 %970, %v981_v58  }
 0x451   : > { %v463_v61 = vpop.xlane.xlu1 %462 }
 0x452   : > { %v464_v62 = vadd.f32 %v463_v61, %v460_v60 }
 0x454   : > { %466 = vst.msk [vmem:[#allocation3] sm:$0xff] %vm369_vm2, %v464_v62 }
 0x45b   : > { %v667_v63 = vld [vmem:[#allocation3] sm:$0xff] }
 0x45c   : > { %982 = vrcp.f32 %v667_v63 }
 0x466   : > { %v983_v0 = vpop.eup %982 }
 0x467   : > { %672 = vperm.xlu0 %970, %v983_v0  }
 0x4bd   : > { %v603_v3 = vpop.xlane.xlu0 %602 }
 0x4be   : > { %v604_v4 = vadd.f32 %v603_v3, %v600_v2 }
 0x4c0   : > { %605 = vst.msk [vmem:[#allocation3 + $0x8] sm:$0xff] %vm369_vm2, %v604_v4 }
 0x4c5   : > { %v611_v5 = vpop.permute.xlu0 %610 }
 0x4c6   : > { %v613_v17 = vmul.f32 %v611_v5, %v607_v16 }
 0x4c7   : > { %v679_v7 = vld [vmem:[#allocation3 + $0x8] sm:$0xff] }
 0x4c8   : > { %984 = vrcp.f32 %v679_v7 }
 0x4c9   : > { %v471_v8 = vpop.permute.xlu0 %470 }
 0x4ca   : > { %v473_v9 = vmul.f32 %v471_v8, %v467_v6 }
 0x4cc   : > { %v524_v10 = vadd.f32 %v518_v33, %v473_v9 }
 0x4ce   : > { %525 = vst.msk [vmem:[#allocation4] sm:$0xff] %vm374_vm0, %v524_v10 }
 0x4d2   : > { %v985_v11 = vpop.eup %984 }
 0x4d3   : > { %684 = vperm.xlu1 %971, %v985_v11  }
 0x4d5   : > { %v669_v12 = vld [vmem:[#allocation4] sm:$0xff] }
 0x4e6   : > { %v673_v13 = vpop.permute.xlu0 %672 }
 0x4e7   : > { %v675_v14 = vmul.f32 %v673_v13, %v669_v12 }
 0x4e9   : > { %v676_v15 = vpack.c.bf16 %v675_v14, %v675_v14 }
 0x4eb   : > { %678 = vst.msk [vmem:[%s362_s25] sm:$0xf] %vm677_vm5, %v676_v15 }
 0x504   : > { %v655_v18 = vpop.f32.mrb[4].mxu0 }
 0x505   : > { %v661_v19 = vadd.f32 %v655_v18, %v613_v17  ;;  %v891_v20 = vpop.f32.mrb[5].mxu0 }
 0x506   : > { %v658_v21 = vpop.f32.mrb[6].mxu0 }
 0x507   : > { %662 = vst.msk [vmem:[#allocation4 + $0x8] sm:$0xff] %vm374_vm0, %v661_v19  ;;  %v892_v22 = vpop.f32.mrb[7].mxu0 }
 0x50e   : > { %v681_v24 = vld [vmem:[#allocation4 + $0x8] sm:$0xff] }
 0x552   : > { %v685_v23 = vpop.permute.xlu1 %684 }
 0x553   : > { %v687_v25 = vmul.f32 %v685_v23, %v681_v24 }
 0x555   : > { %v860_v26 = vpack.c.bf16 %v687_v25, %v687_v25 }
 0x557   : > { %692 = vrot.lane.b32.xlu0 %v860_v26, %s1062_s16 }
 0x5c9   : > { %v693_v27 = vpop.permute.xlu0 %692 }
 0x5ca   : > { %696 = vst.msk [vmem:[%s362_s25] sm:$0xf] %vm695_vm6, %v693_v27 }
 0x5cb PF: > { %s13_s20 = sadd.s32 1, %s1056_s20   ;;  %s1281_s12 = smov %s1028_s13 }
 0x5cc   : > { %p10_p1 = scmp.ge.s32.totalorder %s13_s20, 6   ;;  %s1282_s13 = smov %s1164_s8 }
 0x5cd   : > { %s1283_s14 = smov %s1036_s15  ;;  %s1284_s15 = smov %s1161_s7 }
 0x5ce   : > { %s1285_s16 = smov %s1048_s18  ;;  %s1286_s17 = smov %s1052_s19 }
 0x5cf   : > { %s1287_s18 = smov %s1290_s21  ;;  %s1288_s19 = smov %s1294_s22 }
 0x5d0   :  { %12 = sbr.rel (!%p10_p1) target bundleno = 5 (0x5), region = 171 }

// kernel: text_decoder_forward.36
= control target key start
LH: loop header
LB: loop body
LE: loop exit
PB: predicated region body
PF: predicated region fallthrough
CT: control target
= control target key end

     0   :  { %s2077_s1 = inlined_call_operand.vmem [shape: bf16[256,1024], index: 1, kind: input, shape index: {}]   ;;  %s2078_s0 = inlined_call_operand.vmem [shape: bf16[16,256], index: 0, kind: input, shape index: {}]   ;;  %s2079_s2 = inlined_call_operand.vmem [shape: f32[1,1024], index: 2, kind: input, shape index: {}]   ;;  %s2080_s3 = inlined_call_operand.vmem [shape: bf16[16,1024], index: 3, kind: output, shape index: {}]  }
   0x1   :  { %v52_v0 = vld [vmem:[%s2077_s1] sm:$0xff]  ;;  %v53_v2 = vld [vmem:[%s2077_s1 + $0x8] sm:$0xff] }
   0x2   :  { %v56_v1 = vld [vmem:[%s2077_s1 + $0x20] sm:$0xff]  ;;  %v57_v4 = vld [vmem:[%s2077_s1 + $0x28] sm:$0xff] }
   0x3   :  { %v1318_v3 = vcombine.high %v52_v0, %v56_v1  ;;  %v1317_v5 = vcombine.low %v52_v0, %v56_v1  ;;  %v60_v6 = vld [vmem:[%s2077_s1 + $0x40] sm:$0xff]  ;;  %v1320_v8 = vcombine.high %v53_v2, %v57_v4  ;;  %v1319_v9 = vcombine.low %v53_v2, %v57_v4  ;;  %v61_v11 = vld [vmem:[%s2077_s1 + $0x48] sm:$0xff] }
   0x4   :  { %v64_v7 = vld [vmem:[%s2077_s1 + $0x60] sm:$0xff]  ;;  %v65_v12 = vld [vmem:[%s2077_s1 + $0x68] sm:$0xff] }
   0x5   :  { %v1326_v10 = vcombine.high %v60_v6, %v64_v7  ;;  %v68_v13 = vld [vmem:[%s2077_s1 + $0x80] sm:$0xff]  ;;  %830 = vmatprep.subr.bf16.mxu0 %v1318_v3  ;;  %v1328_v14 = vcombine.high %v61_v11, %v65_v12  ;;  %v69_v16 = vld [vmem:[%s2077_s1 + $0x88] sm:$0xff]  ;;  %873 = vmatprep.subr.bf16.mxu1 %v1320_v8  ;;  %v1325_v18 = vcombine.low %v60_v6, %v64_v7 }
   0x6   :  { %v72_v15 = vld [vmem:[%s2077_s1 + $0xa0] sm:$0xff]  ;;  %v73_v17 = vld [vmem:[%s2077_s1 + $0xa8] sm:$0xff]  ;;  %831 = vmatpush1.bf16.msra.mxu0 %v1317_v5  ;;  %874 = vmatpush1.bf16.msra.mxu1 %v1319_v9  ;;  %v1327_v19 = vcombine.low %v61_v11, %v65_v12 }
   0x7   :  { %832 = vmatprep.subr.bf16.mxu0 %v1326_v10  ;;  %v1334_v20 = vcombine.high %v68_v13, %v72_v15  ;;  %875 = vmatprep.subr.bf16.mxu1 %v1328_v14  ;;  %v1336_v21 = vcombine.high %v69_v16, %v73_v17  ;;  %v76_v22 = vld [vmem:[%s2077_s1 + $0xc0] sm:$0xff]  ;;  %v77_v24 = vld [vmem:[%s2077_s1 + $0xc8] sm:$0xff]  ;;  %v1333_v26 = vcombine.low %v68_v13, %v72_v15 }
   0x8   :  { %v80_v23 = vld [vmem:[%s2077_s1 + $0xe0] sm:$0xff]  ;;  %v81_v25 = vld [vmem:[%s2077_s1 + $0xe8] sm:$0xff]  ;;  %v1335_v27 = vcombine.low %v69_v16, %v73_v17 }
   0x9   :  { %v1342_v28 = vcombine.high %v76_v22, %v80_v23  ;;  %v1344_v29 = vcombine.high %v77_v24, %v81_v25  ;;  %v84_v30 = vld [vmem:[%s2077_s1 + $0x100] sm:$0xff]  ;;  %v85_v32 = vld [vmem:[%s2077_s1 + $0x108] sm:$0xff]  ;;  %v1341_v34 = vcombine.low %v76_v22, %v80_v23  ;;  %v1343_v35 = vcombine.low %v77_v24, %v81_v25 }
   0xa   :  { %833 = vmatpush1.bf16.msra.mxu0 %v1325_v18  ;;  %876 = vmatpush1.bf16.msra.mxu1 %v1327_v19  ;;  %v88_v31 = vld [vmem:[%s2077_s1 + $0x120] sm:$0xff]  ;;  %v89_v33 = vld [vmem:[%s2077_s1 + $0x128] sm:$0xff] }
   0xb   :  { %834 = vmatprep.subr.bf16.mxu0 %v1334_v20  ;;  %877 = vmatprep.subr.bf16.mxu1 %v1336_v21  ;;  %v1350_v36 = vcombine.high %v84_v30, %v88_v31  ;;  %v1352_v37 = vcombine.high %v85_v32, %v89_v33  ;;  %v92_v38 = vld [vmem:[%s2077_s1 + $0x140] sm:$0xff]  ;;  %v93_v40 = vld [vmem:[%s2077_s1 + $0x148] sm:$0xff]  ;;  %v1349_v42 = vcombine.low %v84_v30, %v88_v31 }
   0xc   :  { %v96_v39 = vld [vmem:[%s2077_s1 + $0x160] sm:$0xff]  ;;  %v97_v41 = vld [vmem:[%s2077_s1 + $0x168] sm:$0xff]  ;;  %v1351_v43 = vcombine.low %v85_v32, %v89_v33 }
   0xd   :  { %v1358_v44 = vcombine.high %v92_v38, %v96_v39  ;;  %v1360_v45 = vcombine.high %v93_v40, %v97_v41  ;;  %v100_v46 = vld [vmem:[%s2077_s1 + $0x180] sm:$0xff]  ;;  %v101_v48 = vld [vmem:[%s2077_s1 + $0x188] sm:$0xff]  ;;  %v1357_v50 = vcombine.low %v92_v38, %v96_v39  ;;  %v1359_v51 = vcombine.low %v93_v40, %v97_v41 }
   0xe   :  { %835 = vmatpush1.bf16.msra.mxu0 %v1333_v26  ;;  %878 = vmatpush1.bf16.msra.mxu1 %v1335_v27  ;;  %v104_v47 = vld [vmem:[%s2077_s1 + $0x1a0] sm:$0xff]  ;;  %v105_v49 = vld [vmem:[%s2077_s1 + $0x1a8] sm:$0xff] }
   0xf   :  { %836 = vmatprep.subr.bf16.mxu0 %v1342_v28  ;;  %879 = vmatprep.subr.bf16.mxu1 %v1344_v29  ;;  %v1366_v52 = vcombine.high %v100_v46, %v104_v47  ;;  %v1368_v53 = vcombine.high %v101_v48, %v105_v49  ;;  %v108_v54 = vld [vmem:[%s2077_s1 + $0x1c0] sm:$0xff]  ;;  %v109_v57 = vld [vmem:[%s2077_s1 + $0x1c8] sm:$0xff]  ;;  %v1365_v59 = vcombine.low %v100_v46, %v104_v47 }
  0x10   :  { %v112_v55 = vld [vmem:[%s2077_s1 + $0x1e0] sm:$0xff]  ;;  %v113_v58 = vld [vmem:[%s2077_s1 + $0x1e8] sm:$0xff]  ;;  %v1367_v60 = vcombine.low %v101_v48, %v105_v49 }
  0x11   :  { %v1609_v56 = vld [vmem:[%s2078_s0 + $0x4] ss:$8 sps:$4 sm:$0xff]   ;;  %v1374_v61 = vcombine.high %v108_v54, %v112_v55  ;;  %v1376_v62 = vcombine.high %v109_v57, %v113_v58  ;;  %v1373_v3 = vcombine.low %v108_v54, %v112_v55  ;;  %v1375_v4 = vcombine.low %v109_v57, %v113_v58 }
  0x12   :  { %837 = vmatpush1.bf16.msra.mxu0 %v1341_v34  ;;  %880 = vmatpush1.bf16.msra.mxu1 %v1343_v35  ;;  %v116_v63 = vld [vmem:[%s2077_s1 + $0x200] sm:$0xff]  ;;  %v117_v1 = vld [vmem:[%s2077_s1 + $0x208] sm:$0xff] }
  0x13   :  { %838 = vmatprep.subr.bf16.mxu0 %v1350_v36  ;;  %881 = vmatprep.subr.bf16.mxu1 %v1352_v37  ;;  %v120_v0 = vld [vmem:[%s2077_s1 + $0x220] sm:$0xff]  ;;  %v121_v2 = vld [vmem:[%s2077_s1 + $0x228] sm:$0xff] }
  0x14   :  { %862 = vmatprep.mubr.bf16.mxu0 %v1609_v56  ;;  %905 = vmatprep.mubr.bf16.mxu1 %v1609_v56  ;;  %v1382_v5 = vcombine.high %v116_v63, %v120_v0  ;;  %v1384_v6 = vcombine.high %v117_v1, %v121_v2  ;;  %v124_v7 = vld [vmem:[%s2077_s1 + $0x240] sm:$0xff]  ;;  %v125_v9 = vld [vmem:[%s2077_s1 + $0x248] sm:$0xff]  ;;  %v1381_v11 = vcombine.low %v116_v63, %v120_v0  ;;  %v54_v0 = vld [vmem:[%s2077_s1 + $0x10] sm:$0xff] }
  0x15   :  { %v128_v8 = vld [vmem:[%s2077_s1 + $0x260] sm:$0xff]  ;;  %v129_v10 = vld [vmem:[%s2077_s1 + $0x268] sm:$0xff]  ;;  %v1383_v12 = vcombine.low %v117_v1, %v121_v2  ;;  %v58_v1 = vld [vmem:[%s2077_s1 + $0x30] sm:$0xff] }
  0x16   :  { %839 = vmatpush1.bf16.msra.mxu0 %v1349_v42  ;;  %882 = vmatpush1.bf16.msra.mxu1 %v1351_v43  ;;  %v1390_v13 = vcombine.high %v124_v7, %v128_v8  ;;  %v1392_v14 = vcombine.high %v125_v9, %v129_v10  ;;  %v132_v15 = vld [vmem:[%s2077_s1 + $0x280] sm:$0xff]  ;;  %v133_v17 = vld [vmem:[%s2077_s1 + $0x288] sm:$0xff]  ;;  %v1389_v19 = vcombine.low %v124_v7, %v128_v8  ;;  %v55_v2 = vld [vmem:[%s2077_s1 + $0x18] sm:$0xff] }
  0x17   :  { %840 = vmatprep.subr.bf16.mxu0 %v1358_v44  ;;  %883 = vmatprep.subr.bf16.mxu1 %v1360_v45  ;;  %v136_v16 = vld [vmem:[%s2077_s1 + $0x2a0] sm:$0xff]  ;;  %v137_v18 = vld [vmem:[%s2077_s1 + $0x2a8] sm:$0xff]  ;;  %v1391_v20 = vcombine.low %v125_v9, %v129_v10  ;;  %v62_v8 = vld [vmem:[%s2077_s1 + $0x50] sm:$0xff] }
  0x18   :  { %v1398_v21 = vcombine.high %v132_v15, %v136_v16  ;;  %v1400_v22 = vcombine.high %v133_v17, %v137_v18  ;;  %v140_v23 = vld [vmem:[%s2077_s1 + $0x2c0] sm:$0xff]  ;;  %v141_v25 = vld [vmem:[%s2077_s1 + $0x2c8] sm:$0xff]  ;;  %v1397_v27 = vcombine.low %v132_v15, %v136_v16  ;;  %v1399_v28 = vcombine.low %v133_v17, %v137_v18  ;;  %v66_v9 = vld [vmem:[%s2077_s1 + $0x70] sm:$0xff] }
  0x19   :  { %v144_v24 = vld [vmem:[%s2077_s1 + $0x2e0] sm:$0xff]  ;;  %v145_v26 = vld [vmem:[%s2077_s1 + $0x2e8] sm:$0xff]  ;;  %v1330_v15 = vcombine.high %v62_v8, %v66_v9  ;;  %v70_v17 = vld [vmem:[%s2077_s1 + $0x90] sm:$0xff] }
  0x1a   :  { %841 = vmatpush1.bf16.msra.mxu0 %v1357_v50  ;;  %884 = vmatpush1.bf16.msra.mxu1 %v1359_v51  ;;  %v1406_v29 = vcombine.high %v140_v23, %v144_v24  ;;  %v1408_v30 = vcombine.high %v141_v25, %v145_v26  ;;  %v148_v31 = vld [vmem:[%s2077_s1 + $0x300] sm:$0xff]  ;;  %v149_v33 = vld [vmem:[%s2077_s1 + $0x308] sm:$0xff]  ;;  %v1405_v35 = vcombine.low %v140_v23, %v144_v24  ;;  %v74_v18 = vld [vmem:[%s2077_s1 + $0xb0] sm:$0xff] }
  0x1b   :  { %842 = vmatprep.subr.bf16.mxu0 %v1366_v52  ;;  %885 = vmatprep.subr.bf16.mxu1 %v1368_v53  ;;  %v152_v32 = vld [vmem:[%s2077_s1 + $0x320] sm:$0xff]  ;;  %v153_v34 = vld [vmem:[%s2077_s1 + $0x328] sm:$0xff]  ;;  %v1407_v36 = vcombine.low %v141_v25, %v145_v26  ;;  %v1338_v23 = vcombine.high %v70_v17, %v74_v18  ;;  %v78_v25 = vld [vmem:[%s2077_s1 + $0xd0] sm:$0xff] }
  0x1c   :  { %v1414_v37 = vcombine.high %v148_v31, %v152_v32  ;;  %v1416_v38 = vcombine.high %v149_v33, %v153_v34  ;;  %v156_v39 = vld [vmem:[%s2077_s1 + $0x340] sm:$0xff]  ;;  %v157_v41 = vld [vmem:[%s2077_s1 + $0x348] sm:$0xff]  ;;  %v1413_v43 = vcombine.low %v148_v31, %v152_v32  ;;  %v1415_v44 = vcombine.low %v149_v33, %v153_v34  ;;  %v82_v26 = vld [vmem:[%s2077_s1 + $0xf0] sm:$0xff] }
  0x1d   :  { %v160_v40 = vld [vmem:[%s2077_s1 + $0x360] sm:$0xff]  ;;  %v161_v42 = vld [vmem:[%s2077_s1 + $0x368] sm:$0xff]  ;;  %v1346_v31 = vcombine.high %v78_v25, %v82_v26  ;;  %v86_v33 = vld [vmem:[%s2077_s1 + $0x110] sm:$0xff] }
  0x1e   :  { %843 = vmatpush1.bf16.msra.mxu0 %v1365_v59  ;;  %886 = vmatpush1.bf16.msra.mxu1 %v1367_v60  ;;  %v1422_v45 = vcombine.high %v156_v39, %v160_v40  ;;  %v1424_v46 = vcombine.high %v157_v41, %v161_v42  ;;  %v164_v47 = vld [vmem:[%s2077_s1 + $0x380] sm:$0xff]  ;;  %v165_v49 = vld [vmem:[%s2077_s1 + $0x388] sm:$0xff]  ;;  %v1421_v51 = vcombine.low %v156_v39, %v160_v40  ;;  %v90_v34 = vld [vmem:[%s2077_s1 + $0x130] sm:$0xff] }
  0x1f   :  { %844 = vmatprep.subr.bf16.mxu0 %v1374_v61  ;;  %887 = vmatprep.subr.bf16.mxu1 %v1376_v62  ;;  %v168_v48 = vld [vmem:[%s2077_s1 + $0x3a0] sm:$0xff]  ;;  %v169_v50 = vld [vmem:[%s2077_s1 + $0x3a8] sm:$0xff]  ;;  %v1423_v52 = vcombine.low %v157_v41, %v161_v42  ;;  %v94_v40 = vld [vmem:[%s2077_s1 + $0x150] sm:$0xff] }
  0x20   :  { %v1430_v53 = vcombine.high %v164_v47, %v168_v48  ;;  %v1432_v54 = vcombine.high %v165_v49, %v169_v50  ;;  %v172_v55 = vld [vmem:[%s2077_s1 + $0x3c0] sm:$0xff]  ;;  %v173_v58 = vld [vmem:[%s2077_s1 + $0x3c8] sm:$0xff]  ;;  %v1429_v60 = vcombine.low %v164_v47, %v168_v48  ;;  %v1431_v61 = vcombine.low %v165_v49, %v169_v50  ;;  %v98_v41 = vld [vmem:[%s2077_s1 + $0x170] sm:$0xff] }
  0x21   :  { %v176_v57 = vld [vmem:[%s2077_s1 + $0x3e0] sm:$0xff]  ;;  %v177_v59 = vld [vmem:[%s2077_s1 + $0x3e8] sm:$0xff]  ;;  %v95_v42 = vld [vmem:[%s2077_s1 + $0x158] sm:$0xff] }
  0x22   :  { %845 = vmatpush1.bf16.msra.mxu0 %v1373_v3  ;;  %888 = vmatpush1.bf16.msra.mxu1 %v1375_v4  ;;  %v1438_v62 = vcombine.high %v172_v55, %v176_v57  ;;  %v1440_v63 = vcombine.high %v173_v58, %v177_v59  ;;  %v59_v3 = vld [vmem:[%s2077_s1 + $0x38] sm:$0xff]  ;;  %v1437_v4 = vcombine.low %v172_v55, %v176_v57  ;;  %v1736_v10 = vld [vmem:[%s2078_s0] ss:$8 sps:$4 sm:$0xff]   ;;  %v102_v48 = vld [vmem:[%s2077_s1 + $0x190] sm:$0xff] }
  0x23   :  { %846 = vmatprep.subr.bf16.mxu0 %v1382_v5  ;;  %889 = vmatprep.subr.bf16.mxu1 %v1384_v6  ;;  %v1439_v5 = vcombine.low %v173_v58, %v177_v59  ;;  %v1322_v6 = vcombine.high %v54_v0, %v58_v1  ;;  %v1324_v7 = vcombine.high %v55_v2, %v59_v3  ;;  %v106_v49 = vld [vmem:[%s2077_s1 + $0x1b0] sm:$0xff]  ;;  %v103_v50 = vld [vmem:[%s2077_s1 + $0x198] sm:$0xff] }
  0x24   :  { %v110_v57 = vld [vmem:[%s2077_s1 + $0x1d0] sm:$0xff]  ;;  %v111_v59 = vld [vmem:[%s2077_s1 + $0x1d8] sm:$0xff] }
  0x25   :  { %v114_v58 = vld [vmem:[%s2077_s1 + $0x1f0] sm:$0xff] }
  0x26   :  { %847 = vmatpush1.bf16.msra.mxu0 %v1381_v11  ;;  %890 = vmatpush1.bf16.msra.mxu1 %v1383_v12  ;;  %v63_v11 = vld [vmem:[%s2077_s1 + $0x58] sm:$0xff] }
  0x27   :  { %848 = vmatprep.subr.bf16.mxu0 %v1390_v13  ;;  %891 = vmatprep.subr.bf16.mxu1 %v1392_v14  ;;  %v67_v12 = vld [vmem:[%s2077_s1 + $0x78] sm:$0xff]  ;;  %v1321_v13 = vcombine.low %v54_v0, %v58_v1  ;;  %v1323_v14 = vcombine.low %v55_v2, %v59_v3  ;;  %v118_v1 = vld [vmem:[%s2077_s1 + $0x210] sm:$0xff] }
  0x28   :  { %v1332_v16 = vcombine.high %v63_v11, %v67_v12  ;;  %v122_v2 = vld [vmem:[%s2077_s1 + $0x230] sm:$0xff]  ;;  %v119_v3 = vld [vmem:[%s2077_s1 + $0x218] sm:$0xff] }
  0x2a   :  { %849 = vmatpush1.bf16.msra.mxu0 %v1389_v19  ;;  %892 = vmatpush1.bf16.msra.mxu1 %v1391_v20  ;;  %v71_v19 = vld [vmem:[%s2077_s1 + $0x98] sm:$0xff] }
  0x2b   :  { %850 = vmatprep.subr.bf16.mxu0 %v1398_v21  ;;  %893 = vmatprep.subr.bf16.mxu1 %v1400_v22  ;;  %v75_v20 = vld [vmem:[%s2077_s1 + $0xb8] sm:$0xff]  ;;  %v1329_v21 = vcombine.low %v62_v8, %v66_v9  ;;  %v1331_v22 = vcombine.low %v63_v11, %v67_v12  ;;  %v126_v9 = vld [vmem:[%s2077_s1 + $0x250] sm:$0xff] }
  0x2c   :  { %v1340_v24 = vcombine.high %v71_v19, %v75_v20  ;;  %v130_v11 = vld [vmem:[%s2077_s1 + $0x270] sm:$0xff]  ;;  %v127_v12 = vld [vmem:[%s2077_s1 + $0x258] sm:$0xff] }
  0x2e   :  { %851 = vmatpush1.bf16.msra.mxu0 %v1397_v27  ;;  %894 = vmatpush1.bf16.msra.mxu1 %v1399_v28  ;;  %v79_v27 = vld [vmem:[%s2077_s1 + $0xd8] sm:$0xff] }
  0x2f   :  { %852 = vmatprep.subr.bf16.mxu0 %v1406_v29  ;;  %895 = vmatprep.subr.bf16.mxu1 %v1408_v30  ;;  %v83_v28 = vld [vmem:[%s2077_s1 + $0xf8] sm:$0xff]  ;;  %v1337_v29 = vcombine.low %v70_v17, %v74_v18  ;;  %v1339_v30 = vcombine.low %v71_v19, %v75_v20  ;;  %v134_v18 = vld [vmem:[%s2077_s1 + $0x290] sm:$0xff] }
  0x30   :  { %v1348_v32 = vcombine.high %v79_v27, %v83_v28  ;;  %v138_v19 = vld [vmem:[%s2077_s1 + $0x2b0] sm:$0xff]  ;;  %v135_v20 = vld [vmem:[%s2077_s1 + $0x298] sm:$0xff] }
  0x32   :  { %853 = vmatpush1.bf16.msra.mxu0 %v1405_v35  ;;  %896 = vmatpush1.bf16.msra.mxu1 %v1407_v36  ;;  %v91_v35 = vld [vmem:[%s2077_s1 + $0x138] sm:$0xff]  ;;  %v1345_v36 = vcombine.low %v78_v25, %v82_v26  ;;  %v142_v26 = vld [vmem:[%s2077_s1 + $0x2d0] sm:$0xff] }
  0x33   :  { %854 = vmatprep.subr.bf16.mxu0 %v1414_v37  ;;  %897 = vmatprep.subr.bf16.mxu1 %v1416_v38  ;;  %v1347_v37 = vcombine.low %v79_v27, %v83_v28  ;;  %v1354_v38 = vcombine.high %v86_v33, %v90_v34  ;;  %v146_v27 = vld [vmem:[%s2077_s1 + $0x2f0] sm:$0xff]  ;;  %v143_v28 = vld [vmem:[%s2077_s1 + $0x2d8] sm:$0xff] }
  0x36   :  { %855 = vmatpush1.bf16.msra.mxu0 %v1413_v43  ;;  %898 = vmatpush1.bf16.msra.mxu1 %v1415_v44  ;;  %v99_v43 = vld [vmem:[%s2077_s1 + $0x178] sm:$0xff]  ;;  %v1353_v44 = vcombine.low %v86_v33, %v90_v34  ;;  %v150_v34 = vld [vmem:[%s2077_s1 + $0x310] sm:$0xff] }
  0x37   :  { %856 = vmatprep.subr.bf16.mxu0 %v1422_v45  ;;  %899 = vmatprep.subr.bf16.mxu1 %v1424_v46  ;;  %v1362_v46 = vcombine.high %v94_v40, %v98_v41  ;;  %v1364_v47 = vcombine.high %v95_v42, %v99_v43 }
  0x3a   :  { %857 = vmatpush1.bf16.msra.mxu0 %v1421_v51  ;;  %900 = vmatpush1.bf16.msra.mxu1 %v1423_v52  ;;  %v107_v51 = vld [vmem:[%s2077_s1 + $0x1b8] sm:$0xff]  ;;  %v1361_v52 = vcombine.low %v94_v40, %v98_v41  ;;  %v158_v41 = vld [vmem:[%s2077_s1 + $0x350] sm:$0xff] }
  0x3b   :  { %858 = vmatprep.subr.bf16.mxu0 %v1430_v53  ;;  %901 = vmatprep.subr.bf16.mxu1 %v1432_v54  ;;  %v1363_v53 = vcombine.low %v95_v42, %v99_v43  ;;  %v1370_v54 = vcombine.high %v102_v48, %v106_v49  ;;  %v1372_v55 = vcombine.high %v103_v50, %v107_v51  ;;  %v162_v42 = vld [vmem:[%s2077_s1 + $0x370] sm:$0xff]  ;;  %v159_v43 = vld [vmem:[%s2077_s1 + $0x358] sm:$0xff] }
  0x3e   :  { %859 = vmatpush1.bf16.msra.mxu0 %v1429_v60  ;;  %902 = vmatpush1.bf16.msra.mxu1 %v1431_v61  ;;  %v115_v60 = vld [vmem:[%s2077_s1 + $0x1f8] sm:$0xff]  ;;  %v1369_v61 = vcombine.low %v102_v48, %v106_v49  ;;  %v166_v49 = vld [vmem:[%s2077_s1 + $0x390] sm:$0xff] }
  0x3f   :  { %860 = vmatprep.subr.bf16.mxu0 %v1438_v62  ;;  %903 = vmatprep.subr.bf16.mxu1 %v1440_v63  ;;  %v1371_v62 = vcombine.low %v103_v50, %v107_v51  ;;  %v1378_v63 = vcombine.high %v110_v57, %v114_v58  ;;  %v1380_v0 = vcombine.high %v111_v59, %v115_v60  ;;  %v170_v50 = vld [vmem:[%s2077_s1 + $0x3b0] sm:$0xff]  ;;  %v167_v51 = vld [vmem:[%s2077_s1 + $0x398] sm:$0xff] }
  0x42   :  { %861 = vmatpush1.bf16.msra.mxu0 %v1437_v4  ;;  %904 = vmatpush1.bf16.msra.mxu1 %v1439_v5  ;;  %v123_v4 = vld [vmem:[%s2077_s1 + $0x238] sm:$0xff]  ;;  %v1377_v5 = vcombine.low %v110_v57, %v114_v58  ;;  %v174_v58 = vld [vmem:[%s2077_s1 + $0x3d0] sm:$0xff] }
  0x43   :  { %916 = vmatprep.subr.bf16.mxu0 %v1322_v6  ;;  %959 = vmatprep.subr.bf16.mxu1 %v1324_v7  ;;  %v1379_v6 = vcombine.low %v111_v59, %v115_v60  ;;  %v1386_v7 = vcombine.high %v118_v1, %v122_v2  ;;  %v1388_v8 = vcombine.high %v119_v3, %v123_v4  ;;  %v178_v59 = vld [vmem:[%s2077_s1 + $0x3f0] sm:$0xff]  ;;  %v175_v60 = vld [vmem:[%s2077_s1 + $0x3d8] sm:$0xff] }
  0x45   :  { %863 = vmatmul.mubr.bf16.vlgmr.msra.gmra.mrb[0].mxu0 %v1736_v10  ;;  %906 = vmatmul.mubr.bf16.vlgmr.msra.gmra.mrb[0].mxu1 %v1736_v10 }
  0x46   :  { %917 = vmatpush1.bf16.msra.mxu0 %v1321_v13  ;;  %960 = vmatpush1.bf16.msra.mxu1 %v1323_v14  ;;  %v131_v13 = vld [vmem:[%s2077_s1 + $0x278] sm:$0xff]  ;;  %v1385_v14 = vcombine.low %v118_v1, %v122_v2  ;;  %v1441_v2 = vcombine.low %v174_v58, %v178_v59 }
  0x47   :  { %918 = vmatprep.subr.bf16.mxu0 %v1330_v15  ;;  %961 = vmatprep.subr.bf16.mxu1 %v1332_v16  ;;  %v1387_v15 = vcombine.low %v119_v3, %v123_v4  ;;  %v1394_v16 = vcombine.high %v126_v9, %v130_v11  ;;  %v1396_v17 = vcombine.high %v127_v12, %v131_v13  ;;  %v1055_v4 = vlaneseq }
  0x48   :  { %948 = vmatprep.mubr.bf16.mxu0 %v1609_v56  ;;  %991 = vmatprep.mubr.bf16.mxu1 %v1609_v56  ;;  %v87_v56 = vld [vmem:[%s2077_s1 + $0x118] sm:$0xff] }
  0x49   :  { %v1356_v39 = vcombine.high %v87_v56, %v91_v35  ;;  %v1355_v45 = vcombine.low %v87_v56, %v91_v35  ;;  %v154_v56 = vld [vmem:[%s2077_s1 + $0x330] sm:$0xff]  ;;  %v151_v35 = vld [vmem:[%s2077_s1 + $0x318] sm:$0xff] }
  0x4a   :  { %919 = vmatpush1.bf16.msra.mxu0 %v1329_v21  ;;  %962 = vmatpush1.bf16.msra.mxu1 %v1331_v22  ;;  %v139_v21 = vld [vmem:[%s2077_s1 + $0x2b8] sm:$0xff]  ;;  %v1393_v22 = vcombine.low %v126_v9, %v130_v11 }
  0x4b   :  { %920 = vmatprep.subr.bf16.mxu0 %v1338_v23  ;;  %963 = vmatprep.subr.bf16.mxu1 %v1340_v24  ;;  %v1395_v23 = vcombine.low %v127_v12, %v131_v13  ;;  %v1402_v24 = vcombine.high %v134_v18, %v138_v19  ;;  %v1404_v25 = vcombine.high %v135_v20, %v139_v21 }
  0x4e   :  { %921 = vmatpush1.bf16.msra.mxu0 %v1337_v29  ;;  %964 = vmatpush1.bf16.msra.mxu1 %v1339_v30  ;;  %v147_v29 = vld [vmem:[%s2077_s1 + $0x2f8] sm:$0xff]  ;;  %v1401_v30 = vcombine.low %v134_v18, %v138_v19 }
  0x4f   :  { %922 = vmatprep.subr.bf16.mxu0 %v1346_v31  ;;  %965 = vmatprep.subr.bf16.mxu1 %v1348_v32  ;;  %v1403_v31 = vcombine.low %v135_v20, %v139_v21  ;;  %v1410_v32 = vcombine.high %v142_v26, %v146_v27  ;;  %v1412_v33 = vcombine.high %v143_v28, %v147_v29 }
  0x52   :  { %923 = vmatpush1.bf16.msra.mxu0 %v1345_v36  ;;  %966 = vmatpush1.bf16.msra.mxu1 %v1347_v37  ;;  %v155_v36 = vld [vmem:[%s2077_s1 + $0x338] sm:$0xff]  ;;  %v1409_v37 = vcombine.low %v142_v26, %v146_v27 }
  0x53   :  { %924 = vmatprep.subr.bf16.mxu0 %v1354_v38  ;;  %967 = vmatprep.subr.bf16.mxu1 %v1356_v39  ;;  %v1411_v38 = vcombine.low %v143_v28, %v147_v29  ;;  %v1418_v39 = vcombine.high %v150_v34, %v154_v56  ;;  %v1420_v40 = vcombine.high %v151_v35, %v155_v36 }
  0x56   :  { %925 = vmatpush1.bf16.msra.mxu0 %v1353_v44  ;;  %968 = vmatpush1.bf16.msra.mxu1 %v1355_v45  ;;  %v163_v44 = vld [vmem:[%s2077_s1 + $0x378] sm:$0xff]  ;;  %v1417_v45 = vcombine.low %v150_v34, %v154_v56 }
  0x57   :  { %926 = vmatprep.subr.bf16.mxu0 %v1362_v46  ;;  %969 = vmatprep.subr.bf16.mxu1 %v1364_v47  ;;  %v1419_v46 = vcombine.low %v151_v35, %v155_v36  ;;  %v1426_v47 = vcombine.high %v158_v41, %v162_v42  ;;  %v1428_v48 = vcombine.high %v159_v43, %v163_v44 }
  0x5a   :  { %927 = vmatpush1.bf16.msra.mxu0 %v1361_v52  ;;  %970 = vmatpush1.bf16.msra.mxu1 %v1363_v53  ;;  %v171_v52 = vld [vmem:[%s2077_s1 + $0x3b8] sm:$0xff]  ;;  %v1425_v53 = vcombine.low %v158_v41, %v162_v42 }
  0x5b   :  { %928 = vmatprep.subr.bf16.mxu0 %v1370_v54  ;;  %971 = vmatprep.subr.bf16.mxu1 %v1372_v55  ;;  %v1427_v54 = vcombine.low %v159_v43, %v163_v44  ;;  %v1434_v55 = vcombine.high %v166_v49, %v170_v50  ;;  %v1436_v57 = vcombine.high %v167_v51, %v171_v52 }
  0x5e   :  { %929 = vmatpush1.bf16.msra.mxu0 %v1369_v61  ;;  %972 = vmatpush1.bf16.msra.mxu1 %v1371_v62  ;;  %v179_v61 = vld [vmem:[%s2077_s1 + $0x3f8] sm:$0xff]  ;;  %v1433_v62 = vcombine.low %v166_v49, %v170_v50 }
  0x5f   :  { %930 = vmatprep.subr.bf16.mxu0 %v1378_v63  ;;  %973 = vmatprep.subr.bf16.mxu1 %v1380_v0  ;;  %v1435_v63 = vcombine.low %v167_v51, %v171_v52  ;;  %v1442_v0 = vcombine.high %v174_v58, %v178_v59  ;;  %v1444_v1 = vcombine.high %v175_v60, %v179_v61 }
  0x60   :  { %v1443_v3 = vcombine.low %v175_v60, %v179_v61 }
  0x62   :  { %931 = vmatpush1.bf16.msra.mxu0 %v1377_v5  ;;  %974 = vmatpush1.bf16.msra.mxu1 %v1379_v6  ;;  %v1918_v5 = vshrl.u32 %v1055_v4, 7 }
  0x63   :  { %932 = vmatprep.subr.bf16.mxu0 %v1386_v7  ;;  %975 = vmatprep.subr.bf16.mxu1 %v1388_v8  ;;  %v1924_v7 = vld [vmem:[%s2079_s2] sm:$0xff] }
  0x64   :  { %v1057_v6 = vsub.s32 0, %v1918_v5  ;;  %v1065_v8 = vsub.s32 2, %v1918_v5  ;;  %v1061_v9 = vsub.s32 1, %v1918_v5  ;;  %v1069_v11 = vsub.s32 3, %v1918_v5 }
  0x66   :  { %933 = vmatpush1.bf16.msra.mxu0 %v1385_v14  ;;  %976 = vmatpush1.bf16.msra.mxu1 %v1387_v15  ;;  %v1058_v12 = vrot.slane %v1924_v7, %v1057_v6  ;;  %v1062_v13 = vrot.slane %v1924_v7, %v1061_v9  ;;  %v1070_v14 = vrot.slane %v1924_v7, %v1069_v11 }
  0x67   :  { %934 = vmatprep.subr.bf16.mxu0 %v1394_v16  ;;  %977 = vmatprep.subr.bf16.mxu1 %v1396_v17 }
  0x6a   :  { %935 = vmatpush1.bf16.msra.mxu0 %v1393_v22  ;;  %978 = vmatpush1.bf16.msra.mxu1 %v1395_v23 }
  0x6b   :  { %936 = vmatprep.subr.bf16.mxu0 %v1402_v24  ;;  %979 = vmatprep.subr.bf16.mxu1 %v1404_v25 }
  0x6e   :  { %937 = vmatpush1.bf16.msra.mxu0 %v1401_v30  ;;  %980 = vmatpush1.bf16.msra.mxu1 %v1403_v31 }
  0x6f   :  { %938 = vmatprep.subr.bf16.mxu0 %v1410_v32  ;;  %981 = vmatprep.subr.bf16.mxu1 %v1412_v33 }
  0x72   :  { %939 = vmatpush1.bf16.msra.mxu0 %v1409_v37  ;;  %982 = vmatpush1.bf16.msra.mxu1 %v1411_v38 }
  0x73   :  { %940 = vmatprep.subr.bf16.mxu0 %v1418_v39  ;;  %983 = vmatprep.subr.bf16.mxu1 %v1420_v40 }
  0x76   :  { %941 = vmatpush1.bf16.msra.mxu0 %v1417_v45  ;;  %984 = vmatpush1.bf16.msra.mxu1 %v1419_v46 }
  0x77   :  { %942 = vmatprep.subr.bf16.mxu0 %v1426_v47  ;;  %985 = vmatprep.subr.bf16.mxu1 %v1428_v48 }
  0x7a   :  { %943 = vmatpush1.bf16.msra.mxu0 %v1425_v53  ;;  %986 = vmatpush1.bf16.msra.mxu1 %v1427_v54 }
  0x7b   :  { %944 = vmatprep.subr.bf16.mxu0 %v1434_v55  ;;  %987 = vmatprep.subr.bf16.mxu1 %v1436_v57 }
  0x7e   :  { %945 = vmatpush1.bf16.msra.mxu0 %v1433_v62  ;;  %988 = vmatpush1.bf16.msra.mxu1 %v1435_v63 }
  0x7f   :  { %946 = vmatprep.subr.bf16.mxu0 %v1442_v0  ;;  %989 = vmatprep.subr.bf16.mxu1 %v1444_v1 }
  0x82   :  { %947 = vmatpush1.bf16.msra.mxu0 %v1441_v2  ;;  %990 = vmatpush1.bf16.msra.mxu1 %v1443_v3 }
  0x85   :  { %949 = vmatmul.mubr.bf16.vlgmr.msra.gmra.mrb[4].mxu0 %v1736_v10  ;;  %992 = vmatmul.mubr.bf16.vlgmr.msra.gmra.mrb[4].mxu1 %v1736_v10  ;;  %v1066_v10 = vrot.slane %v1924_v7, %v1065_v8 }
 0x118   :  { %v864_v15 = vpop.f32.mrb[0].mxu0  ;;  %v907_v17 = vpop.f32.mrb[0].mxu1 }
 0x119   :  { %v1933_v16 = vadd.f32 %v1058_v12, %v864_v15  ;;  %v866_v18 = vpop.f32.mrb[1].mxu0  ;;  %v1935_v19 = vadd.f32 %v1066_v10, %v907_v17  ;;  %v909_v21 = vpop.f32.mrb[1].mxu1 }
 0x11a   :  { %v1937_v20 = vadd.f32 %v1062_v13, %v866_v18  ;;  %v868_v22 = vpop.f32.mrb[2].mxu0  ;;  %v1940_v24 = vadd.f32 %v1070_v14, %v909_v21  ;;  %v911_v26 = vpop.f32.mrb[2].mxu1 }
 0x11b   :  { %v1127_v23 = vmul.f32 0.044715, %v1933_v16  ;;  %v1942_v25 = vadd.f32 %v1058_v12, %v868_v22  ;;  %v870_v27 = vpop.f32.mrb[3].mxu0  ;;  %v1129_v28 = vmul.f32 0.044715, %v1935_v19  ;;  %v913_v32 = vpop.f32.mrb[3].mxu1  ;;  %v1951_v35 = vadd.f32 %v1066_v10, %v911_v26 }
 0x11c   :  { %v1128_v29 = vmul.f32 0.044715, %v1937_v20  ;;  %v1130_v31 = vmul.f32 0.044715, %v1940_v24  ;;  %v1955_v38 = vadd.f32 %v1062_v13, %v870_v27  ;;  %v1963_v45 = vadd.f32 %v1070_v14, %v913_v32 }
 0x11d   :  { %v1143_v30 = vmul.f32 %v1127_v23, %v1933_v16  ;;  %v1145_v33 = vmul.f32 %v1129_v28, %v1935_v19  ;;  %v1135_v56 = vmul.f32 0.044715, %v1942_v25  ;;  %v1137_v44 = vmul.f32 0.044715, %v1951_v35 }
 0x11e   :  { %v1144_v34 = vmul.f32 %v1128_v29, %v1937_v20  ;;  %v1146_v37 = vmul.f32 %v1130_v31, %v1940_v24  ;;  %v1136_v49 = vmul.f32 0.044715, %v1955_v38  ;;  %v1138_v60 = vmul.f32 0.044715, %v1963_v45 }
 0x11f   :  { %v1159_v36 = vmul.f32 %v1143_v30, %v1933_v16  ;;  %v1161_v39 = vmul.f32 %v1145_v33, %v1935_v19  ;;  %v1151_v41 = vmul.f32 %v1135_v56, %v1942_v25  ;;  %v1153_v52 = vmul.f32 %v1137_v44, %v1951_v35 }
 0x120   :  { %v1160_v40 = vmul.f32 %v1144_v34, %v1937_v20  ;;  %v1162_v43 = vmul.f32 %v1146_v37, %v1940_v24  ;;  %v1152_v57 = vmul.f32 %v1136_v49, %v1955_v38  ;;  %v1154_v0 = vmul.f32 %v1138_v60, %v1963_v45 }
 0x121   :  { %v1175_v42 = vadd.f32 %v1159_v36, %v1933_v16  ;;  %v1177_v46 = vadd.f32 %v1161_v39, %v1935_v19  ;;  %v1167_v48 = vmul.f32 %v1151_v41, %v1942_v25  ;;  %v1169_v59 = vmul.f32 %v1153_v52, %v1951_v35 }
 0x122   :  { %v1176_v47 = vadd.f32 %v1160_v40, %v1937_v20  ;;  %v1178_v51 = vadd.f32 %v1162_v43, %v1940_v24  ;;  %v1168_v62 = vmul.f32 %v1152_v57, %v1955_v38  ;;  %v1170_v3 = vmul.f32 %v1154_v0, %v1963_v45 }
 0x123   :  { %v1191_v50 = vmul.f32 0.7978846, %v1175_v42  ;;  %v1193_v53 = vmul.f32 0.7978846, %v1177_v46  ;;  %v1183_v55 = vadd.f32 %v1167_v48, %v1942_v25  ;;  %v1185_v63 = vadd.f32 %v1169_v59, %v1951_v35 }
 0x124   :  { %v1192_v54 = vmul.f32 0.7978846, %v1176_v47  ;;  %v1194_v58 = vmul.f32 0.7978846, %v1178_v51  ;;  %v1184_v1 = vadd.f32 %v1168_v62, %v1955_v38  ;;  %v1186_v6 = vadd.f32 %v1170_v3, %v1963_v45 }
 0x125   :  { %1464 = vtanh.f32 %v1191_v50  ;;  %v1199_v61 = vmul.f32 0.7978846, %v1183_v55  ;;  %v1201_v2 = vmul.f32 0.7978846, %v1185_v63  ;;  %v1111_v12 = vmul.f32 0.5, %v1933_v16 }
 0x126   :  { %1466 = vtanh.f32 %v1193_v53  ;;  %v1200_v4 = vmul.f32 0.7978846, %v1184_v1  ;;  %v1202_v8 = vmul.f32 0.7978846, %v1186_v6  ;;  %v1113_v14 = vmul.f32 0.5, %v1935_v19 }
 0x127   :  { %1468 = vtanh.f32 %v1192_v54  ;;  %v1112_v21 = vmul.f32 0.5, %v1937_v20  ;;  %v1114_v27 = vmul.f32 0.5, %v1940_v24  ;;  %v1119_v16 = vmul.f32 0.5, %v1942_v25 }
 0x128   :  { %1470 = vtanh.f32 %v1194_v58  ;;  %v1120_v37 = vmul.f32 0.5, %v1955_v38  ;;  %v1121_v24 = vmul.f32 0.5, %v1951_v35  ;;  %v1122_v41 = vmul.f32 0.5, %v1963_v45 }
 0x129   :  { %1472 = vtanh.f32 %v1199_v61  ;;  %v1073_v35 = vsub.s32 4, %v1918_v5  ;;  %v1081_v46 = vsub.s32 6, %v1918_v5  ;;  %v1077_v47 = vsub.s32 5, %v1918_v5 }
 0x12a   :  { %1474 = vtanh.f32 %v1201_v2  ;;  %v1085_v45 = vsub.s32 7, %v1918_v5 }
 0x12b   :  { %1476 = vtanh.f32 %v1200_v4  ;;  %v1074_v48 = vrot.slane %v1924_v7, %v1073_v35  ;;  %v1082_v49 = vrot.slane %v1924_v7, %v1081_v46  ;;  %v1078_v50 = vrot.slane %v1924_v7, %v1077_v47 }
 0x12c   :  { %1478 = vtanh.f32 %v1202_v8  ;;  %v1086_v51 = vrot.slane %v1924_v7, %v1085_v45 }
 0x12f   :  { %v1465_v9 = vpop.eup %1464 }
 0x130   :  { %v1467_v11 = vpop.eup %1466  ;;  %v1223_v10 = vadd.f32 1.0, %v1465_v9 }
 0x131   :  { %v1469_v13 = vpop.eup %1468  ;;  %v1225_v15 = vadd.f32 1.0, %v1467_v11 }
 0x132   :  { %v1471_v17 = vpop.eup %1470  ;;  %v1239_v18 = vmul.f32 %v1223_v10, %v1111_v12  ;;  %v1224_v22 = vadd.f32 1.0, %v1469_v13 }
 0x133   :  { %v1473_v23 = vpop.eup %1472  ;;  %v1241_v26 = vmul.f32 %v1225_v15, %v1113_v14  ;;  %v1226_v28 = vadd.f32 1.0, %v1471_v17 }
 0x134   :  { %v1240_v29 = vmul.f32 %v1224_v22, %v1112_v21  ;;  %v1231_v30 = vadd.f32 1.0, %v1473_v23  ;;  %v1475_v31 = vpop.eup %1474 }
 0x135   :  { %v1242_v32 = vmul.f32 %v1226_v28, %v1114_v27  ;;  %v1477_v33 = vpop.eup %1476  ;;  %v1233_v19 = vadd.f32 1.0, %v1475_v31 }
 0x136   :  { %v1453_v34 = vpack.c.bf16 %v1240_v29, %v1239_v18  ;;  %v1247_v36 = vmul.f32 %v1231_v30, %v1119_v16  ;;  %v1232_v20 = vadd.f32 1.0, %v1477_v33  ;;  %v1479_v39 = vpop.eup %1478 }
 0x137   :  { %v1454_v56 = vpack.c.bf16 %v1242_v32, %v1241_v26  ;;  %v1249_v40 = vmul.f32 %v1233_v19, %v1121_v24  ;;  %v1234_v42 = vadd.f32 1.0, %v1479_v39 }
 0x138   :  { %1303 = vst [vmem:[%s2080_s3] sm:$0xff] %v1453_v34  ;;  %v1248_v25 = vmul.f32 %v1232_v20, %v1120_v37 }
 0x139   :  { %1304 = vst [vmem:[%s2080_s3 + $0x8] sm:$0xff] %v1454_v56  ;;  %v1250_v44 = vmul.f32 %v1234_v42, %v1122_v41 }
 0x13a   :  { %v1457_v43 = vpack.c.bf16 %v1248_v25, %v1247_v36 }
 0x13b   :  { %v1458_v38 = vpack.c.bf16 %v1250_v44, %v1249_v40 }
 0x13c   :  { %1307 = vst [vmem:[%s2080_s3 + $0x20] sm:$0xff] %v1457_v43 }
 0x13d   :  { %1308 = vst [vmem:[%s2080_s3 + $0x28] sm:$0xff] %v1458_v38 }
 0x158   :  { %v950_v52 = vpop.f32.mrb[4].mxu0  ;;  %v993_v54 = vpop.f32.mrb[4].mxu1 }
 0x159   :  { %v2009_v53 = vadd.f32 %v1074_v48, %v950_v52  ;;  %v952_v55 = vpop.f32.mrb[5].mxu0  ;;  %v2011_v57 = vadd.f32 %v1082_v49, %v993_v54  ;;  %v995_v59 = vpop.f32.mrb[5].mxu1 }
 0x15a   :  { %v2013_v58 = vadd.f32 %v1078_v50, %v952_v55  ;;  %v954_v60 = vpop.f32.mrb[6].mxu0  ;;  %v2016_v61 = vadd.f32 %v1086_v51, %v995_v59  ;;  %v997_v63 = vpop.f32.mrb[6].mxu1 }
 0x15b   :  { %v1131_v5 = vmul.f32 0.044715, %v2009_v53  ;;  %v2018_v62 = vadd.f32 %v1074_v48, %v954_v60  ;;  %v956_v0 = vpop.f32.mrb[7].mxu0  ;;  %v1133_v7 = vmul.f32 0.044715, %v2011_v57  ;;  %v999_v4 = vpop.f32.mrb[7].mxu1  ;;  %v2027_v11 = vadd.f32 %v1082_v49, %v997_v63 }
 0x15c   :  { %v1132_v1 = vmul.f32 0.044715, %v2013_v58  ;;  %v1134_v3 = vmul.f32 0.044715, %v2016_v61  ;;  %v2031_v13 = vadd.f32 %v1078_v50, %v956_v0  ;;  %v2039_v23 = vadd.f32 %v1086_v51, %v999_v4 }
 0x15d   :  { %v1147_v2 = vmul.f32 %v1131_v5, %v2009_v53  ;;  %v1149_v6 = vmul.f32 %v1133_v7, %v2011_v57  ;;  %v1139_v9 = vmul.f32 0.044715, %v2018_v62  ;;  %v1141_v22 = vmul.f32 0.044715, %v2027_v11 }
 0x15e   :  { %v1148_v8 = vmul.f32 %v1132_v1, %v2013_v58  ;;  %v1150_v10 = vmul.f32 %v1134_v3, %v2016_v61  ;;  %v1140_v29 = vmul.f32 0.044715, %v2031_v13  ;;  %v1142_v37 = vmul.f32 0.044715, %v2039_v23 }
 0x15f   :  { %v1163_v12 = vmul.f32 %v1147_v2, %v2009_v53  ;;  %v1165_v14 = vmul.f32 %v1149_v6, %v2011_v57  ;;  %v1155_v17 = vmul.f32 %v1139_v9, %v2018_v62  ;;  %v1157_v32 = vmul.f32 %v1141_v22, %v2027_v11 }
 0x160   :  { %v1164_v15 = vmul.f32 %v1148_v8, %v2013_v58  ;;  %v1166_v21 = vmul.f32 %v1150_v10, %v2016_v61  ;;  %v1156_v19 = vmul.f32 %v1140_v29, %v2031_v13  ;;  %v1158_v25 = vmul.f32 %v1142_v37, %v2039_v23 }
 0x161   :  { %v1179_v18 = vadd.f32 %v1163_v12, %v2009_v53  ;;  %v1181_v26 = vadd.f32 %v1165_v14, %v2011_v57  ;;  %v1171_v28 = vmul.f32 %v1155_v17, %v2018_v62  ;;  %v1173_v36 = vmul.f32 %v1157_v32, %v2027_v11 }
 0x162   :  { %v1180_v27 = vadd.f32 %v1164_v15, %v2013_v58  ;;  %v1182_v31 = vadd.f32 %v1166_v21, %v2016_v61  ;;  %v1172_v24 = vmul.f32 %v1156_v19, %v2031_v13  ;;  %v1174_v42 = vmul.f32 %v1158_v25, %v2039_v23 }
 0x163   :  { %v1195_v30 = vmul.f32 0.7978846, %v1179_v18  ;;  %v1197_v16 = vmul.f32 0.7978846, %v1181_v26  ;;  %v1187_v34 = vadd.f32 %v1171_v28, %v2018_v62  ;;  %v1189_v39 = vadd.f32 %v1173_v36, %v2027_v11 }
 0x164   :  { %v1196_v33 = vmul.f32 0.7978846, %v1180_v27  ;;  %v1198_v56 = vmul.f32 0.7978846, %v1182_v31  ;;  %v1188_v40 = vadd.f32 %v1172_v24, %v2031_v13  ;;  %v1190_v44 = vadd.f32 %v1174_v42, %v2039_v23 }
 0x165   :  { %1480 = vtanh.f32 %v1195_v30  ;;  %v1203_v20 = vmul.f32 0.7978846, %v1187_v34  ;;  %v1205_v41 = vmul.f32 0.7978846, %v1189_v39  ;;  %v1115_v47 = vmul.f32 0.5, %v2009_v53 }
 0x166   :  { %1482 = vtanh.f32 %v1197_v16  ;;  %v1204_v43 = vmul.f32 0.7978846, %v1188_v40  ;;  %v1206_v38 = vmul.f32 0.7978846, %v1190_v44  ;;  %v1117_v49 = vmul.f32 0.5, %v2011_v57 }
 0x167   :  { %1484 = vtanh.f32 %v1196_v33  ;;  %v1116_v54 = vmul.f32 0.5, %v2013_v58  ;;  %v1118_v5 = vmul.f32 0.5, %v2016_v61  ;;  %v1123_v53 = vmul.f32 0.5, %v2018_v62 }
 0x168   :  { %1486 = vtanh.f32 %v1198_v56  ;;  %v1124_v9 = vmul.f32 0.5, %v2031_v13  ;;  %v1125_v61 = vmul.f32 0.5, %v2027_v11  ;;  %v1126_v14 = vmul.f32 0.5, %v2039_v23 }
 0x169   :  { %1488 = vtanh.f32 %v1203_v20 }
 0x16a   :  { %1490 = vtanh.f32 %v1205_v41 }
 0x16b   :  { %1492 = vtanh.f32 %v1204_v43 }
 0x16c   :  { %1494 = vtanh.f32 %v1206_v38 }
 0x16f   :  { %v1481_v35 = vpop.eup %1480 }
 0x170   :  { %v1483_v46 = vpop.eup %1482  ;;  %v1227_v45 = vadd.f32 1.0, %v1481_v35 }
 0x171   :  { %v1485_v48 = vpop.eup %1484  ;;  %v1229_v50 = vadd.f32 1.0, %v1483_v46 }
 0x172   :  { %v1487_v51 = vpop.eup %1486  ;;  %v1243_v52 = vmul.f32 %v1227_v45, %v1115_v47  ;;  %v1228_v55 = vadd.f32 1.0, %v1485_v48 }
 0x173   :  { %v1489_v59 = vpop.eup %1488  ;;  %v1245_v60 = vmul.f32 %v1229_v50, %v1117_v49  ;;  %v1230_v63 = vadd.f32 1.0, %v1487_v51 }
 0x174   :  { %v1244_v0 = vmul.f32 %v1228_v55, %v1116_v54  ;;  %v1235_v7 = vadd.f32 1.0, %v1489_v59  ;;  %v1491_v1 = vpop.eup %1490 }
 0x175   :  { %v1246_v2 = vmul.f32 %v1230_v63, %v1118_v5  ;;  %v1493_v3 = vpop.eup %1492  ;;  %v1237_v57 = vadd.f32 1.0, %v1491_v1 }
 0x176   :  { %v1455_v4 = vpack.c.bf16 %v1244_v0, %v1243_v52  ;;  %v1251_v8 = vmul.f32 %v1235_v7, %v1123_v53  ;;  %v1236_v58 = vadd.f32 1.0, %v1493_v3  ;;  %v1495_v12 = vpop.eup %1494 }
 0x177   :  { %v1456_v6 = vpack.c.bf16 %v1246_v2, %v1245_v60  ;;  %v1253_v10 = vmul.f32 %v1237_v57, %v1125_v61  ;;  %v1238_v15 = vadd.f32 1.0, %v1495_v12 }
 0x178   :  { %1305 = vst [vmem:[%s2080_s3 + $0x10] sm:$0xff] %v1455_v4  ;;  %v1252_v62 = vmul.f32 %v1236_v58, %v1124_v9 }
 0x179   :  { %1306 = vst [vmem:[%s2080_s3 + $0x18] sm:$0xff] %v1456_v6  ;;  %v1254_v18 = vmul.f32 %v1238_v15, %v1126_v14 }
 0x17a   :  { %v1459_v17 = vpack.c.bf16 %v1252_v62, %v1251_v8 }
 0x17b   :  { %v1460_v13 = vpack.c.bf16 %v1254_v18, %v1253_v10 }
 0x17c   :  { %1309 = vst [vmem:[%s2080_s3 + $0x30] sm:$0xff] %v1459_v17 }
 0x17d   :  { %1310 = vst [vmem:[%s2080_s3 + $0x38] sm:$0xff] %v1460_v13 }

// kernel: text_decoder_forward.51
= control target key start
LH: loop header
LB: loop body
LE: loop exit
PB: predicated region body
PF: predicated region fallthrough
CT: control target
= control target key end

     0   :  { %s350_s1 = inlined_call_operand.vmem [shape: bf16[256,128], index: 1, kind: input, shape index: {}]   ;;  %s351_s0 = inlined_call_operand.vmem [shape: bf16[16,256], index: 0, kind: input, shape index: {}]   ;;  %s352_s2 = inlined_call_operand.vmem [shape: f32[16,128], index: 2, kind: output, shape index: {}]  }
   0x1   :  { %v256_v0 = vld [vmem:[%s350_s1 + $0x40] sm:$0xff]   ;;  %v258_v2 = vld [vmem:[%s350_s1 + $0x48] sm:$0xff]   ;;  %v260_v4 = vld [vmem:[%s350_s1 + $0x50] sm:$0xff]  }
   0x2   :  { %v257_v1 = vld [vmem:[%s350_s1] sm:$0xff]   ;;  %234 = vmatprep.subr.bf16.mxu0 %v256_v0  ;;  %v259_v3 = vld [vmem:[%s350_s1 + $0x8] sm:$0xff]   ;;  %v261_v5 = vld [vmem:[%s350_s1 + $0x10] sm:$0xff]  }
   0x3   :  { %235 = vmatpush3.bf16.msra.mxu0 %v257_v1  ;;  %v262_v6 = vld [vmem:[%s350_s1 + $0x58] sm:$0xff]   ;;  %v264_v8 = vld [vmem:[%s350_s1 + $0x60] sm:$0xff]   ;;  %v266_v10 = vld [vmem:[%s350_s1 + $0x68] sm:$0xff]  }
   0x4   :  { %236 = vmatprep.subr.bf16.mxu0 %v258_v2  ;;  %v263_v7 = vld [vmem:[%s350_s1 + $0x18] sm:$0xff]   ;;  %v265_v9 = vld [vmem:[%s350_s1 + $0x20] sm:$0xff]   ;;  %v267_v12 = vld [vmem:[%s350_s1 + $0x28] sm:$0xff]  }
   0x5   :  { %v274_v11 = vld [vmem:[%s351_s0 + $0x4] ss:$8 sps:$4 sm:$0xff]   ;;  %v268_v13 = vld [vmem:[%s350_s1 + $0x70] sm:$0xff]   ;;  %v270_v15 = vld [vmem:[%s350_s1 + $0x78] sm:$0xff]  }
   0x6   :  { %192 = vmatprep.mubr.bf16.mxu0 %v274_v11  ;;  %v269_v14 = vld [vmem:[%s350_s1 + $0x30] sm:$0xff]   ;;  %v271_v16 = vld [vmem:[%s350_s1 + $0x38] sm:$0xff]   ;;  %v272_v17 = vld [vmem:[%s351_s0] ss:$8 sps:$4 sm:$0xff]  }
   0x7   :  { %237 = vmatpush3.bf16.msra.mxu0 %v259_v3 }
   0x8   :  { %238 = vmatprep.subr.bf16.mxu0 %v260_v4 }
   0xb   :  { %239 = vmatpush3.bf16.msra.mxu0 %v261_v5 }
   0xc   :  { %240 = vmatprep.subr.bf16.mxu0 %v262_v6 }
   0xf   :  { %241 = vmatpush3.bf16.msra.mxu0 %v263_v7 }
  0x10   :  { %242 = vmatprep.subr.bf16.mxu0 %v264_v8 }
  0x13   :  { %243 = vmatpush3.bf16.msra.mxu0 %v265_v9 }
  0x14   :  { %244 = vmatprep.subr.bf16.mxu0 %v266_v10 }
  0x17   :  { %245 = vmatpush3.bf16.msra.mxu0 %v267_v12 }
  0x18   :  { %246 = vmatprep.subr.bf16.mxu0 %v268_v13 }
  0x1b   :  { %247 = vmatpush3.bf16.msra.mxu0 %v269_v14 }
  0x1c   :  { %248 = vmatprep.subr.bf16.mxu0 %v270_v15 }
  0x1f   :  { %249 = vmatpush3.bf16.msra.mxu0 %v271_v16 }
  0x22   :  { %193 = vmatmul.mubr.bf16.vlgmr.msra.gmra.mrb[0].mxu0 %v272_v17 }
  0xf5   :  { %v250_v18 = vpop.f32.mrb[0].mxu0 }
  0xf6   :  { %v251_v19 = vpop.f32.mrb[1].mxu0 }
  0xf7   :  { %v252_v20 = vadd.f32 %v251_v19, %v250_v18  ;;  %v253_v21 = vpop.f32.mrb[2].mxu0 }
  0xf8   :  { %v254_v22 = vpop.f32.mrb[3].mxu0 }
  0xf9   :  { %210 = vst [vmem:[%s352_s2] sm:$0xff] %v252_v20  ;;  %v255_v23 = vadd.f32 %v254_v22, %v253_v21 }
  0xfb   :  { %211 = vst [vmem:[%s352_s2 + $0x8] sm:$0xff] %v255_v23 }

// kernel: text_decoder_forward.37
= control target key start
LH: loop header
LB: loop body
LE: loop exit
PB: predicated region body
PF: predicated region fallthrough
CT: control target
= control target key end

     0   :  { %s1884_s1 = inlined_call_operand.vmem [shape: bf16[1024,256], index: 1, kind: input, shape index: {}]   ;;  %s1885_s0 = inlined_call_operand.vmem [shape: bf16[16,1024], index: 0, kind: input, shape index: {}]   ;;  %s1886_s2 = inlined_call_operand.vmem [shape: f32[1,256], index: 2, kind: input, shape index: {}]   ;;  %s1887_s3 = inlined_call_operand.vmem [shape: bf16[16,256], index: 3, kind: input, shape index: {}]   ;;  %s1888_s4 = inlined_call_operand.vmem [shape: bf16[16,256], index: 4, kind: output, shape index: {}]  }
   0x1   :  { %v1228_v0 = vld [vmem:[%s1884_s1 + $0x4] ss:$8 sps:$4 sm:$0xff]   ;;  %v1232_v2 = vld [vmem:[%s1884_s1] ss:$8 sps:$4 sm:$0xff]   ;;  %v1234_v4 = vld [vmem:[%s1884_s1 + $0x14] ss:$8 sps:$4 sm:$0xff]  }
   0x2   :  { %v1230_v1 = vld [vmem:[%s1884_s1 + $0x204] ss:$8 sps:$4 sm:$0xff]   ;;  %845 = vmatprep.subr.bf16.mxu1 %v1228_v0  ;;  %v1233_v3 = vld [vmem:[%s1884_s1 + $0x200] ss:$8 sps:$4 sm:$0xff]   ;;  %v1236_v5 = vld [vmem:[%s1884_s1 + $0x214] ss:$8 sps:$4 sm:$0xff]  }
   0x3   :  { %931 = vmatprep.subr.bf16.mxu0 %v1230_v1  ;;  %846 = vmatpush1.bf16.msra.mxu1 %v1232_v2  ;;  %v1238_v6 = vld [vmem:[%s1884_s1 + $0x10] ss:$8 sps:$4 sm:$0xff]   ;;  %v1240_v8 = vld [vmem:[%s1884_s1 + $0x24] ss:$8 sps:$4 sm:$0xff]   ;;  %v1244_v10 = vld [vmem:[%s1884_s1 + $0x20] ss:$8 sps:$4 sm:$0xff]  }
   0x4   :  { %932 = vmatpush1.bf16.msra.mxu0 %v1233_v3  ;;  %847 = vmatprep.subr.bf16.mxu1 %v1234_v4  ;;  %v1239_v7 = vld [vmem:[%s1884_s1 + $0x210] ss:$8 sps:$4 sm:$0xff]   ;;  %v1242_v9 = vld [vmem:[%s1884_s1 + $0x224] ss:$8 sps:$4 sm:$0xff]   ;;  %v1245_v11 = vld [vmem:[%s1884_s1 + $0x220] ss:$8 sps:$4 sm:$0xff]  }
   0x5   :  { %933 = vmatprep.subr.bf16.mxu0 %v1236_v5  ;;  %v1246_v12 = vld [vmem:[%s1884_s1 + $0x34] ss:$8 sps:$4 sm:$0xff]   ;;  %v1250_v14 = vld [vmem:[%s1884_s1 + $0x30] ss:$8 sps:$4 sm:$0xff]   ;;  %v1252_v16 = vld [vmem:[%s1884_s1 + $0x44] ss:$8 sps:$4 sm:$0xff]  }
   0x6   :  { %v1248_v13 = vld [vmem:[%s1884_s1 + $0x234] ss:$8 sps:$4 sm:$0xff]   ;;  %v1251_v15 = vld [vmem:[%s1884_s1 + $0x230] ss:$8 sps:$4 sm:$0xff]   ;;  %v1254_v17 = vld [vmem:[%s1884_s1 + $0x244] ss:$8 sps:$4 sm:$0xff]  }
   0x7   :  { %848 = vmatpush1.bf16.msra.mxu1 %v1238_v6  ;;  %v1256_v18 = vld [vmem:[%s1884_s1 + $0x40] ss:$8 sps:$4 sm:$0xff]   ;;  %v1258_v20 = vld [vmem:[%s1884_s1 + $0x54] ss:$8 sps:$4 sm:$0xff]   ;;  %v1262_v22 = vld [vmem:[%s1884_s1 + $0x50] ss:$8 sps:$4 sm:$0xff]  }
   0x8   :  { %934 = vmatpush1.bf16.msra.mxu0 %v1239_v7  ;;  %849 = vmatprep.subr.bf16.mxu1 %v1240_v8  ;;  %v1257_v19 = vld [vmem:[%s1884_s1 + $0x240] ss:$8 sps:$4 sm:$0xff]   ;;  %v1260_v21 = vld [vmem:[%s1884_s1 + $0x254] ss:$8 sps:$4 sm:$0xff]   ;;  %v1263_v23 = vld [vmem:[%s1884_s1 + $0x250] ss:$8 sps:$4 sm:$0xff]  }
   0x9   :  { %935 = vmatprep.subr.bf16.mxu0 %v1242_v9  ;;  %v1264_v24 = vld [vmem:[%s1884_s1 + $0x64] ss:$8 sps:$4 sm:$0xff]   ;;  %v1268_v26 = vld [vmem:[%s1884_s1 + $0x60] ss:$8 sps:$4 sm:$0xff]   ;;  %v1270_v28 = vld [vmem:[%s1884_s1 + $0x74] ss:$8 sps:$4 sm:$0xff]  }
   0xa   :  { %v1266_v25 = vld [vmem:[%s1884_s1 + $0x264] ss:$8 sps:$4 sm:$0xff]   ;;  %v1269_v27 = vld [vmem:[%s1884_s1 + $0x260] ss:$8 sps:$4 sm:$0xff]   ;;  %v1272_v29 = vld [vmem:[%s1884_s1 + $0x274] ss:$8 sps:$4 sm:$0xff]  }
   0xb   :  { %850 = vmatpush1.bf16.msra.mxu1 %v1244_v10  ;;  %v1274_v30 = vld [vmem:[%s1884_s1 + $0x70] ss:$8 sps:$4 sm:$0xff]   ;;  %v1276_v32 = vld [vmem:[%s1884_s1 + $0x84] ss:$8 sps:$4 sm:$0xff]   ;;  %v1280_v34 = vld [vmem:[%s1884_s1 + $0x80] ss:$8 sps:$4 sm:$0xff]  }
   0xc   :  { %936 = vmatpush1.bf16.msra.mxu0 %v1245_v11  ;;  %851 = vmatprep.subr.bf16.mxu1 %v1246_v12  ;;  %v1275_v31 = vld [vmem:[%s1884_s1 + $0x270] ss:$8 sps:$4 sm:$0xff]   ;;  %v1278_v33 = vld [vmem:[%s1884_s1 + $0x284] ss:$8 sps:$4 sm:$0xff]   ;;  %v1281_v35 = vld [vmem:[%s1884_s1 + $0x280] ss:$8 sps:$4 sm:$0xff]  }
   0xd   :  { %937 = vmatprep.subr.bf16.mxu0 %v1248_v13  ;;  %v1282_v36 = vld [vmem:[%s1884_s1 + $0x94] ss:$8 sps:$4 sm:$0xff]   ;;  %v1286_v38 = vld [vmem:[%s1884_s1 + $0x90] ss:$8 sps:$4 sm:$0xff]   ;;  %v1288_v40 = vld [vmem:[%s1884_s1 + $0xa4] ss:$8 sps:$4 sm:$0xff]  }
   0xe   :  { %v1284_v37 = vld [vmem:[%s1884_s1 + $0x294] ss:$8 sps:$4 sm:$0xff]   ;;  %v1287_v39 = vld [vmem:[%s1884_s1 + $0x290] ss:$8 sps:$4 sm:$0xff]   ;;  %v1290_v41 = vld [vmem:[%s1884_s1 + $0x2a4] ss:$8 sps:$4 sm:$0xff]  }
   0xf   :  { %852 = vmatpush1.bf16.msra.mxu1 %v1250_v14  ;;  %v1292_v42 = vld [vmem:[%s1884_s1 + $0xa0] ss:$8 sps:$4 sm:$0xff]   ;;  %v1294_v44 = vld [vmem:[%s1884_s1 + $0xb4] ss:$8 sps:$4 sm:$0xff]   ;;  %v1298_v46 = vld [vmem:[%s1884_s1 + $0xb0] ss:$8 sps:$4 sm:$0xff]  }
  0x10   :  { %938 = vmatpush1.bf16.msra.mxu0 %v1251_v15  ;;  %853 = vmatprep.subr.bf16.mxu1 %v1252_v16  ;;  %v1293_v43 = vld [vmem:[%s1884_s1 + $0x2a0] ss:$8 sps:$4 sm:$0xff]   ;;  %v1296_v45 = vld [vmem:[%s1884_s1 + $0x2b4] ss:$8 sps:$4 sm:$0xff]   ;;  %v1299_v47 = vld [vmem:[%s1884_s1 + $0x2b0] ss:$8 sps:$4 sm:$0xff]  }
  0x11   :  { %939 = vmatprep.subr.bf16.mxu0 %v1254_v17  ;;  %v29_v48 = vld [vmem:[%s1885_s0] sm:$0xff]  ;;  %v31_v53 = vld [vmem:[%s1885_s0 + $0x10] sm:$0xff] }
  0x12   :  { %v33_v49 = vld [vmem:[%s1885_s0 + $0x20] sm:$0xff]  ;;  %v35_v54 = vld [vmem:[%s1885_s0 + $0x30] sm:$0xff] }
  0x13   :  { %854 = vmatpush1.bf16.msra.mxu1 %v1256_v18  ;;  %v1300_v50 = vld [vmem:[%s1884_s1 + $0xc4] ss:$8 sps:$4 sm:$0xff]   ;;  %v1077_v52 = vcombine.high %v29_v48, %v33_v49  ;;  %v1081_v55 = vcombine.high %v31_v53, %v35_v54  ;;  %v1304_v56 = vld [vmem:[%s1884_s1 + $0xc0] ss:$8 sps:$4 sm:$0xff]   ;;  %v1306_v58 = vld [vmem:[%s1884_s1 + $0xd4] ss:$8 sps:$4 sm:$0xff]   ;;  %v1076_v8 = vcombine.low %v29_v48, %v33_v49  ;;  %v1080_v10 = vcombine.low %v31_v53, %v35_v54 }
  0x14   :  { %940 = vmatpush1.bf16.msra.mxu0 %v1257_v19  ;;  %855 = vmatprep.subr.bf16.mxu1 %v1258_v20  ;;  %v1302_v51 = vld [vmem:[%s1884_s1 + $0x2c4] ss:$8 sps:$4 sm:$0xff]   ;;  %v1305_v57 = vld [vmem:[%s1884_s1 + $0x2c0] ss:$8 sps:$4 sm:$0xff]   ;;  %v1308_v59 = vld [vmem:[%s1884_s1 + $0x2d4] ss:$8 sps:$4 sm:$0xff]  }
  0x15   :  { %941 = vmatprep.subr.bf16.mxu0 %v1260_v21  ;;  %877 = vmatprep.mubr.bf16.mxu1 %v1077_v52  ;;  %v1310_v60 = vld [vmem:[%s1884_s1 + $0xd0] ss:$8 sps:$4 sm:$0xff]   ;;  %v1312_v62 = vld [vmem:[%s1884_s1 + $0xe4] ss:$8 sps:$4 sm:$0xff]   ;;  %v1316_v0 = vld [vmem:[%s1884_s1 + $0xe0] ss:$8 sps:$4 sm:$0xff]  }
  0x16   :  { %963 = vmatprep.mubr.bf16.mxu0 %v1081_v55  ;;  %v1311_v61 = vld [vmem:[%s1884_s1 + $0x2d0] ss:$8 sps:$4 sm:$0xff]   ;;  %v1314_v63 = vld [vmem:[%s1884_s1 + $0x2e4] ss:$8 sps:$4 sm:$0xff]   ;;  %v1317_v1 = vld [vmem:[%s1884_s1 + $0x2e0] ss:$8 sps:$4 sm:$0xff]  }
  0x17   :  { %856 = vmatpush1.bf16.msra.mxu1 %v1262_v22  ;;  %v1318_v2 = vld [vmem:[%s1884_s1 + $0xf4] ss:$8 sps:$4 sm:$0xff]   ;;  %v1322_v4 = vld [vmem:[%s1884_s1 + $0xf0] ss:$8 sps:$4 sm:$0xff]   ;;  %v1326_v6 = vld [vmem:[%s1884_s1 + $0x104] ss:$8 sps:$4 sm:$0xff]  }
  0x18   :  { %942 = vmatpush1.bf16.msra.mxu0 %v1263_v23  ;;  %857 = vmatprep.subr.bf16.mxu1 %v1264_v24  ;;  %v1320_v3 = vld [vmem:[%s1884_s1 + $0x2f4] ss:$8 sps:$4 sm:$0xff]   ;;  %v1323_v5 = vld [vmem:[%s1884_s1 + $0x2f0] ss:$8 sps:$4 sm:$0xff]   ;;  %v1329_v7 = vld [vmem:[%s1884_s1 + $0x304] ss:$8 sps:$4 sm:$0xff]  }
  0x19   :  { %943 = vmatprep.subr.bf16.mxu0 %v1266_v25  ;;  %v1324_v9 = vld [vmem:[%s1884_s1 + $0x100] ss:$8 sps:$4 sm:$0xff]   ;;  %v1332_v12 = vld [vmem:[%s1884_s1 + $0x114] ss:$8 sps:$4 sm:$0xff]   ;;  %v1330_v14 = vld [vmem:[%s1884_s1 + $0x110] ss:$8 sps:$4 sm:$0xff]  }
  0x1a   :  { %v1327_v11 = vld [vmem:[%s1884_s1 + $0x300] ss:$8 sps:$4 sm:$0xff]   ;;  %v1335_v13 = vld [vmem:[%s1884_s1 + $0x314] ss:$8 sps:$4 sm:$0xff]   ;;  %v1333_v15 = vld [vmem:[%s1884_s1 + $0x310] ss:$8 sps:$4 sm:$0xff]  }
  0x1b   :  { %858 = vmatpush1.bf16.msra.mxu1 %v1268_v26  ;;  %v1338_v16 = vld [vmem:[%s1884_s1 + $0x124] ss:$8 sps:$4 sm:$0xff]   ;;  %v1336_v18 = vld [vmem:[%s1884_s1 + $0x120] ss:$8 sps:$4 sm:$0xff]   ;;  %v1344_v20 = vld [vmem:[%s1884_s1 + $0x134] ss:$8 sps:$4 sm:$0xff]  }
  0x1c   :  { %944 = vmatpush1.bf16.msra.mxu0 %v1269_v27  ;;  %859 = vmatprep.subr.bf16.mxu1 %v1270_v28  ;;  %v1341_v17 = vld [vmem:[%s1884_s1 + $0x324] ss:$8 sps:$4 sm:$0xff]   ;;  %v1339_v19 = vld [vmem:[%s1884_s1 + $0x320] ss:$8 sps:$4 sm:$0xff]   ;;  %v1347_v21 = vld [vmem:[%s1884_s1 + $0x334] ss:$8 sps:$4 sm:$0xff]  }
  0x1d   :  { %945 = vmatprep.subr.bf16.mxu0 %v1272_v29  ;;  %v1342_v22 = vld [vmem:[%s1884_s1 + $0x130] ss:$8 sps:$4 sm:$0xff]   ;;  %v1350_v24 = vld [vmem:[%s1884_s1 + $0x144] ss:$8 sps:$4 sm:$0xff]   ;;  %v1348_v26 = vld [vmem:[%s1884_s1 + $0x140] ss:$8 sps:$4 sm:$0xff]  }
  0x1e   :  { %v1345_v23 = vld [vmem:[%s1884_s1 + $0x330] ss:$8 sps:$4 sm:$0xff]   ;;  %v1353_v25 = vld [vmem:[%s1884_s1 + $0x344] ss:$8 sps:$4 sm:$0xff]   ;;  %v1351_v27 = vld [vmem:[%s1884_s1 + $0x340] ss:$8 sps:$4 sm:$0xff]  }
  0x1f   :  { %860 = vmatpush1.bf16.msra.mxu1 %v1274_v30  ;;  %v1356_v28 = vld [vmem:[%s1884_s1 + $0x154] ss:$8 sps:$4 sm:$0xff]   ;;  %v1354_v30 = vld [vmem:[%s1884_s1 + $0x150] ss:$8 sps:$4 sm:$0xff]   ;;  %v1372_v48 = vld [vmem:[%s1884_s1 + $0x180] ss:$8 sps:$4 sm:$0xff]  }
  0x20   :  { %946 = vmatpush1.bf16.msra.mxu0 %v1275_v31  ;;  %861 = vmatprep.subr.bf16.mxu1 %v1276_v32  ;;  %v1359_v29 = vld [vmem:[%s1884_s1 + $0x354] ss:$8 sps:$4 sm:$0xff]   ;;  %v1357_v31 = vld [vmem:[%s1884_s1 + $0x350] ss:$8 sps:$4 sm:$0xff]   ;;  %v1362_v32 = vld [vmem:[%s1884_s1 + $0x164] ss:$8 sps:$4 sm:$0xff]  }
  0x21   :  { %947 = vmatprep.subr.bf16.mxu0 %v1278_v33  ;;  %v1365_v33 = vld [vmem:[%s1884_s1 + $0x364] ss:$8 sps:$4 sm:$0xff]   ;;  %v1375_v49 = vld [vmem:[%s1884_s1 + $0x380] ss:$8 sps:$4 sm:$0xff]   ;;  %v1378_v52 = vld [vmem:[%s1884_s1 + $0x190] ss:$8 sps:$4 sm:$0xff]  }
  0x22   :  { %v1381_v53 = vld [vmem:[%s1884_s1 + $0x390] ss:$8 sps:$4 sm:$0xff]   ;;  %v1386_v54 = vld [vmem:[%s1884_s1 + $0x1a4] ss:$8 sps:$4 sm:$0xff]  }
  0x23   :  { %862 = vmatpush1.bf16.msra.mxu1 %v1280_v34  ;;  %v1730_v34 = vld [vmem:[%s1885_s0 + $0x8] sm:$0xff] }
  0x24   :  { %948 = vmatpush1.bf16.msra.mxu0 %v1281_v35  ;;  %863 = vmatprep.subr.bf16.mxu1 %v1282_v36  ;;  %v1735_v35 = vld [vmem:[%s1885_s0 + $0x28] sm:$0xff]  ;;  %v1740_v36 = vld [vmem:[%s1885_s0 + $0x18] sm:$0xff] }
  0x25   :  { %949 = vmatprep.subr.bf16.mxu0 %v1284_v37  ;;  %v1745_v37 = vld [vmem:[%s1885_s0 + $0x38] sm:$0xff]  ;;  %v1389_v55 = vld [vmem:[%s1884_s1 + $0x3a4] ss:$8 sps:$4 sm:$0xff]  }
  0x27   :  { %864 = vmatpush1.bf16.msra.mxu1 %v1286_v38  ;;  %v1360_v38 = vld [vmem:[%s1884_s1 + $0x160] ss:$8 sps:$4 sm:$0xff]  }
  0x28   :  { %950 = vmatpush1.bf16.msra.mxu0 %v1287_v39  ;;  %865 = vmatprep.subr.bf16.mxu1 %v1288_v40  ;;  %v1363_v39 = vld [vmem:[%s1884_s1 + $0x360] ss:$8 sps:$4 sm:$0xff]   ;;  %v1079_v40 = vcombine.high %v1730_v34, %v1735_v35 }
  0x29   :  { %951 = vmatprep.subr.bf16.mxu0 %v1290_v41  ;;  %v1368_v41 = vld [vmem:[%s1884_s1 + $0x174] ss:$8 sps:$4 sm:$0xff]  }
  0x2b   :  { %866 = vmatpush1.bf16.msra.mxu1 %v1292_v42  ;;  %v1371_v42 = vld [vmem:[%s1884_s1 + $0x374] ss:$8 sps:$4 sm:$0xff]  }
  0x2c   :  { %952 = vmatpush1.bf16.msra.mxu0 %v1293_v43  ;;  %867 = vmatprep.subr.bf16.mxu1 %v1294_v44  ;;  %v1083_v43 = vcombine.high %v1740_v36, %v1745_v37  ;;  %v1366_v44 = vld [vmem:[%s1884_s1 + $0x170] ss:$8 sps:$4 sm:$0xff]  }
  0x2d   :  { %953 = vmatprep.subr.bf16.mxu0 %v1296_v45  ;;  %v1369_v45 = vld [vmem:[%s1884_s1 + $0x370] ss:$8 sps:$4 sm:$0xff]  }
  0x2f   :  { %868 = vmatpush1.bf16.msra.mxu1 %v1298_v46  ;;  %v1374_v46 = vld [vmem:[%s1884_s1 + $0x184] ss:$8 sps:$4 sm:$0xff]  }
  0x30   :  { %954 = vmatpush1.bf16.msra.mxu0 %v1299_v47  ;;  %869 = vmatprep.subr.bf16.mxu1 %v1300_v50  ;;  %v1377_v47 = vld [vmem:[%s1884_s1 + $0x384] ss:$8 sps:$4 sm:$0xff]   ;;  %v1380_v50 = vld [vmem:[%s1884_s1 + $0x194] ss:$8 sps:$4 sm:$0xff]  }
  0x31   :  { %955 = vmatprep.subr.bf16.mxu0 %v1302_v51  ;;  %v1383_v51 = vld [vmem:[%s1884_s1 + $0x394] ss:$8 sps:$4 sm:$0xff]  }
  0x33   :  { %870 = vmatpush1.bf16.msra.mxu1 %v1304_v56  ;;  %v1384_v56 = vld [vmem:[%s1884_s1 + $0x1a0] ss:$8 sps:$4 sm:$0xff]  }
  0x34   :  { %956 = vmatpush1.bf16.msra.mxu0 %v1305_v57  ;;  %871 = vmatprep.subr.bf16.mxu1 %v1306_v58  ;;  %v1387_v57 = vld [vmem:[%s1884_s1 + $0x3a0] ss:$8 sps:$4 sm:$0xff]   ;;  %v1392_v58 = vld [vmem:[%s1884_s1 + $0x1b4] ss:$8 sps:$4 sm:$0xff]  }
  0x35   :  { %957 = vmatprep.subr.bf16.mxu0 %v1308_v59  ;;  %v1395_v59 = vld [vmem:[%s1884_s1 + $0x3b4] ss:$8 sps:$4 sm:$0xff]  }
  0x37   :  { %872 = vmatpush1.bf16.msra.mxu1 %v1310_v60  ;;  %v1390_v60 = vld [vmem:[%s1884_s1 + $0x1b0] ss:$8 sps:$4 sm:$0xff]  }
  0x38   :  { %958 = vmatpush1.bf16.msra.mxu0 %v1311_v61  ;;  %873 = vmatprep.subr.bf16.mxu1 %v1312_v62  ;;  %v1393_v61 = vld [vmem:[%s1884_s1 + $0x3b0] ss:$8 sps:$4 sm:$0xff]   ;;  %v1398_v62 = vld [vmem:[%s1884_s1 + $0x1c4] ss:$8 sps:$4 sm:$0xff]  }
  0x39   :  { %959 = vmatprep.subr.bf16.mxu0 %v1314_v63  ;;  %v1401_v63 = vld [vmem:[%s1884_s1 + $0x3c4] ss:$8 sps:$4 sm:$0xff]  }
  0x3b   :  { %874 = vmatpush1.bf16.msra.mxu1 %v1316_v0  ;;  %v1396_v0 = vld [vmem:[%s1884_s1 + $0x1c0] ss:$8 sps:$4 sm:$0xff]  }
  0x3c   :  { %960 = vmatpush1.bf16.msra.mxu0 %v1317_v1  ;;  %875 = vmatprep.subr.bf16.mxu1 %v1318_v2  ;;  %v1399_v1 = vld [vmem:[%s1884_s1 + $0x3c0] ss:$8 sps:$4 sm:$0xff]   ;;  %v1404_v2 = vld [vmem:[%s1884_s1 + $0x1d4] ss:$8 sps:$4 sm:$0xff]  }
  0x3d   :  { %961 = vmatprep.subr.bf16.mxu0 %v1320_v3  ;;  %v1407_v3 = vld [vmem:[%s1884_s1 + $0x3d4] ss:$8 sps:$4 sm:$0xff]  }
  0x3f   :  { %876 = vmatpush1.bf16.msra.mxu1 %v1322_v4  ;;  %v1402_v4 = vld [vmem:[%s1884_s1 + $0x1d0] ss:$8 sps:$4 sm:$0xff]  }
  0x40   :  { %962 = vmatpush1.bf16.msra.mxu0 %v1323_v5  ;;  %888 = vmatprep.subr.bf16.mxu1 %v1326_v6  ;;  %v1405_v5 = vld [vmem:[%s1884_s1 + $0x3d0] ss:$8 sps:$4 sm:$0xff]   ;;  %v1410_v6 = vld [vmem:[%s1884_s1 + $0x1e4] ss:$8 sps:$4 sm:$0xff]  }
  0x41   :  { %974 = vmatprep.subr.bf16.mxu0 %v1329_v7  ;;  %v1413_v7 = vld [vmem:[%s1884_s1 + $0x3e4] ss:$8 sps:$4 sm:$0xff]  }
  0x42   :  { %878 = vmatmul.mubr.bf16.vlgmr.msra.gmra.mrb[0].mxu1 %v1076_v8  ;;  %v1408_v8 = vld [vmem:[%s1884_s1 + $0x1e0] ss:$8 sps:$4 sm:$0xff]  }
  0x43   :  { %964 = vmatmul.mubr.bf16.vlgmr.msra.gmra.mrb[0].mxu0 %v1080_v10  ;;  %889 = vmatpush1.bf16.msra.mxu1 %v1324_v9  ;;  %v1411_v9 = vld [vmem:[%s1884_s1 + $0x3e0] ss:$8 sps:$4 sm:$0xff]   ;;  %v1416_v10 = vld [vmem:[%s1884_s1 + $0x1f4] ss:$8 sps:$4 sm:$0xff]  }
  0x44   :  { %975 = vmatpush1.bf16.msra.mxu0 %v1327_v11  ;;  %890 = vmatprep.subr.bf16.mxu1 %v1332_v12  ;;  %v1419_v11 = vld [vmem:[%s1884_s1 + $0x3f4] ss:$8 sps:$4 sm:$0xff]   ;;  %v1414_v12 = vld [vmem:[%s1884_s1 + $0x1f0] ss:$8 sps:$4 sm:$0xff]  }
  0x45   :  { %976 = vmatprep.subr.bf16.mxu0 %v1335_v13  ;;  %920 = vmatprep.mubr.bf16.mxu1 %v1079_v40  ;;  %v1417_v13 = vld [vmem:[%s1884_s1 + $0x3f0] ss:$8 sps:$4 sm:$0xff]  }
  0x46   :  { %1006 = vmatprep.mubr.bf16.mxu0 %v1083_v43 }
  0x47   :  { %891 = vmatpush1.bf16.msra.mxu1 %v1330_v14  ;;  %v1078_v14 = vcombine.low %v1730_v34, %v1735_v35 }
  0x48   :  { %977 = vmatpush1.bf16.msra.mxu0 %v1333_v15  ;;  %892 = vmatprep.subr.bf16.mxu1 %v1338_v16  ;;  %v1082_v15 = vcombine.low %v1740_v36, %v1745_v37  ;;  %v1034_v16 = vlaneseq }
  0x49   :  { %978 = vmatprep.subr.bf16.mxu0 %v1341_v17 }
  0x4a   :  { %v1035_v17 = vshrl.u32 %v1034_v16, 7 }
  0x4b   :  { %893 = vmatpush1.bf16.msra.mxu1 %v1336_v18 }
  0x4c   :  { %979 = vmatpush1.bf16.msra.mxu0 %v1339_v19  ;;  %894 = vmatprep.subr.bf16.mxu1 %v1344_v20  ;;  %v1036_v18 = vsub.s32 0, %v1035_v17  ;;  %v1032_v19 = vld [vmem:[%s1886_s2] sm:$0x3]  ;;  %v1040_v20 = vsub.s32 1, %v1035_v17 }
  0x4d   :  { %980 = vmatprep.subr.bf16.mxu0 %v1347_v21  ;;  %v1048_v21 = vld [vmem:[%s1887_s3] sm:$0xff] }
  0x4f   :  { %895 = vmatpush1.bf16.msra.mxu1 %v1342_v22  ;;  %v1037_v22 = vrot.slane %v1032_v19, %v1036_v18 }
  0x50   :  { %981 = vmatpush1.bf16.msra.mxu0 %v1345_v23  ;;  %896 = vmatprep.subr.bf16.mxu1 %v1350_v24 }
  0x51   :  { %982 = vmatprep.subr.bf16.mxu0 %v1353_v25  ;;  %v1041_v25 = vrot.slane %v1032_v19, %v1040_v20 }
  0x53   :  { %897 = vmatpush1.bf16.msra.mxu1 %v1348_v26  ;;  %v1049_v26 = vld [vmem:[%s1887_s3 + $0x8] sm:$0xff] }
  0x54   :  { %983 = vmatpush1.bf16.msra.mxu0 %v1351_v27  ;;  %898 = vmatprep.subr.bf16.mxu1 %v1356_v28  ;;  %v1050_v28 = vunpack.c.l.bf16 %v1048_v21  ;;  %v1052_v37 = vunpack.c.l.bf16 %v1049_v26 }
  0x55   :  { %984 = vmatprep.subr.bf16.mxu0 %v1359_v29 }
  0x57   :  { %899 = vmatpush1.bf16.msra.mxu1 %v1354_v30 }
  0x58   :  { %985 = vmatpush1.bf16.msra.mxu0 %v1357_v31  ;;  %900 = vmatprep.subr.bf16.mxu1 %v1362_v32  ;;  %v1051_v32 = vunpack.c.h.bf16 %v1048_v21 }
  0x59   :  { %986 = vmatprep.subr.bf16.mxu0 %v1365_v33 }
  0x5b   :  { %901 = vmatpush1.bf16.msra.mxu1 %v1360_v38 }
  0x5c   :  { %987 = vmatpush1.bf16.msra.mxu0 %v1363_v39  ;;  %902 = vmatprep.subr.bf16.mxu1 %v1368_v41 }
  0x5d   :  { %988 = vmatprep.subr.bf16.mxu0 %v1371_v42  ;;  %v1053_v42 = vunpack.c.h.bf16 %v1049_v26 }
  0x5f   :  { %903 = vmatpush1.bf16.msra.mxu1 %v1366_v44 }
  0x60   :  { %989 = vmatpush1.bf16.msra.mxu0 %v1369_v45  ;;  %904 = vmatprep.subr.bf16.mxu1 %v1374_v46 }
  0x61   :  { %990 = vmatprep.subr.bf16.mxu0 %v1377_v47 }
  0x63   :  { %905 = vmatpush1.bf16.msra.mxu1 %v1372_v48 }
  0x64   :  { %991 = vmatpush1.bf16.msra.mxu0 %v1375_v49  ;;  %906 = vmatprep.subr.bf16.mxu1 %v1380_v50 }
  0x65   :  { %992 = vmatprep.subr.bf16.mxu0 %v1383_v51 }
  0x67   :  { %907 = vmatpush1.bf16.msra.mxu1 %v1378_v52 }
  0x68   :  { %993 = vmatpush1.bf16.msra.mxu0 %v1381_v53  ;;  %908 = vmatprep.subr.bf16.mxu1 %v1386_v54 }
  0x69   :  { %994 = vmatprep.subr.bf16.mxu0 %v1389_v55 }
  0x6b   :  { %909 = vmatpush1.bf16.msra.mxu1 %v1384_v56 }
  0x6c   :  { %995 = vmatpush1.bf16.msra.mxu0 %v1387_v57  ;;  %910 = vmatprep.subr.bf16.mxu1 %v1392_v58 }
  0x6d   :  { %996 = vmatprep.subr.bf16.mxu0 %v1395_v59 }
  0x6f   :  { %911 = vmatpush1.bf16.msra.mxu1 %v1390_v60 }
  0x70   :  { %997 = vmatpush1.bf16.msra.mxu0 %v1393_v61  ;;  %912 = vmatprep.subr.bf16.mxu1 %v1398_v62 }
  0x71   :  { %998 = vmatprep.subr.bf16.mxu0 %v1401_v63 }
  0x73   :  { %913 = vmatpush1.bf16.msra.mxu1 %v1396_v0 }
  0x74   :  { %999 = vmatpush1.bf16.msra.mxu0 %v1399_v1  ;;  %914 = vmatprep.subr.bf16.mxu1 %v1404_v2 }
  0x75   :  { %1000 = vmatprep.subr.bf16.mxu0 %v1407_v3 }
  0x77   :  { %915 = vmatpush1.bf16.msra.mxu1 %v1402_v4 }
  0x78   :  { %1001 = vmatpush1.bf16.msra.mxu0 %v1405_v5  ;;  %916 = vmatprep.subr.bf16.mxu1 %v1410_v6 }
  0x79   :  { %1002 = vmatprep.subr.bf16.mxu0 %v1413_v7 }
  0x7b   :  { %917 = vmatpush1.bf16.msra.mxu1 %v1408_v8 }
  0x7c   :  { %1003 = vmatpush1.bf16.msra.mxu0 %v1411_v9  ;;  %918 = vmatprep.subr.bf16.mxu1 %v1416_v10 }
  0x7d   :  { %1004 = vmatprep.subr.bf16.mxu0 %v1419_v11 }
  0x7f   :  { %919 = vmatpush1.bf16.msra.mxu1 %v1414_v12 }
  0x80   :  { %1005 = vmatpush1.bf16.msra.mxu0 %v1417_v13 }
  0x82   :  { %921 = vmatmul.mubr.bf16.vlgmr.msra.gmra.mrb[0].mxu1 %v1078_v14 }
  0x83   :  { %1007 = vmatmul.mubr.bf16.vlgmr.msra.gmra.mrb[0].mxu0 %v1082_v15 }
 0x155   :  { %v922_v23 = vpop.f32.mrb[0].mxu1 }
 0x156   :  { %v1008_v24 = vpop.f32.mrb[0].mxu0  ;;  %v924_v29 = vpop.f32.mrb[1].mxu1 }
 0x157   :  { %v1216_v27 = vadd.f32 %v1008_v24, %v922_v23  ;;  %v1010_v30 = vpop.f32.mrb[1].mxu0  ;;  %v926_v33 = vpop.f32.mrb[2].mxu1 }
 0x158   :  { %v1217_v31 = vadd.f32 %v1010_v30, %v924_v29  ;;  %v1012_v34 = vpop.f32.mrb[2].mxu0  ;;  %v928_v38 = vpop.f32.mrb[3].mxu1 }
 0x159   :  { %v1044_v35 = vadd.f32 %v1216_v27, %v1037_v22  ;;  %v1218_v36 = vadd.f32 %v1012_v34, %v926_v33  ;;  %v1014_v39 = vpop.f32.mrb[3].mxu0 }
 0x15a   :  { %v1045_v40 = vadd.f32 %v1217_v31, %v1041_v25  ;;  %v1219_v41 = vadd.f32 %v1014_v39, %v928_v38 }
 0x15b   :  { %v1054_v43 = vadd.f32 %v1050_v28, %v1044_v35  ;;  %v1046_v44 = vadd.f32 %v1218_v36, %v1037_v22 }
 0x15c   :  { %v1055_v45 = vadd.f32 %v1051_v32, %v1045_v40  ;;  %v1047_v46 = vadd.f32 %v1219_v41, %v1041_v25 }
 0x15d   :  { %v1056_v47 = vadd.f32 %v1052_v37, %v1046_v44 }
 0x15e   :  { %v1214_v48 = vpack.c.bf16 %v1055_v45, %v1054_v43  ;;  %v1057_v49 = vadd.f32 %v1053_v42, %v1047_v46 }
 0x160   :  { %1070 = vst [vmem:[%s1888_s4] sm:$0xff] %v1214_v48  ;;  %v1215_v50 = vpack.c.bf16 %v1057_v49, %v1056_v47 }
 0x162   :  { %1071 = vst [vmem:[%s1888_s4 + $0x8] sm:$0xff] %v1215_v50 }

</bundles_post_ra>
